<compile_context>
chip_gen: v7x
topology: tpu7x:2x2x1
jax: 0.10.0
libtpu: 0.0.40
codegen_flags: <defaults>
</compile_context>

<pallas_src>
import math
import numpy as np

import jax
import jax.numpy as jnp
from jax import lax
from jax.experimental import pallas as pl
from jax.experimental.pallas import tpu as pltpu  # noqa: F401  (TPU backend)

LN_EPS = 1e-5          # nn.LayerNorm default
LEAKY_SLOPE = 0.01     # nn.LeakyReLU default


# ----------------------------------------------------------------------------
# shared in-kernel math helpers (all f32)
# ----------------------------------------------------------------------------
def _ln(y, g, b):
    mu = jnp.mean(y, axis=-1, keepdims=True)
    var = jnp.mean(jnp.square(y - mu), axis=-1, keepdims=True)
    return (y - mu) * lax.rsqrt(var + LN_EPS) * g + b


def _leaky(y):
    return jnp.where(y > 0, y, LEAKY_SLOPE * y)


def _row(v2d, i):
    """Row i of a (k, N) parameter pack, kept 2-D as (1, N)."""
    return v2d[i:i + 1, :]


def _encoder_layer(xf, Wqkv, bqkv, Wo, W1, b1, W2, vec6, nhead, B, T, want_att):
    """Post-norm nn.TransformerEncoderLayer (eval mode) on a (B*T, dm) slab.

    vec6 rows: [bo, ln1_g, ln1_b, b2, ln2_g, ln2_b].
    Attention uses batched dot_general over the batch dim; only the head loop
    (nhead, static) remains; head outputs are concatenated in registers.
    """
    dm = Wo.shape[-1]
    hd = dm // nhead
    scale = 1.0 / math.sqrt(hd)

    qkv = jnp.dot(xf, Wqkv, preferred_element_type=jnp.float32) + bqkv   # (B*T, 3dm)
    qkv3 = qkv.reshape(B, T, 3 * dm)

    heads = []
    att_sum = None
    for h in range(nhead):                                   # static, tiny
        q = qkv3[:, :, h * hd:(h + 1) * hd]                  # (B, T, hd)
        k = qkv3[:, :, dm + h * hd:dm + (h + 1) * hd]
        v = qkv3[:, :, 2 * dm + h * hd:2 * dm + (h + 1) * hd]
        s = lax.dot_general(q, k, (((2,), (2,)), ((0,), (0,))),
                            preferred_element_type=jnp.float32) * scale  # (B,T,T)
        s = s - jnp.max(s, axis=-1, keepdims=True)
        p = jnp.exp(s)
        p = p / jnp.sum(p, axis=-1, keepdims=True)            # exact softmax
        if want_att:
            att_sum = p if att_sum is None else att_sum + p
        o = lax.dot_general(p, v, (((2,), (1,)), ((0,), (0,))),
                            preferred_element_type=jnp.float32)          # (B,T,hd)
        heads.append(o)

    attn = jnp.concatenate(heads, axis=-1).reshape(B * T, dm)
    proj = jnp.dot(attn, Wo, preferred_element_type=jnp.float32) + _row(vec6, 0)
    h1 = _ln(xf + proj, _row(vec6, 1), _row(vec6, 2))
    ff = jnp.maximum(jnp.dot(h1, W1, preferred_element_type=jnp.float32) + b1, 0.0)
    ff2 = jnp.dot(ff, W2, preferred_element_type=jnp.float32) + _row(vec6, 3)
    h2 = _ln(h1 + ff2, _row(vec6, 4), _row(vec6, 5))

    att = att_sum * (1.0 / nhead) if want_att else None
    return h2, att


# ----------------------------------------------------------------------------
# Stage A: FeatureExtractors + trunk_net + Multi_Group encoder stack
# ----------------------------------------------------------------------------
def _make_stage_a_kernel(B, S, D, E, G, H, L):
    feat = D // 2
    dg = E // G

    def kernel(x_ref, feW_ref, feV_ref, trW_ref, trV_ref, pe_ref,
               mWqkv_ref, mbqkv_ref, mWo_ref, mW1_ref, mb1_ref, mW2_ref, mV_ref,
               out_ref):
        x = x_ref[...].reshape(B * S, D)
        xg = x[:, :feat]
        xr = x[:, feat:]
        # presence masks (mask_g / mask_r in the reference)
        m_g = (jnp.sum(xg, axis=-1, keepdims=True) != 0).astype(jnp.float32)
        m_r = (jnp.sum(xr, axis=-1, keepdims=True) != 0).astype(jnp.float32)

        feW = feW_ref[...]
        feV = feV_ref[...]          # (2, 3, Eh): [bias, gamma, beta]
        gfe = _leaky(_ln(jnp.dot(xg * m_g, feW[0],
                                 preferred_element_type=jnp.float32)
                         + feV[0, 0:1, :], feV[0, 1:2, :], feV[0, 2:3, :]))
        rfe = _leaky(_ln(jnp.dot(xr * m_r, feW[1],
                                 preferred_element_type=jnp.float32)
                         + feV[1, 0:1, :], feV[1, 1:2, :], feV[1, 2:3, :]))
        comb = jnp.concatenate([gfe, rfe], axis=-1)           # (B*S, E)

        # trunk_net: Linear -> LN -> +PE -> LN   (PE tiled over batch, 2-D math)
        trV = trV_ref[...]          # (5, E): [b, ln1_g, ln1_b, ln2_g, ln2_b]
        t = jnp.dot(comb, trW_ref[...],
                    preferred_element_type=jnp.float32) + _row(trV, 0)
        t = _ln(t, _row(trV, 1), _row(trV, 2))
        pe2 = jnp.concatenate([pe_ref[...]] * B, axis=0)      # (B*S, E)
        t = _ln(t + pe2, _row(trV, 3), _row(trV, 4))          # (B*S, E)

        # Multi_Group encoders: group g = lanes [g*dg, (g+1)*dg)
        mWqkv = mWqkv_ref[...]
        mbqkv = mbqkv_ref[...]
        mWo = mWo_ref[...]
        mW1 = mW1_ref[...]
        mb1 = mb1_ref[...]
        mW2 = mW2_ref[...]
        mV = mV_ref[...]
        grp = [t[:, g * dg:(g + 1) * dg] for g in range(G)]
        for li in range(L):
            for g in range(G):
                grp[g], _ = _encoder_layer(
                    grp[g], mWqkv[li, g], mbqkv[li, g], mWo[li, g],
                    mW1[li, g], mb1[li, g], mW2[li, g], mV[li, g],
                    H, B, S, want_att=False)
        out = jnp.concatenate(grp, axis=-1)                   # (B*S, E)
        out_ref[...] = out.reshape(B, S, E)

    return kernel


# ----------------------------------------------------------------------------
# Stage B: channel embedding + channel encoder stack (+att) + retrunk_net
# ----------------------------------------------------------------------------
def _make_stage_b_kernel(B, S, E, Ec, H, L):
    T = E  # channel tokens

    def kernel(xt_ref, We_ref, be_ref, cWqkv_ref, cbqkv_ref, cWo_ref,
               cW1_ref, cb1_ref, cW2_ref, cV_ref, rtW_ref, rtV_ref,
               rt_ref, att_ref):
        x2 = xt_ref[...].reshape(B * T, S)                    # (B*E, S)
        c = jnp.dot(x2, We_ref[...],
                    preferred_element_type=jnp.float32) + be_ref[...]  # (B*E, Ec)

        cWqkv = cWqkv_ref[...]
        cbqkv = cbqkv_ref[...]
        cWo = cWo_ref[...]
        cW1 = cW1_ref[...]
        cb1 = cb1_ref[...]
        cW2 = cW2_ref[...]
        cV = cV_ref[...]
        att = None
        for li in range(L):
            want = (li == L - 1)
            c, a = _encoder_layer(c, cWqkv[li], cbqkv[li], cWo[li],
                                  cW1[li], cb1[li], cW2[li], cV[li],
                                  H, B, T, want_att=want)
            if want:
                att = a
        att_ref[...] = att                                     # (B, E, E)

        # retrunk_net: Linear(Ec->S) -> LeakyReLU -> LayerNorm(S)
        rtV = rtV_ref[...]          # (3, S): [b, gamma, beta]
        rt = jnp.dot(c, rtW_ref[...],
                     preferred_element_type=jnp.float32) + _row(rtV, 0)
        rt = _ln(_leaky(rt), _row(rtV, 1), _row(rtV, 2))
        rt_ref[...] = rt.reshape(B, T, S)                      # (B, E, S)

    return kernel


# ----------------------------------------------------------------------------
# Stage C: laynorm(out + res) + class_net
# ----------------------------------------------------------------------------
def _make_stage_c_kernel(B, S, E, Fc, C):
    def kernel(rt_ref, res_ref, lnV_ref, W1_ref, clV_ref, W2_ref, W3_ref, b3_ref,
               logits_ref):
        lnV = lnV_ref[...]          # (2, E): [gamma, beta]
        rt2 = rt_ref[...].reshape(B * S, E)
        res2 = res_ref[...].reshape(B * S, E)
        o2 = _ln(rt2 + res2, _row(lnV, 0), _row(lnV, 1))       # (B*S, E)
        o3 = o2.reshape(B, S, E)

        # class_net first Linear on the flattened (S*E) vector, computed as a
        # static sum over S of (B,E)x(E,Fc) matmuls (avoids a minor-dim-merging
        # reshape inside the kernel).
        W1 = W1_ref[...]            # (S*E, Fc)
        clV = clV_ref[...]          # (6, Fc): [b1, g1, be1, b2, g2, be2]
        h = None
        for s in range(S):
            term = jnp.dot(o3[:, s, :], W1[s * E:(s + 1) * E, :],
                           preferred_element_type=jnp.float32)
            h = term if h is None else h + term
        h = h + _row(clV, 0)
        h = _ln(_leaky(h), _row(clV, 1), _row(clV, 2))
        h = jnp.dot(h, W2_ref[...],
                    preferred_element_type=jnp.float32) + _row(clV, 3)
        h = _ln(_leaky(h), _row(clV, 4), _row(clV, 5))
        logits_ref[...] = jnp.dot(h, W3_ref[...],
                                  preferred_element_type=jnp.float32) + b3_ref[...]

    return kernel


# ----------------------------------------------------------------------------
# Parameter construction (deterministic, synthetic; packed vector layouts)
# ----------------------------------------------------------------------------
def sinusoidal_pe(seq_len, emb):
    pos = np.arange(seq_len)[:, None].astype(np.float32)
    div = np.exp(np.arange(0, emb, 2).astype(np.float32) * (-math.log(10000.0) / emb))
    pe = np.zeros((seq_len, emb), np.float32)
    pe[:, 0::2] = np.sin(pos * div)
    pe[:, 1::2] = np.cos(pos * div)
    return jnp.asarray(pe)


def init_params(key, cfg):
    D = cfg["input_size"]; E = cfg["emb_size"]; S = cfg["seq_len"]
    G = cfg["multi_group"]; F = cfg["nhid"]; Ec = cfg["emb_size_c"]
    Fc = cfg["nhid_c"]; C = cfg["nclasses"]; L = cfg["nlayers"]
    feat = D // 2
    Eh = E // 2
    dg = E // G

    keys = iter(jax.random.split(key, 64))

    def nk():
        return next(keys)

    def unif(shape, fan_in):
        bound = 1.0 / math.sqrt(fan_in)
        return jax.random.uniform(nk(), shape, jnp.float32, -bound, bound)

    def ones(shape):
        return jnp.ones(shape, jnp.float32)

    def zeros(shape):
        return jnp.zeros(shape, jnp.float32)

    p = {}
    # FeatureExtractors (g = index 0, r = index 1);  V rows: [b, gamma, beta]
    p["fe_W"] = unif((2, feat, Eh), feat)
    p["fe_V"] = jnp.concatenate(
        [unif((2, 1, Eh), feat), ones((2, 1, Eh)), zeros((2, 1, Eh))], axis=1)

    # trunk_net;  V rows: [b, ln1_g, ln1_b, ln2_g, ln2_b]
    p["tr_W"] = unif((E, E), E)
    p["tr_V"] = jnp.concatenate(
        [unif((1, E), E), ones((1, E)), zeros((1, E)), ones((1, E)), zeros((1, E))],
        axis=0)
    p["pe"] = sinusoidal_pe(S, E)

    # Multi_Group encoder stack;  V rows: [bo, ln1_g, ln1_b, b2, ln2_g, ln2_b]
    p["mg_Wqkv"] = unif((L, G, dg, 3 * dg), dg)
    p["mg_bqkv"] = unif((L, G, 1, 3 * dg), dg)
    p["mg_Wo"] = unif((L, G, dg, dg), dg)
    p["mg_W1"] = unif((L, G, dg, F), dg)
    p["mg_b1"] = unif((L, G, 1, F), dg)
    p["mg_W2"] = unif((L, G, F, dg), F)
    p["mg_V"] = jnp.concatenate(
        [unif((L, G, 1, dg), dg), ones((L, G, 1, dg)), zeros((L, G, 1, dg)),
         unif((L, G, 1, dg), F), ones((L, G, 1, dg)), zeros((L, G, 1, dg))], axis=2)

    # Channel transformer
    p["ca_We"] = unif((S, Ec), S)
    p["ca_be"] = unif((1, Ec), S)
    p["ca_Wqkv"] = unif((L, Ec, 3 * Ec), Ec)
    p["ca_bqkv"] = unif((L, 1, 3 * Ec), Ec)
    p["ca_Wo"] = unif((L, Ec, Ec), Ec)
    p["ca_W1"] = unif((L, Ec, Fc), Ec)
    p["ca_b1"] = unif((L, 1, Fc), Ec)
    p["ca_W2"] = unif((L, Fc, Ec), Fc)
    p["ca_V"] = jnp.concatenate(
        [unif((L, 1, Ec), Ec), ones((L, 1, Ec)), zeros((L, 1, Ec)),
         unif((L, 1, Ec), Fc), ones((L, 1, Ec)), zeros((L, 1, Ec))], axis=1)

    # retrunk_net;  V rows: [b, gamma, beta]
    p["rt_W"] = unif((Ec, S), Ec)
    p["rt_V"] = jnp.concatenate([unif((1, S), Ec), ones((1, S)), zeros((1, S))],
                                axis=0)

    # final laynorm;  V rows: [gamma, beta]
    p["ln_V"] = jnp.concatenate([ones((1, E)), zeros((1, E))], axis=0)

    # class_net;  V rows: [b1, g1, be1, b2, g2, be2]
    p["cl_W1"] = unif((S * E, Fc), S * E)
    p["cl_V"] = jnp.concatenate(
        [unif((1, Fc), S * E), ones((1, Fc)), zeros((1, Fc)),
         unif((1, Fc), Fc), ones((1, Fc)), zeros((1, Fc))], axis=0)
    p["cl_W2"] = unif((Fc, Fc), Fc)
    p["cl_W3"] = unif((Fc, C), Fc)
    p["cl_b3"] = unif((1, C), Fc)
    return p


# ----------------------------------------------------------------------------
# Full forward pass (3 fused pallas_calls + 2 tiny XLA transposes)
# ----------------------------------------------------------------------------
def mgmcformer_forward(params, cfg, x, mask=None):
    B, S, D = x.shape
    E = cfg["emb_size"]; G = cfg["multi_group"]; H = cfg["nhead"]
    L = cfg["nlayers"]; Ec = cfg["emb_size_c"]; Fc = cfg["nhid_c"]
    C = cfg["nclasses"]

    # Stage A: FE(g) + FE(r) + concat + trunk_net + Multi_Group encoders
    out = pl.pallas_call(
        _make_stage_a_kernel(B, S, D, E, G, H, L),
        out_shape=jax.ShapeDtypeStruct((B, S, E), jnp.float32),
    )(x, params["fe_W"], params["fe_V"], params["tr_W"], params["tr_V"],
      params["pe"], params["mg_Wqkv"], params["mg_bqkv"], params["mg_Wo"],
      params["mg_W1"], params["mg_b1"], params["mg_W2"], params["mg_V"])

    res = out
    src = out if mask is None else jnp.where(mask, 0.0, out)
    out_t = jnp.transpose(src, (0, 2, 1))                     # (B, E, S)

    # Stage B: channel embed + channel encoders (+att) + retrunk_net
    rt, att = pl.pallas_call(
        _make_stage_b_kernel(B, S, E, Ec, H, L),
        out_shape=(jax.ShapeDtypeStruct((B, E, S), jnp.float32),
                   jax.ShapeDtypeStruct((B, E, E), jnp.float32)),
    )(out_t, params["ca_We"], params["ca_be"], params["ca_Wqkv"],
      params["ca_bqkv"], params["ca_Wo"], params["ca_W1"], params["ca_b1"],
      params["ca_W2"], params["ca_V"], params["rt_W"], params["rt_V"])

    rt_t = jnp.transpose(rt, (0, 2, 1))                       # (B, S, E)

    # Stage C: laynorm(rt_t + res) + class_net
    logits = pl.pallas_call(
        _make_stage_c_kernel(B, S, E, Fc, C),
        out_shape=jax.ShapeDtypeStruct((B, C), jnp.float32),
    )(rt_t, res, params["ln_V"], params["cl_W1"], params["cl_V"],
      params["cl_W2"], params["cl_W3"], params["cl_b3"])

    return logits, att


# ----------------------------------------------------------------------------
if __name__ == "__main__":
    cfg = dict(multi_group=2, nclasses=3, seq_len=8, input_size=16,
               emb_size=32, nhid=64, emb_size_c=16, nhid_c=32,
               nhead=2, nlayers=1)

    key = jax.random.PRNGKey(0)
    pkey, xkey = jax.random.split(key)
    params = init_params(pkey, cfg)
    x = jax.random.normal(xkey, (2, cfg["seq_len"], cfg["input_size"]), jnp.float32)

    fwd = jax.jit(lambda p, xx: mgmcformer_forward(p, cfg, xx))
    logits, att = fwd(params, x)
    jax.block_until_ready((logits, att))

    assert logits.shape == (2, cfg["nclasses"])
    assert att.shape == (2, cfg["emb_size"], cfg["emb_size"])
    print("KERNEL_OK")
</pallas_src>

<mosaic_0001>
module attributes {stable_mosaic.version = 11 : i64} {
  func.func @kernel(%arg0: memref<2x8x32xf32, #tpu.memory_space<vmem>>, %arg1: memref<2x8x32xf32, #tpu.memory_space<vmem>>, %arg2: memref<2x32xf32, #tpu.memory_space<vmem>>, %arg3: memref<256x32xf32, #tpu.memory_space<vmem>>, %arg4: memref<6x32xf32, #tpu.memory_space<vmem>>, %arg5: memref<32x32xf32, #tpu.memory_space<vmem>>, %arg6: memref<32x3xf32, #tpu.memory_space<vmem>>, %arg7: memref<1x3xf32, #tpu.memory_space<vmem>>, %arg8: memref<2x3xf32, #tpu.memory_space<vmem>>) attributes {dimension_semantics = [], scalar_prefetch = 0 : i64, scratch_operands = 0 : i64, tpu.core_type = #tpu.core_type<tc>} {
    %c0 = arith.constant 0 : index
    %c0_0 = arith.constant 0 : index
    %0 = vector.load %arg2[%c0, %c0_0] : memref<2x32xf32, #tpu.memory_space<vmem>>, vector<2x32xf32>
    %c0_1 = arith.constant 0 : index
    %c0_2 = arith.constant 0 : index
    %c0_3 = arith.constant 0 : index
    %1 = vector.load %arg0[%c0_1, %c0_2, %c0_3] : memref<2x8x32xf32, #tpu.memory_space<vmem>>, vector<2x8x32xf32>
    %2 = vector.shape_cast %1 : vector<2x8x32xf32> to vector<16x32xf32>
    %c0_4 = arith.constant 0 : index
    %c0_5 = arith.constant 0 : index
    %c0_6 = arith.constant 0 : index
    %3 = vector.load %arg1[%c0_4, %c0_5, %c0_6] : memref<2x8x32xf32, #tpu.memory_space<vmem>>, vector<2x8x32xf32>
    %4 = vector.shape_cast %3 : vector<2x8x32xf32> to vector<16x32xf32>
    %5 = arith.addf %2, %4 : vector<16x32xf32>
    %6 = vector.extract_strided_slice %0 {offsets = [0, 0], sizes = [1, 32], strides = [1, 1]} : vector<2x32xf32> to vector<1x32xf32>
    %7 = vector.extract_strided_slice %0 {offsets = [1, 0], sizes = [1, 32], strides = [1, 1]} : vector<2x32xf32> to vector<1x32xf32>
    %cst = arith.constant dense<0.000000e+00> : vector<16xf32>
    %8 = vector.multi_reduction <add>, %5, %cst [1] : vector<16x32xf32> to vector<16xf32>
    %9 = vector.shape_cast %8 : vector<16xf32> to vector<16x1xf32>
    %cst_7 = arith.constant 3.200000e+01 : f32
    %10 = vector.broadcast %cst_7 : f32 to vector<16x1xf32>
    %11 = arith.divf %9, %10 : vector<16x1xf32>
    %12 = vector.broadcast %11 : vector<16x1xf32> to vector<16x32xf32>
    %13 = arith.subf %5, %12 : vector<16x32xf32>
    %14 = arith.mulf %13, %13 : vector<16x32xf32>
    %cst_8 = arith.constant dense<0.000000e+00> : vector<16xf32>
    %15 = vector.multi_reduction <add>, %14, %cst_8 [1] : vector<16x32xf32> to vector<16xf32>
    %16 = vector.shape_cast %15 : vector<16xf32> to vector<16x1xf32>
    %cst_9 = arith.constant 3.200000e+01 : f32
    %17 = vector.broadcast %cst_9 : f32 to vector<16x1xf32>
    %18 = arith.divf %16, %17 : vector<16x1xf32>
    %19 = vector.broadcast %11 : vector<16x1xf32> to vector<16x32xf32>
    %20 = arith.subf %5, %19 : vector<16x32xf32>
    %cst_10 = arith.constant 9.99999974E-6 : f32
    %21 = vector.broadcast %cst_10 : f32 to vector<16x1xf32>
    %22 = arith.addf %18, %21 : vector<16x1xf32>
    %23 = math.rsqrt %22 : vector<16x1xf32>
    %24 = vector.broadcast %23 : vector<16x1xf32> to vector<16x32xf32>
    %25 = arith.mulf %20, %24 : vector<16x32xf32>
    %26 = vector.broadcast %6 : vector<1x32xf32> to vector<16x32xf32>
    %27 = arith.mulf %25, %26 : vector<16x32xf32>
    %28 = vector.broadcast %7 : vector<1x32xf32> to vector<16x32xf32>
    %29 = arith.addf %27, %28 : vector<16x32xf32>
    %30 = vector.shape_cast %29 : vector<16x32xf32> to vector<2x8x32xf32>
    %c0_11 = arith.constant 0 : index
    %c0_12 = arith.constant 0 : index
    %31 = vector.load %arg3[%c0_11, %c0_12] : memref<256x32xf32, #tpu.memory_space<vmem>>, vector<256x32xf32>
    %c0_13 = arith.constant 0 : index
    %c0_14 = arith.constant 0 : index
    %32 = vector.load %arg4[%c0_13, %c0_14] : memref<6x32xf32, #tpu.memory_space<vmem>>, vector<6x32xf32>
    %33 = vector.extract_strided_slice %30 {offsets = [0, 0, 0], sizes = [2, 1, 32], strides = [1, 1, 1]} : vector<2x8x32xf32> to vector<2x1x32xf32>
    %34 = vector.shape_cast %33 : vector<2x1x32xf32> to vector<2x32xf32>
    %35 = vector.extract_strided_slice %31 {offsets = [0, 0], sizes = [32, 32], strides = [1, 1]} : vector<256x32xf32> to vector<32x32xf32>
    %cst_15 = arith.constant dense<0.000000e+00> : vector<2x32xf32>
    %36 = tpu.matmul %34, %35, %cst_15 {dimension_numbers = #tpu.dot_dimension_numbers<[1], [0], [0], [1], [0, 0, 1, 1], [], []>} : vector<2x32xf32>, vector<32x32xf32>, vector<2x32xf32> -> vector<2x32xf32>
    %37 = vector.extract_strided_slice %30 {offsets = [0, 1, 0], sizes = [2, 1, 32], strides = [1, 1, 1]} : vector<2x8x32xf32> to vector<2x1x32xf32>
    %38 = vector.shape_cast %37 : vector<2x1x32xf32> to vector<2x32xf32>
    %39 = vector.extract_strided_slice %31 {offsets = [32, 0], sizes = [32, 32], strides = [1, 1]} : vector<256x32xf32> to vector<32x32xf32>
    %cst_16 = arith.constant dense<0.000000e+00> : vector<2x32xf32>
    %40 = tpu.matmul %38, %39, %cst_16 {dimension_numbers = #tpu.dot_dimension_numbers<[1], [0], [0], [1], [0, 0, 1, 1], [], []>} : vector<2x32xf32>, vector<32x32xf32>, vector<2x32xf32> -> vector<2x32xf32>
    %41 = arith.addf %36, %40 : vector<2x32xf32>
    %42 = vector.extract_strided_slice %30 {offsets = [0, 2, 0], sizes = [2, 1, 32], strides = [1, 1, 1]} : vector<2x8x32xf32> to vector<2x1x32xf32>
    %43 = vector.shape_cast %42 : vector<2x1x32xf32> to vector<2x32xf32>
    %44 = vector.extract_strided_slice %31 {offsets = [64, 0], sizes = [32, 32], strides = [1, 1]} : vector<256x32xf32> to vector<32x32xf32>
    %cst_17 = arith.constant dense<0.000000e+00> : vector<2x32xf32>
    %45 = tpu.matmul %43, %44, %cst_17 {dimension_numbers = #tpu.dot_dimension_numbers<[1], [0], [0], [1], [0, 0, 1, 1], [], []>} : vector<2x32xf32>, vector<32x32xf32>, vector<2x32xf32> -> vector<2x32xf32>
    %46 = arith.addf %41, %45 : vector<2x32xf32>
    %47 = vector.extract_strided_slice %30 {offsets = [0, 3, 0], sizes = [2, 1, 32], strides = [1, 1, 1]} : vector<2x8x32xf32> to vector<2x1x32xf32>
    %48 = vector.shape_cast %47 : vector<2x1x32xf32> to vector<2x32xf32>
    %49 = vector.extract_strided_slice %31 {offsets = [96, 0], sizes = [32, 32], strides = [1, 1]} : vector<256x32xf32> to vector<32x32xf32>
    %cst_18 = arith.constant dense<0.000000e+00> : vector<2x32xf32>
    %50 = tpu.matmul %48, %49, %cst_18 {dimension_numbers = #tpu.dot_dimension_numbers<[1], [0], [0], [1], [0, 0, 1, 1], [], []>} : vector<2x32xf32>, vector<32x32xf32>, vector<2x32xf32> -> vector<2x32xf32>
    %51 = arith.addf %46, %50 : vector<2x32xf32>
    %52 = vector.extract_strided_slice %30 {offsets = [0, 4, 0], sizes = [2, 1, 32], strides = [1, 1, 1]} : vector<2x8x32xf32> to vector<2x1x32xf32>
    %53 = vector.shape_cast %52 : vector<2x1x32xf32> to vector<2x32xf32>
    %54 = vector.extract_strided_slice %31 {offsets = [128, 0], sizes = [32, 32], strides = [1, 1]} : vector<256x32xf32> to vector<32x32xf32>
    %cst_19 = arith.constant dense<0.000000e+00> : vector<2x32xf32>
    %55 = tpu.matmul %53, %54, %cst_19 {dimension_numbers = #tpu.dot_dimension_numbers<[1], [0], [0], [1], [0, 0, 1, 1], [], []>} : vector<2x32xf32>, vector<32x32xf32>, vector<2x32xf32> -> vector<2x32xf32>
    %56 = arith.addf %51, %55 : vector<2x32xf32>
    %57 = vector.extract_strided_slice %30 {offsets = [0, 5, 0], sizes = [2, 1, 32], strides = [1, 1, 1]} : vector<2x8x32xf32> to vector<2x1x32xf32>
    %58 = vector.shape_cast %57 : vector<2x1x32xf32> to vector<2x32xf32>
    %59 = vector.extract_strided_slice %31 {offsets = [160, 0], sizes = [32, 32], strides = [1, 1]} : vector<256x32xf32> to vector<32x32xf32>
    %cst_20 = arith.constant dense<0.000000e+00> : vector<2x32xf32>
    %60 = tpu.matmul %58, %59, %cst_20 {dimension_numbers = #tpu.dot_dimension_numbers<[1], [0], [0], [1], [0, 0, 1, 1], [], []>} : vector<2x32xf32>, vector<32x32xf32>, vector<2x32xf32> -> vector<2x32xf32>
    %61 = arith.addf %56, %60 : vector<2x32xf32>
    %62 = vector.extract_strided_slice %30 {offsets = [0, 6, 0], sizes = [2, 1, 32], strides = [1, 1, 1]} : vector<2x8x32xf32> to vector<2x1x32xf32>
    %63 = vector.shape_cast %62 : vector<2x1x32xf32> to vector<2x32xf32>
    %64 = vector.extract_strided_slice %31 {offsets = [192, 0], sizes = [32, 32], strides = [1, 1]} : vector<256x32xf32> to vector<32x32xf32>
    %cst_21 = arith.constant dense<0.000000e+00> : vector<2x32xf32>
    %65 = tpu.matmul %63, %64, %cst_21 {dimension_numbers = #tpu.dot_dimension_numbers<[1], [0], [0], [1], [0, 0, 1, 1], [], []>} : vector<2x32xf32>, vector<32x32xf32>, vector<2x32xf32> -> vector<2x32xf32>
    %66 = arith.addf %61, %65 : vector<2x32xf32>
    %67 = vector.extract_strided_slice %30 {offsets = [0, 7, 0], sizes = [2, 1, 32], strides = [1, 1, 1]} : vector<2x8x32xf32> to vector<2x1x32xf32>
    %68 = vector.shape_cast %67 : vector<2x1x32xf32> to vector<2x32xf32>
    %69 = vector.extract_strided_slice %31 {offsets = [224, 0], sizes = [32, 32], strides = [1, 1]} : vector<256x32xf32> to vector<32x32xf32>
    %cst_22 = arith.constant dense<0.000000e+00> : vector<2x32xf32>
    %70 = tpu.matmul %68, %69, %cst_22 {dimension_numbers = #tpu.dot_dimension_numbers<[1], [0], [0], [1], [0, 0, 1, 1], [], []>} : vector<2x32xf32>, vector<32x32xf32>, vector<2x32xf32> -> vector<2x32xf32>
    %71 = arith.addf %66, %70 : vector<2x32xf32>
    %72 = vector.extract_strided_slice %32 {offsets = [0, 0], sizes = [1, 32], strides = [1, 1]} : vector<6x32xf32> to vector<1x32xf32>
    %73 = vector.broadcast %72 : vector<1x32xf32> to vector<2x32xf32>
    %74 = arith.addf %71, %73 : vector<2x32xf32>
    %cst_23 = arith.constant 0.000000e+00 : f32
    %75 = vector.broadcast %cst_23 : f32 to vector<2x32xf32>
    %76 = arith.cmpf ogt, %74, %75 : vector<2x32xf32>
    %cst_24 = arith.constant 0.00999999977 : f32
    %77 = vector.broadcast %cst_24 : f32 to vector<2x32xf32>
    %78 = arith.mulf %77, %74 : vector<2x32xf32>
    %79 = arith.select %76, %74, %78 : vector<2x32xi1>, vector<2x32xf32>
    %80 = vector.extract_strided_slice %32 {offsets = [1, 0], sizes = [1, 32], strides = [1, 1]} : vector<6x32xf32> to vector<1x32xf32>
    %81 = vector.extract_strided_slice %32 {offsets = [2, 0], sizes = [1, 32], strides = [1, 1]} : vector<6x32xf32> to vector<1x32xf32>
    %cst_25 = arith.constant dense<0.000000e+00> : vector<2xf32>
    %82 = vector.multi_reduction <add>, %79, %cst_25 [1] : vector<2x32xf32> to vector<2xf32>
    %83 = vector.shape_cast %82 : vector<2xf32> to vector<2x1xf32>
    %cst_26 = arith.constant 3.200000e+01 : f32
    %84 = vector.broadcast %cst_26 : f32 to vector<2x1xf32>
    %85 = arith.divf %83, %84 : vector<2x1xf32>
    %86 = vector.broadcast %85 : vector<2x1xf32> to vector<2x32xf32>
    %87 = arith.subf %79, %86 : vector<2x32xf32>
    %88 = arith.mulf %87, %87 : vector<2x32xf32>
    %cst_27 = arith.constant dense<0.000000e+00> : vector<2xf32>
    %89 = vector.multi_reduction <add>, %88, %cst_27 [1] : vector<2x32xf32> to vector<2xf32>
    %90 = vector.shape_cast %89 : vector<2xf32> to vector<2x1xf32>
    %cst_28 = arith.constant 3.200000e+01 : f32
    %91 = vector.broadcast %cst_28 : f32 to vector<2x1xf32>
    %92 = arith.divf %90, %91 : vector<2x1xf32>
    %93 = vector.broadcast %85 : vector<2x1xf32> to vector<2x32xf32>
    %94 = arith.subf %79, %93 : vector<2x32xf32>
    %cst_29 = arith.constant 9.99999974E-6 : f32
    %95 = vector.broadcast %cst_29 : f32 to vector<2x1xf32>
    %96 = arith.addf %92, %95 : vector<2x1xf32>
    %97 = math.rsqrt %96 : vector<2x1xf32>
    %98 = vector.broadcast %97 : vector<2x1xf32> to vector<2x32xf32>
    %99 = arith.mulf %94, %98 : vector<2x32xf32>
    %100 = vector.broadcast %80 : vector<1x32xf32> to vector<2x32xf32>
    %101 = arith.mulf %99, %100 : vector<2x32xf32>
    %102 = vector.broadcast %81 : vector<1x32xf32> to vector<2x32xf32>
    %103 = arith.addf %101, %102 : vector<2x32xf32>
    %c0_30 = arith.constant 0 : index
    %c0_31 = arith.constant 0 : index
    %104 = vector.load %arg5[%c0_30, %c0_31] : memref<32x32xf32, #tpu.memory_space<vmem>>, vector<32x32xf32>
    %cst_32 = arith.constant dense<0.000000e+00> : vector<2x32xf32>
    %105 = tpu.matmul %103, %104, %cst_32 {dimension_numbers = #tpu.dot_dimension_numbers<[1], [0], [0], [1], [0, 0, 1, 1], [], []>} : vector<2x32xf32>, vector<32x32xf32>, vector<2x32xf32> -> vector<2x32xf32>
    %106 = vector.extract_strided_slice %32 {offsets = [3, 0], sizes = [1, 32], strides = [1, 1]} : vector<6x32xf32> to vector<1x32xf32>
    %107 = vector.broadcast %106 : vector<1x32xf32> to vector<2x32xf32>
    %108 = arith.addf %105, %107 : vector<2x32xf32>
    %cst_33 = arith.constant 0.000000e+00 : f32
    %109 = vector.broadcast %cst_33 : f32 to vector<2x32xf32>
    %110 = arith.cmpf ogt, %108, %109 : vector<2x32xf32>
    %cst_34 = arith.constant 0.00999999977 : f32
    %111 = vector.broadcast %cst_34 : f32 to vector<2x32xf32>
    %112 = arith.mulf %111, %108 : vector<2x32xf32>
    %113 = arith.select %110, %108, %112 : vector<2x32xi1>, vector<2x32xf32>
    %114 = vector.extract_strided_slice %32 {offsets = [4, 0], sizes = [1, 32], strides = [1, 1]} : vector<6x32xf32> to vector<1x32xf32>
    %115 = vector.extract_strided_slice %32 {offsets = [5, 0], sizes = [1, 32], strides = [1, 1]} : vector<6x32xf32> to vector<1x32xf32>
    %cst_35 = arith.constant dense<0.000000e+00> : vector<2xf32>
    %116 = vector.multi_reduction <add>, %113, %cst_35 [1] : vector<2x32xf32> to vector<2xf32>
    %117 = vector.shape_cast %116 : vector<2xf32> to vector<2x1xf32>
    %cst_36 = arith.constant 3.200000e+01 : f32
    %118 = vector.broadcast %cst_36 : f32 to vector<2x1xf32>
    %119 = arith.divf %117, %118 : vector<2x1xf32>
    %120 = vector.broadcast %119 : vector<2x1xf32> to vector<2x32xf32>
    %121 = arith.subf %113, %120 : vector<2x32xf32>
    %122 = arith.mulf %121, %121 : vector<2x32xf32>
    %cst_37 = arith.constant dense<0.000000e+00> : vector<2xf32>
    %123 = vector.multi_reduction <add>, %122, %cst_37 [1] : vector<2x32xf32> to vector<2xf32>
    %124 = vector.shape_cast %123 : vector<2xf32> to vector<2x1xf32>
    %cst_38 = arith.constant 3.200000e+01 : f32
    %125 = vector.broadcast %cst_38 : f32 to vector<2x1xf32>
    %126 = arith.divf %124, %125 : vector<2x1xf32>
    %127 = vector.broadcast %119 : vector<2x1xf32> to vector<2x32xf32>
    %128 = arith.subf %113, %127 : vector<2x32xf32>
    %cst_39 = arith.constant 9.99999974E-6 : f32
    %129 = vector.broadcast %cst_39 : f32 to vector<2x1xf32>
    %130 = arith.addf %126, %129 : vector<2x1xf32>
    %131 = math.rsqrt %130 : vector<2x1xf32>
    %132 = vector.broadcast %131 : vector<2x1xf32> to vector<2x32xf32>
    %133 = arith.mulf %128, %132 : vector<2x32xf32>
    %134 = vector.broadcast %114 : vector<1x32xf32> to vector<2x32xf32>
    %135 = arith.mulf %133, %134 : vector<2x32xf32>
    %136 = vector.broadcast %115 : vector<1x32xf32> to vector<2x32xf32>
    %137 = arith.addf %135, %136 : vector<2x32xf32>
    %c0_40 = arith.constant 0 : index
    %c0_41 = arith.constant 0 : index
    %138 = vector.load %arg6[%c0_40, %c0_41] : memref<32x3xf32, #tpu.memory_space<vmem>>, vector<32x3xf32>
    %cst_42 = arith.constant dense<0.000000e+00> : vector<2x3xf32>
    %139 = tpu.matmul %137, %138, %cst_42 {dimension_numbers = #tpu.dot_dimension_numbers<[1], [0], [0], [1], [0, 0, 1, 1], [], []>} : vector<2x32xf32>, vector<32x3xf32>, vector<2x3xf32> -> vector<2x3xf32>
    %c0_43 = arith.constant 0 : index
    %c0_44 = arith.constant 0 : index
    %140 = vector.load %arg7[%c0_43, %c0_44] : memref<1x3xf32, #tpu.memory_space<vmem>>, vector<1x3xf32>
    %141 = vector.broadcast %140 : vector<1x3xf32> to vector<2x3xf32>
    %142 = arith.addf %139, %141 : vector<2x3xf32>
    %c0_45 = arith.constant 0 : index
    %c0_46 = arith.constant 0 : index
    %143 = vector.load %arg8[%c0_45, %c0_46] : memref<2x3xf32, #tpu.memory_space<vmem>>, vector<2x3xf32>
    tpu.vector_store %arg8[%c0_45, %c0_46], %142 {strides = array<i32>} : memref<2x3xf32, #tpu.memory_space<vmem>>, vector<2x3xf32>,
    return
  }
}

module attributes {stable_mosaic.version = 11 : i64} {
  func.func @kernel(%arg0: memref<2x32x8xf32, #tpu.memory_space<vmem>>, %arg1: memref<8x16xf32, #tpu.memory_space<vmem>>, %arg2: memref<1x16xf32, #tpu.memory_space<vmem>>, %arg3: memref<1x16x48xf32, #tpu.memory_space<vmem>>, %arg4: memref<1x1x48xf32, #tpu.memory_space<vmem>>, %arg5: memref<1x16x16xf32, #tpu.memory_space<vmem>>, %arg6: memref<1x16x32xf32, #tpu.memory_space<vmem>>, %arg7: memref<1x1x32xf32, #tpu.memory_space<vmem>>, %arg8: memref<1x32x16xf32, #tpu.memory_space<vmem>>, %arg9: memref<1x6x16xf32, #tpu.memory_space<vmem>>, %arg10: memref<16x8xf32, #tpu.memory_space<vmem>>, %arg11: memref<3x8xf32, #tpu.memory_space<vmem>>, %arg12: memref<2x32x8xf32, #tpu.memory_space<vmem>>, %arg13: memref<2x32x32xf32, #tpu.memory_space<vmem>>) attributes {dimension_semantics = [], scalar_prefetch = 0 : i64, scratch_operands = 0 : i64, tpu.core_type = #tpu.core_type<tc>} {
    %c0 = arith.constant 0 : index
    %c0_0 = arith.constant 0 : index
    %c0_1 = arith.constant 0 : index
    %0 = vector.load %arg0[%c0, %c0_0, %c0_1] : memref<2x32x8xf32, #tpu.memory_space<vmem>>, vector<2x32x8xf32>
    %1 = vector.shape_cast %0 : vector<2x32x8xf32> to vector<64x8xf32>
    %c0_2 = arith.constant 0 : index
    %c0_3 = arith.constant 0 : index
    %2 = vector.load %arg1[%c0_2, %c0_3] : memref<8x16xf32, #tpu.memory_space<vmem>>, vector<8x16xf32>
    %cst = arith.constant dense<0.000000e+00> : vector<64x16xf32>
    %3 = tpu.matmul %1, %2, %cst {dimension_numbers = #tpu.dot_dimension_numbers<[1], [0], [0], [1], [0, 0, 1, 1], [], []>} : vector<64x8xf32>, vector<8x16xf32>, vector<64x16xf32> -> vector<64x16xf32>
    %c0_4 = arith.constant 0 : index
    %c0_5 = arith.constant 0 : index
    %4 = vector.load %arg2[%c0_4, %c0_5] : memref<1x16xf32, #tpu.memory_space<vmem>>, vector<1x16xf32>
    %5 = vector.broadcast %4 : vector<1x16xf32> to vector<64x16xf32>
    %6 = arith.addf %3, %5 : vector<64x16xf32>
    %c0_6 = arith.constant 0 : index
    %c0_7 = arith.constant 0 : index
    %c0_8 = arith.constant 0 : index
    %7 = vector.load %arg3[%c0_6, %c0_7, %c0_8] : memref<1x16x48xf32, #tpu.memory_space<vmem>>, vector<1x16x48xf32>
    %c0_9 = arith.constant 0 : index
    %c0_10 = arith.constant 0 : index
    %c0_11 = arith.constant 0 : index
    %8 = vector.load %arg4[%c0_9, %c0_10, %c0_11] : memref<1x1x48xf32, #tpu.memory_space<vmem>>, vector<1x1x48xf32>
    %c0_12 = arith.constant 0 : index
    %c0_13 = arith.constant 0 : index
    %c0_14 = arith.constant 0 : index
    %9 = vector.load %arg5[%c0_12, %c0_13, %c0_14] : memref<1x16x16xf32, #tpu.memory_space<vmem>>, vector<1x16x16xf32>
    %c0_15 = arith.constant 0 : index
    %c0_16 = arith.constant 0 : index
    %c0_17 = arith.constant 0 : index
    %10 = vector.load %arg6[%c0_15, %c0_16, %c0_17] : memref<1x16x32xf32, #tpu.memory_space<vmem>>, vector<1x16x32xf32>
    %c0_18 = arith.constant 0 : index
    %c0_19 = arith.constant 0 : index
    %c0_20 = arith.constant 0 : index
    %11 = vector.load %arg7[%c0_18, %c0_19, %c0_20] : memref<1x1x32xf32, #tpu.memory_space<vmem>>, vector<1x1x32xf32>
    %c0_21 = arith.constant 0 : index
    %c0_22 = arith.constant 0 : index
    %c0_23 = arith.constant 0 : index
    %12 = vector.load %arg8[%c0_21, %c0_22, %c0_23] : memref<1x32x16xf32, #tpu.memory_space<vmem>>, vector<1x32x16xf32>
    %c0_24 = arith.constant 0 : index
    %c0_25 = arith.constant 0 : index
    %c0_26 = arith.constant 0 : index
    %13 = vector.load %arg9[%c0_24, %c0_25, %c0_26] : memref<1x6x16xf32, #tpu.memory_space<vmem>>, vector<1x6x16xf32>
    %14 = vector.shape_cast %7 : vector<1x16x48xf32> to vector<16x48xf32>
    %15 = vector.shape_cast %8 : vector<1x1x48xf32> to vector<1x48xf32>
    %16 = vector.shape_cast %9 : vector<1x16x16xf32> to vector<16x16xf32>
    %17 = vector.shape_cast %10 : vector<1x16x32xf32> to vector<16x32xf32>
    %18 = vector.shape_cast %11 : vector<1x1x32xf32> to vector<1x32xf32>
    %19 = vector.shape_cast %12 : vector<1x32x16xf32> to vector<32x16xf32>
    %20 = vector.shape_cast %13 : vector<1x6x16xf32> to vector<6x16xf32>
    %cst_27 = arith.constant dense<0.000000e+00> : vector<64x48xf32>
    %21 = tpu.matmul %6, %14, %cst_27 {dimension_numbers = #tpu.dot_dimension_numbers<[1], [0], [0], [1], [0, 0, 1, 1], [], []>} : vector<64x16xf32>, vector<16x48xf32>, vector<64x48xf32> -> vector<64x48xf32>
    %22 = vector.broadcast %15 : vector<1x48xf32> to vector<64x48xf32>
    %23 = arith.addf %21, %22 : vector<64x48xf32>
    %24 = vector.shape_cast %23 : vector<64x48xf32> to vector<2x32x48xf32>
    %25 = vector.extract_strided_slice %24 {offsets = [0, 0, 0], sizes = [2, 32, 8], strides = [1, 1, 1]} : vector<2x32x48xf32> to vector<2x32x8xf32>
    %26 = vector.extract_strided_slice %24 {offsets = [0, 0, 16], sizes = [2, 32, 8], strides = [1, 1, 1]} : vector<2x32x48xf32> to vector<2x32x8xf32>
    %27 = vector.extract_strided_slice %24 {offsets = [0, 0, 32], sizes = [2, 32, 8], strides = [1, 1, 1]} : vector<2x32x48xf32> to vector<2x32x8xf32>
    %cst_28 = arith.constant dense<0.000000e+00> : vector<2x32x32xf32>
    %28 = tpu.matmul %25, %26, %cst_28 {dimension_numbers = #tpu.dot_dimension_numbers<[2], [2], [1], [1], [0, 0, 0, 1, 1, 1], [0], [0]>} : vector<2x32x8xf32>, vector<2x32x8xf32>, vector<2x32x32xf32> -> vector<2x32x32xf32>
    %cst_29 = arith.constant 0.353553385 : f32
    %29 = vector.broadcast %cst_29 : f32 to vector<2x32x32xf32>
    %30 = arith.mulf %28, %29 : vector<2x32x32xf32>
    %cst_30 = arith.constant dense<0xFF800000> : vector<2x32xf32>
    %31 = vector.multi_reduction <maximumf>, %30, %cst_30 [2] : vector<2x32x32xf32> to vector<2x32xf32>
    %32 = vector.shape_cast %31 : vector<2x32xf32> to vector<2x32x1xf32>
    %33 = vector.broadcast %32 : vector<2x32x1xf32> to vector<2x32x32xf32>
    %34 = arith.subf %30, %33 : vector<2x32x32xf32>
    %35 = math.exp %34 : vector<2x32x32xf32>
    %cst_31 = arith.constant dense<0.000000e+00> : vector<2x32xf32>
    %36 = vector.multi_reduction <add>, %35, %cst_31 [2] : vector<2x32x32xf32> to vector<2x32xf32>
    %37 = vector.shape_cast %36 : vector<2x32xf32> to vector<2x32x1xf32>
    %38 = vector.broadcast %37 : vector<2x32x1xf32> to vector<2x32x32xf32>
    %39 = arith.divf %35, %38 : vector<2x32x32xf32>
    %cst_32 = arith.constant dense<0.000000e+00> : vector<2x32x8xf32>
    %40 = tpu.matmul %39, %27, %cst_32 {dimension_numbers = #tpu.dot_dimension_numbers<[2], [1], [1], [2], [0, 0, 0, 1, 1, 2], [0], [0]>} : vector<2x32x32xf32>, vector<2x32x8xf32>, vector<2x32x8xf32> -> vector<2x32x8xf32>
    %41 = vector.extract_strided_slice %24 {offsets = [0, 0, 8], sizes = [2, 32, 8], strides = [1, 1, 1]} : vector<2x32x48xf32> to vector<2x32x8xf32>
    %42 = vector.extract_strided_slice %24 {offsets = [0, 0, 24], sizes = [2, 32, 8], strides = [1, 1, 1]} : vector<2x32x48xf32> to vector<2x32x8xf32>
    %43 = vector.extract_strided_slice %24 {offsets = [0, 0, 40], sizes = [2, 32, 8], strides = [1, 1, 1]} : vector<2x32x48xf32> to vector<2x32x8xf32>
    %cst_33 = arith.constant dense<0.000000e+00> : vector<2x32x32xf32>
    %44 = tpu.matmul %41, %42, %cst_33 {dimension_numbers = #tpu.dot_dimension_numbers<[2], [2], [1], [1], [0, 0, 0, 1, 1, 1], [0], [0]>} : vector<2x32x8xf32>, vector<2x32x8xf32>, vector<2x32x32xf32> -> vector<2x32x32xf32>
    %cst_34 = arith.constant 0.353553385 : f32
    %45 = vector.broadcast %cst_34 : f32 to vector<2x32x32xf32>
    %46 = arith.mulf %44, %45 : vector<2x32x32xf32>
    %cst_35 = arith.constant dense<0xFF800000> : vector<2x32xf32>
    %47 = vector.multi_reduction <maximumf>, %46, %cst_35 [2] : vector<2x32x32xf32> to vector<2x32xf32>
    %48 = vector.shape_cast %47 : vector<2x32xf32> to vector<2x32x1xf32>
    %49 = vector.broadcast %48 : vector<2x32x1xf32> to vector<2x32x32xf32>
    %50 = arith.subf %46, %49 : vector<2x32x32xf32>
    %51 = math.exp %50 : vector<2x32x32xf32>
    %cst_36 = arith.constant dense<0.000000e+00> : vector<2x32xf32>
    %52 = vector.multi_reduction <add>, %51, %cst_36 [2] : vector<2x32x32xf32> to vector<2x32xf32>
    %53 = vector.shape_cast %52 : vector<2x32xf32> to vector<2x32x1xf32>
    %54 = vector.broadcast %53 : vector<2x32x1xf32> to vector<2x32x32xf32>
    %55 = arith.divf %51, %54 : vector<2x32x32xf32>
    %56 = arith.addf %39, %55 : vector<2x32x32xf32>
    %cst_37 = arith.constant dense<0.000000e+00> : vector<2x32x8xf32>
    %57 = tpu.matmul %55, %43, %cst_37 {dimension_numbers = #tpu.dot_dimension_numbers<[2], [1], [1], [2], [0, 0, 0, 1, 1, 2], [0], [0]>} : vector<2x32x32xf32>, vector<2x32x8xf32>, vector<2x32x8xf32> -> vector<2x32x8xf32>
    %58 = tpu.concatenate %40, %57 in 2 : vector<2x32x8xf32>, vector<2x32x8xf32> -> vector<2x32x16xf32>
    %59 = vector.shape_cast %58 : vector<2x32x16xf32> to vector<64x16xf32>
    %cst_38 = arith.constant dense<0.000000e+00> : vector<64x16xf32>
    %60 = tpu.matmul %59, %16, %cst_38 {dimension_numbers = #tpu.dot_dimension_numbers<[1], [0], [0], [1], [0, 0, 1, 1], [], []>} : vector<64x16xf32>, vector<16x16xf32>, vector<64x16xf32> -> vector<64x16xf32>
    %61 = vector.extract_strided_slice %20 {offsets = [0, 0], sizes = [1, 16], strides = [1, 1]} : vector<6x16xf32> to vector<1x16xf32>
    %62 = vector.broadcast %61 : vector<1x16xf32> to vector<64x16xf32>
    %63 = arith.addf %60, %62 : vector<64x16xf32>
    %64 = arith.addf %6, %63 : vector<64x16xf32>
    %65 = vector.extract_strided_slice %20 {offsets = [1, 0], sizes = [1, 16], strides = [1, 1]} : vector<6x16xf32> to vector<1x16xf32>
    %66 = vector.extract_strided_slice %20 {offsets = [2, 0], sizes = [1, 16], strides = [1, 1]} : vector<6x16xf32> to vector<1x16xf32>
    %cst_39 = arith.constant dense<0.000000e+00> : vector<64xf32>
    %67 = vector.multi_reduction <add>, %64, %cst_39 [1] : vector<64x16xf32> to vector<64xf32>
    %68 = vector.shape_cast %67 : vector<64xf32> to vector<64x1xf32>
    %cst_40 = arith.constant 1.600000e+01 : f32
    %69 = vector.broadcast %cst_40 : f32 to vector<64x1xf32>
    %70 = arith.divf %68, %69 : vector<64x1xf32>
    %71 = vector.broadcast %70 : vector<64x1xf32> to vector<64x16xf32>
    %72 = arith.subf %64, %71 : vector<64x16xf32>
    %73 = arith.mulf %72, %72 : vector<64x16xf32>
    %cst_41 = arith.constant dense<0.000000e+00> : vector<64xf32>
    %74 = vector.multi_reduction <add>, %73, %cst_41 [1] : vector<64x16xf32> to vector<64xf32>
    %75 = vector.shape_cast %74 : vector<64xf32> to vector<64x1xf32>
    %cst_42 = arith.constant 1.600000e+01 : f32
    %76 = vector.broadcast %cst_42 : f32 to vector<64x1xf32>
    %77 = arith.divf %75, %76 : vector<64x1xf32>
    %78 = vector.broadcast %70 : vector<64x1xf32> to vector<64x16xf32>
    %79 = arith.subf %64, %78 : vector<64x16xf32>
    %cst_43 = arith.constant 9.99999974E-6 : f32
    %80 = vector.broadcast %cst_43 : f32 to vector<64x1xf32>
    %81 = arith.addf %77, %80 : vector<64x1xf32>
    %82 = math.rsqrt %81 : vector<64x1xf32>
    %83 = vector.broadcast %82 : vector<64x1xf32> to vector<64x16xf32>
    %84 = arith.mulf %79, %83 : vector<64x16xf32>
    %85 = vector.broadcast %65 : vector<1x16xf32> to vector<64x16xf32>
    %86 = arith.mulf %84, %85 : vector<64x16xf32>
    %87 = vector.broadcast %66 : vector<1x16xf32> to vector<64x16xf32>
    %88 = arith.addf %86, %87 : vector<64x16xf32>
    %cst_44 = arith.constant dense<0.000000e+00> : vector<64x32xf32>
    %89 = tpu.matmul %88, %17, %cst_44 {dimension_numbers = #tpu.dot_dimension_numbers<[1], [0], [0], [1], [0, 0, 1, 1], [], []>} : vector<64x16xf32>, vector<16x32xf32>, vector<64x32xf32> -> vector<64x32xf32>
    %90 = vector.broadcast %18 : vector<1x32xf32> to vector<64x32xf32>
    %91 = arith.addf %89, %90 : vector<64x32xf32>
    %cst_45 = arith.constant 0.000000e+00 : f32
    %92 = vector.broadcast %cst_45 : f32 to vector<64x32xf32>
    %93 = arith.maximumf %91, %92 : vector<64x32xf32>
    %cst_46 = arith.constant dense<0.000000e+00> : vector<64x16xf32>
    %94 = tpu.matmul %93, %19, %cst_46 {dimension_numbers = #tpu.dot_dimension_numbers<[1], [0], [0], [1], [0, 0, 1, 1], [], []>} : vector<64x32xf32>, vector<32x16xf32>, vector<64x16xf32> -> vector<64x16xf32>
    %95 = vector.extract_strided_slice %20 {offsets = [3, 0], sizes = [1, 16], strides = [1, 1]} : vector<6x16xf32> to vector<1x16xf32>
    %96 = vector.broadcast %95 : vector<1x16xf32> to vector<64x16xf32>
    %97 = arith.addf %94, %96 : vector<64x16xf32>
    %98 = arith.addf %88, %97 : vector<64x16xf32>
    %99 = vector.extract_strided_slice %20 {offsets = [4, 0], sizes = [1, 16], strides = [1, 1]} : vector<6x16xf32> to vector<1x16xf32>
    %100 = vector.extract_strided_slice %20 {offsets = [5, 0], sizes = [1, 16], strides = [1, 1]} : vector<6x16xf32> to vector<1x16xf32>
    %cst_47 = arith.constant dense<0.000000e+00> : vector<64xf32>
    %101 = vector.multi_reduction <add>, %98, %cst_47 [1] : vector<64x16xf32> to vector<64xf32>
    %102 = vector.shape_cast %101 : vector<64xf32> to vector<64x1xf32>
    %cst_48 = arith.constant 1.600000e+01 : f32
    %103 = vector.broadcast %cst_48 : f32 to vector<64x1xf32>
    %104 = arith.divf %102, %103 : vector<64x1xf32>
    %105 = vector.broadcast %104 : vector<64x1xf32> to vector<64x16xf32>
    %106 = arith.subf %98, %105 : vector<64x16xf32>
    %107 = arith.mulf %106, %106 : vector<64x16xf32>
    %cst_49 = arith.constant dense<0.000000e+00> : vector<64xf32>
    %108 = vector.multi_reduction <add>, %107, %cst_49 [1] : vector<64x16xf32> to vector<64xf32>
    %109 = vector.shape_cast %108 : vector<64xf32> to vector<64x1xf32>
    %cst_50 = arith.constant 1.600000e+01 : f32
    %110 = vector.broadcast %cst_50 : f32 to vector<64x1xf32>
    %111 = arith.divf %109, %110 : vector<64x1xf32>
    %112 = vector.broadcast %104 : vector<64x1xf32> to vector<64x16xf32>
    %113 = arith.subf %98, %112 : vector<64x16xf32>
    %cst_51 = arith.constant 9.99999974E-6 : f32
    %114 = vector.broadcast %cst_51 : f32 to vector<64x1xf32>
    %115 = arith.addf %111, %114 : vector<64x1xf32>
    %116 = math.rsqrt %115 : vector<64x1xf32>
    %117 = vector.broadcast %116 : vector<64x1xf32> to vector<64x16xf32>
    %118 = arith.mulf %113, %117 : vector<64x16xf32>
    %119 = vector.broadcast %99 : vector<1x16xf32> to vector<64x16xf32>
    %120 = arith.mulf %118, %119 : vector<64x16xf32>
    %121 = vector.broadcast %100 : vector<1x16xf32> to vector<64x16xf32>
    %122 = arith.addf %120, %121 : vector<64x16xf32>
    %cst_52 = arith.constant 5.000000e-01 : f32
    %123 = vector.broadcast %cst_52 : f32 to vector<2x32x32xf32>
    %124 = arith.mulf %56, %123 : vector<2x32x32xf32>
    %c0_53 = arith.constant 0 : index
    %c0_54 = arith.constant 0 : index
    %c0_55 = arith.constant 0 : index
    %125 = vector.load %arg13[%c0_53, %c0_54, %c0_55] : memref<2x32x32xf32, #tpu.memory_space<vmem>>, vector<2x32x32xf32>
    tpu.vector_store %arg13[%c0_53, %c0_54, %c0_55], %124 {strides = array<i32>} : memref<2x32x32xf32, #tpu.memory_space<vmem>>, vector<2x32x32xf32>,
    %c0_56 = arith.constant 0 : index
    %c0_57 = arith.constant 0 : index
    %126 = vector.load %arg11[%c0_56, %c0_57] : memref<3x8xf32, #tpu.memory_space<vmem>>, vector<3x8xf32>
    %c0_58 = arith.constant 0 : index
    %c0_59 = arith.constant 0 : index
    %127 = vector.load %arg10[%c0_58, %c0_59] : memref<16x8xf32, #tpu.memory_space<vmem>>, vector<16x8xf32>
    %cst_60 = arith.constant dense<0.000000e+00> : vector<64x8xf32>
    %128 = tpu.matmul %122, %127, %cst_60 {dimension_numbers = #tpu.dot_dimension_numbers<[1], [0], [0], [1], [0, 0, 1, 1], [], []>} : vector<64x16xf32>, vector<16x8xf32>, vector<64x8xf32> -> vector<64x8xf32>
    %129 = vector.extract_strided_slice %126 {offsets = [0, 0], sizes = [1, 8], strides = [1, 1]} : vector<3x8xf32> to vector<1x8xf32>
    %130 = vector.broadcast %129 : vector<1x8xf32> to vector<64x8xf32>
    %131 = arith.addf %128, %130 : vector<64x8xf32>
    %cst_61 = arith.constant 0.000000e+00 : f32
    %132 = vector.broadcast %cst_61 : f32 to vector<64x8xf32>
    %133 = arith.cmpf ogt, %131, %132 : vector<64x8xf32>
    %cst_62 = arith.constant 0.00999999977 : f32
    %134 = vector.broadcast %cst_62 : f32 to vector<64x8xf32>
    %135 = arith.mulf %134, %131 : vector<64x8xf32>
    %136 = arith.select %133, %131, %135 : vector<64x8xi1>, vector<64x8xf32>
    %137 = vector.extract_strided_slice %126 {offsets = [1, 0], sizes = [1, 8], strides = [1, 1]} : vector<3x8xf32> to vector<1x8xf32>
    %138 = vector.extract_strided_slice %126 {offsets = [2, 0], sizes = [1, 8], strides = [1, 1]} : vector<3x8xf32> to vector<1x8xf32>
    %cst_63 = arith.constant dense<0.000000e+00> : vector<64xf32>
    %139 = vector.multi_reduction <add>, %136, %cst_63 [1] : vector<64x8xf32> to vector<64xf32>
    %140 = vector.shape_cast %139 : vector<64xf32> to vector<64x1xf32>
    %cst_64 = arith.constant 8.000000e+00 : f32
    %141 = vector.broadcast %cst_64 : f32 to vector<64x1xf32>
    %142 = arith.divf %140, %141 : vector<64x1xf32>
    %143 = vector.broadcast %142 : vector<64x1xf32> to vector<64x8xf32>
    %144 = arith.subf %136, %143 : vector<64x8xf32>
    %145 = arith.mulf %144, %144 : vector<64x8xf32>
    %cst_65 = arith.constant dense<0.000000e+00> : vector<64xf32>
    %146 = vector.multi_reduction <add>, %145, %cst_65 [1] : vector<64x8xf32> to vector<64xf32>
    %147 = vector.shape_cast %146 : vector<64xf32> to vector<64x1xf32>
    %cst_66 = arith.constant 8.000000e+00 : f32
    %148 = vector.broadcast %cst_66 : f32 to vector<64x1xf32>
    %149 = arith.divf %147, %148 : vector<64x1xf32>
    %150 = vector.broadcast %142 : vector<64x1xf32> to vector<64x8xf32>
    %151 = arith.subf %136, %150 : vector<64x8xf32>
    %cst_67 = arith.constant 9.99999974E-6 : f32
    %152 = vector.broadcast %cst_67 : f32 to vector<64x1xf32>
    %153 = arith.addf %149, %152 : vector<64x1xf32>
    %154 = math.rsqrt %153 : vector<64x1xf32>
    %155 = vector.broadcast %154 : vector<64x1xf32> to vector<64x8xf32>
    %156 = arith.mulf %151, %155 : vector<64x8xf32>
    %157 = vector.broadcast %137 : vector<1x8xf32> to vector<64x8xf32>
    %158 = arith.mulf %156, %157 : vector<64x8xf32>
    %159 = vector.broadcast %138 : vector<1x8xf32> to vector<64x8xf32>
    %160 = arith.addf %158, %159 : vector<64x8xf32>
    %161 = vector.shape_cast %160 : vector<64x8xf32> to vector<2x32x8xf32>
    %c0_68 = arith.constant 0 : index
    %c0_69 = arith.constant 0 : index
    %c0_70 = arith.constant 0 : index
    %162 = vector.load %arg12[%c0_68, %c0_69, %c0_70] : memref<2x32x8xf32, #tpu.memory_space<vmem>>, vector<2x32x8xf32>
    tpu.vector_store %arg12[%c0_68, %c0_69, %c0_70], %161 {strides = array<i32>} : memref<2x32x8xf32, #tpu.memory_space<vmem>>, vector<2x32x8xf32>,
    return
  }
}

module attributes {stable_mosaic.version = 11 : i64} {
  func.func @kernel(%arg0: memref<2x8x16xf32, #tpu.memory_space<vmem>>, %arg1: memref<2x8x16xf32, #tpu.memory_space<vmem>>, %arg2: memref<2x3x16xf32, #tpu.memory_space<vmem>>, %arg3: memref<32x32xf32, #tpu.memory_space<vmem>>, %arg4: memref<5x32xf32, #tpu.memory_space<vmem>>, %arg5: memref<8x32xf32, #tpu.memory_space<vmem>>, %arg6: memref<1x2x16x48xf32, #tpu.memory_space<vmem>>, %arg7: memref<1x2x1x48xf32, #tpu.memory_space<vmem>>, %arg8: memref<1x2x16x16xf32, #tpu.memory_space<vmem>>, %arg9: memref<1x2x16x64xf32, #tpu.memory_space<vmem>>, %arg10: memref<1x2x1x64xf32, #tpu.memory_space<vmem>>, %arg11: memref<1x2x64x16xf32, #tpu.memory_space<vmem>>, %arg12: memref<1x2x6x16xf32, #tpu.memory_space<vmem>>, %arg13: memref<2x8x32xf32, #tpu.memory_space<vmem>>) attributes {dimension_semantics = [], scalar_prefetch = 0 : i64, scratch_operands = 0 : i64, tpu.core_type = #tpu.core_type<tc>} {
    %c0 = arith.constant 0 : index
    %c0_0 = arith.constant 0 : index
    %c0_1 = arith.constant 0 : index
    %0 = vector.load %arg0[%c0, %c0_0, %c0_1] : memref<2x8x16xf32, #tpu.memory_space<vmem>>, vector<2x8x16xf32>
    %1 = vector.shape_cast %0 : vector<2x8x16xf32> to vector<16x16xf32>
    %2 = vector.extract_strided_slice %1 {offsets = [0, 0], sizes = [16, 8], strides = [1, 1]} : vector<16x16xf32> to vector<16x8xf32>
    %3 = vector.extract_strided_slice %1 {offsets = [0, 8], sizes = [16, 8], strides = [1, 1]} : vector<16x16xf32> to vector<16x8xf32>
    %cst = arith.constant dense<0.000000e+00> : vector<16xf32>
    %4 = vector.multi_reduction <add>, %2, %cst [1] : vector<16x8xf32> to vector<16xf32>
    %5 = vector.shape_cast %4 : vector<16xf32> to vector<16x1xf32>
    %cst_2 = arith.constant 0.000000e+00 : f32
    %6 = vector.broadcast %cst_2 : f32 to vector<16x1xf32>
    %7 = arith.cmpf one, %5, %6 : vector<16x1xf32>
    %8 = arith.extui %7 : vector<16x1xi1> to vector<16x1xi32>
    %9 = arith.sitofp %8 : vector<16x1xi32> to vector<16x1xf32>
    %cst_3 = arith.constant dense<0.000000e+00> : vector<16xf32>
    %10 = vector.multi_reduction <add>, %3, %cst_3 [1] : vector<16x8xf32> to vector<16xf32>
    %11 = vector.shape_cast %10 : vector<16xf32> to vector<16x1xf32>
    %cst_4 = arith.constant 0.000000e+00 : f32
    %12 = vector.broadcast %cst_4 : f32 to vector<16x1xf32>
    %13 = arith.cmpf one, %11, %12 : vector<16x1xf32>
    %14 = arith.extui %13 : vector<16x1xi1> to vector<16x1xi32>
    %15 = arith.sitofp %14 : vector<16x1xi32> to vector<16x1xf32>
    %c0_5 = arith.constant 0 : index
    %c0_6 = arith.constant 0 : index
    %c0_7 = arith.constant 0 : index
    %16 = vector.load %arg1[%c0_5, %c0_6, %c0_7] : memref<2x8x16xf32, #tpu.memory_space<vmem>>, vector<2x8x16xf32>
    %c0_8 = arith.constant 0 : index
    %c0_9 = arith.constant 0 : index
    %c0_10 = arith.constant 0 : index
    %17 = vector.load %arg2[%c0_8, %c0_9, %c0_10] : memref<2x3x16xf32, #tpu.memory_space<vmem>>, vector<2x3x16xf32>
    %18 = vector.broadcast %9 : vector<16x1xf32> to vector<16x8xf32>
    %19 = arith.mulf %2, %18 : vector<16x8xf32>
    %20 = vector.extract_strided_slice %16 {offsets = [0, 0, 0], sizes = [1, 8, 16], strides = [1, 1, 1]} : vector<2x8x16xf32> to vector<1x8x16xf32>
    %21 = vector.shape_cast %20 : vector<1x8x16xf32> to vector<8x16xf32>
    %cst_11 = arith.constant dense<0.000000e+00> : vector<16x16xf32>
    %22 = tpu.matmul %19, %21, %cst_11 {dimension_numbers = #tpu.dot_dimension_numbers<[1], [0], [0], [1], [0, 0, 1, 1], [], []>} : vector<16x8xf32>, vector<8x16xf32>, vector<16x16xf32> -> vector<16x16xf32>
    %23 = vector.extract_strided_slice %17 {offsets = [0, 0, 0], sizes = [1, 1, 16], strides = [1, 1, 1]} : vector<2x3x16xf32> to vector<1x1x16xf32>
    %24 = vector.shape_cast %23 : vector<1x1x16xf32> to vector<1x16xf32>
    %25 = vector.broadcast %24 : vector<1x16xf32> to vector<16x16xf32>
    %26 = arith.addf %22, %25 : vector<16x16xf32>
    %27 = vector.extract_strided_slice %17 {offsets = [0, 1, 0], sizes = [1, 1, 16], strides = [1, 1, 1]} : vector<2x3x16xf32> to vector<1x1x16xf32>
    %28 = vector.shape_cast %27 : vector<1x1x16xf32> to vector<1x16xf32>
    %29 = vector.extract_strided_slice %17 {offsets = [0, 2, 0], sizes = [1, 1, 16], strides = [1, 1, 1]} : vector<2x3x16xf32> to vector<1x1x16xf32>
    %30 = vector.shape_cast %29 : vector<1x1x16xf32> to vector<1x16xf32>
    %cst_12 = arith.constant dense<0.000000e+00> : vector<16xf32>
    %31 = vector.multi_reduction <add>, %26, %cst_12 [1] : vector<16x16xf32> to vector<16xf32>
    %32 = vector.shape_cast %31 : vector<16xf32> to vector<16x1xf32>
    %cst_13 = arith.constant 1.600000e+01 : f32
    %33 = vector.broadcast %cst_13 : f32 to vector<16x1xf32>
    %34 = arith.divf %32, %33 : vector<16x1xf32>
    %35 = vector.broadcast %34 : vector<16x1xf32> to vector<16x16xf32>
    %36 = arith.subf %26, %35 : vector<16x16xf32>
    %37 = arith.mulf %36, %36 : vector<16x16xf32>
    %cst_14 = arith.constant dense<0.000000e+00> : vector<16xf32>
    %38 = vector.multi_reduction <add>, %37, %cst_14 [1] : vector<16x16xf32> to vector<16xf32>
    %39 = vector.shape_cast %38 : vector<16xf32> to vector<16x1xf32>
    %cst_15 = arith.constant 1.600000e+01 : f32
    %40 = vector.broadcast %cst_15 : f32 to vector<16x1xf32>
    %41 = arith.divf %39, %40 : vector<16x1xf32>
    %42 = vector.broadcast %34 : vector<16x1xf32> to vector<16x16xf32>
    %43 = arith.subf %26, %42 : vector<16x16xf32>
    %cst_16 = arith.constant 9.99999974E-6 : f32
    %44 = vector.broadcast %cst_16 : f32 to vector<16x1xf32>
    %45 = arith.addf %41, %44 : vector<16x1xf32>
    %46 = math.rsqrt %45 : vector<16x1xf32>
    %47 = vector.broadcast %46 : vector<16x1xf32> to vector<16x16xf32>
    %48 = arith.mulf %43, %47 : vector<16x16xf32>
    %49 = vector.broadcast %28 : vector<1x16xf32> to vector<16x16xf32>
    %50 = arith.mulf %48, %49 : vector<16x16xf32>
    %51 = vector.broadcast %30 : vector<1x16xf32> to vector<16x16xf32>
    %52 = arith.addf %50, %51 : vector<16x16xf32>
    %cst_17 = arith.constant 0.000000e+00 : f32
    %53 = vector.broadcast %cst_17 : f32 to vector<16x16xf32>
    %54 = arith.cmpf ogt, %52, %53 : vector<16x16xf32>
    %cst_18 = arith.constant 0.00999999977 : f32
    %55 = vector.broadcast %cst_18 : f32 to vector<16x16xf32>
    %56 = arith.mulf %55, %52 : vector<16x16xf32>
    %57 = arith.select %54, %52, %56 : vector<16x16xi1>, vector<16x16xf32>
    %58 = vector.broadcast %15 : vector<16x1xf32> to vector<16x8xf32>
    %59 = arith.mulf %3, %58 : vector<16x8xf32>
    %60 = vector.extract_strided_slice %16 {offsets = [1, 0, 0], sizes = [1, 8, 16], strides = [1, 1, 1]} : vector<2x8x16xf32> to vector<1x8x16xf32>
    %61 = vector.shape_cast %60 : vector<1x8x16xf32> to vector<8x16xf32>
    %cst_19 = arith.constant dense<0.000000e+00> : vector<16x16xf32>
    %62 = tpu.matmul %59, %61, %cst_19 {dimension_numbers = #tpu.dot_dimension_numbers<[1], [0], [0], [1], [0, 0, 1, 1], [], []>} : vector<16x8xf32>, vector<8x16xf32>, vector<16x16xf32> -> vector<16x16xf32>
    %63 = vector.extract_strided_slice %17 {offsets = [1, 0, 0], sizes = [1, 1, 16], strides = [1, 1, 1]} : vector<2x3x16xf32> to vector<1x1x16xf32>
    %64 = vector.shape_cast %63 : vector<1x1x16xf32> to vector<1x16xf32>
    %65 = vector.broadcast %64 : vector<1x16xf32> to vector<16x16xf32>
    %66 = arith.addf %62, %65 : vector<16x16xf32>
    %67 = vector.extract_strided_slice %17 {offsets = [1, 1, 0], sizes = [1, 1, 16], strides = [1, 1, 1]} : vector<2x3x16xf32> to vector<1x1x16xf32>
    %68 = vector.shape_cast %67 : vector<1x1x16xf32> to vector<1x16xf32>
    %69 = vector.extract_strided_slice %17 {offsets = [1, 2, 0], sizes = [1, 1, 16], strides = [1, 1, 1]} : vector<2x3x16xf32> to vector<1x1x16xf32>
    %70 = vector.shape_cast %69 : vector<1x1x16xf32> to vector<1x16xf32>
    %cst_20 = arith.constant dense<0.000000e+00> : vector<16xf32>
    %71 = vector.multi_reduction <add>, %66, %cst_20 [1] : vector<16x16xf32> to vector<16xf32>
    %72 = vector.shape_cast %71 : vector<16xf32> to vector<16x1xf32>
    %cst_21 = arith.constant 1.600000e+01 : f32
    %73 = vector.broadcast %cst_21 : f32 to vector<16x1xf32>
    %74 = arith.divf %72, %73 : vector<16x1xf32>
    %75 = vector.broadcast %74 : vector<16x1xf32> to vector<16x16xf32>
    %76 = arith.subf %66, %75 : vector<16x16xf32>
    %77 = arith.mulf %76, %76 : vector<16x16xf32>
    %cst_22 = arith.constant dense<0.000000e+00> : vector<16xf32>
    %78 = vector.multi_reduction <add>, %77, %cst_22 [1] : vector<16x16xf32> to vector<16xf32>
    %79 = vector.shape_cast %78 : vector<16xf32> to vector<16x1xf32>
    %cst_23 = arith.constant 1.600000e+01 : f32
    %80 = vector.broadcast %cst_23 : f32 to vector<16x1xf32>
    %81 = arith.divf %79, %80 : vector<16x1xf32>
    %82 = vector.broadcast %74 : vector<16x1xf32> to vector<16x16xf32>
    %83 = arith.subf %66, %82 : vector<16x16xf32>
    %cst_24 = arith.constant 9.99999974E-6 : f32
    %84 = vector.broadcast %cst_24 : f32 to vector<16x1xf32>
    %85 = arith.addf %81, %84 : vector<16x1xf32>
    %86 = math.rsqrt %85 : vector<16x1xf32>
    %87 = vector.broadcast %86 : vector<16x1xf32> to vector<16x16xf32>
    %88 = arith.mulf %83, %87 : vector<16x16xf32>
    %89 = vector.broadcast %68 : vector<1x16xf32> to vector<16x16xf32>
    %90 = arith.mulf %88, %89 : vector<16x16xf32>
    %91 = vector.broadcast %70 : vector<1x16xf32> to vector<16x16xf32>
    %92 = arith.addf %90, %91 : vector<16x16xf32>
    %cst_25 = arith.constant 0.000000e+00 : f32
    %93 = vector.broadcast %cst_25 : f32 to vector<16x16xf32>
    %94 = arith.cmpf ogt, %92, %93 : vector<16x16xf32>
    %cst_26 = arith.constant 0.00999999977 : f32
    %95 = vector.broadcast %cst_26 : f32 to vector<16x16xf32>
    %96 = arith.mulf %95, %92 : vector<16x16xf32>
    %97 = arith.select %94, %92, %96 : vector<16x16xi1>, vector<16x16xf32>
    %98 = tpu.concatenate %57, %97 in 1 : vector<16x16xf32>, vector<16x16xf32> -> vector<16x32xf32>
    %c0_27 = arith.constant 0 : index
    %c0_28 = arith.constant 0 : index
    %99 = vector.load %arg4[%c0_27, %c0_28] : memref<5x32xf32, #tpu.memory_space<vmem>>, vector<5x32xf32>
    %c0_29 = arith.constant 0 : index
    %c0_30 = arith.constant 0 : index
    %100 = vector.load %arg3[%c0_29, %c0_30] : memref<32x32xf32, #tpu.memory_space<vmem>>, vector<32x32xf32>
    %cst_31 = arith.constant dense<0.000000e+00> : vector<16x32xf32>
    %101 = tpu.matmul %98, %100, %cst_31 {dimension_numbers = #tpu.dot_dimension_numbers<[1], [0], [0], [1], [0, 0, 1, 1], [], []>} : vector<16x32xf32>, vector<32x32xf32>, vector<16x32xf32> -> vector<16x32xf32>
    %102 = vector.extract_strided_slice %99 {offsets = [0, 0], sizes = [1, 32], strides = [1, 1]} : vector<5x32xf32> to vector<1x32xf32>
    %103 = vector.broadcast %102 : vector<1x32xf32> to vector<16x32xf32>
    %104 = arith.addf %101, %103 : vector<16x32xf32>
    %105 = vector.extract_strided_slice %99 {offsets = [1, 0], sizes = [1, 32], strides = [1, 1]} : vector<5x32xf32> to vector<1x32xf32>
    %106 = vector.extract_strided_slice %99 {offsets = [2, 0], sizes = [1, 32], strides = [1, 1]} : vector<5x32xf32> to vector<1x32xf32>
    %cst_32 = arith.constant dense<0.000000e+00> : vector<16xf32>
    %107 = vector.multi_reduction <add>, %104, %cst_32 [1] : vector<16x32xf32> to vector<16xf32>
    %108 = vector.shape_cast %107 : vector<16xf32> to vector<16x1xf32>
    %cst_33 = arith.constant 3.200000e+01 : f32
    %109 = vector.broadcast %cst_33 : f32 to vector<16x1xf32>
    %110 = arith.divf %108, %109 : vector<16x1xf32>
    %111 = vector.broadcast %110 : vector<16x1xf32> to vector<16x32xf32>
    %112 = arith.subf %104, %111 : vector<16x32xf32>
    %113 = arith.mulf %112, %112 : vector<16x32xf32>
    %cst_34 = arith.constant dense<0.000000e+00> : vector<16xf32>
    %114 = vector.multi_reduction <add>, %113, %cst_34 [1] : vector<16x32xf32> to vector<16xf32>
    %115 = vector.shape_cast %114 : vector<16xf32> to vector<16x1xf32>
    %cst_35 = arith.constant 3.200000e+01 : f32
    %116 = vector.broadcast %cst_35 : f32 to vector<16x1xf32>
    %117 = arith.divf %115, %116 : vector<16x1xf32>
    %118 = vector.broadcast %110 : vector<16x1xf32> to vector<16x32xf32>
    %119 = arith.subf %104, %118 : vector<16x32xf32>
    %cst_36 = arith.constant 9.99999974E-6 : f32
    %120 = vector.broadcast %cst_36 : f32 to vector<16x1xf32>
    %121 = arith.addf %117, %120 : vector<16x1xf32>
    %122 = math.rsqrt %121 : vector<16x1xf32>
    %123 = vector.broadcast %122 : vector<16x1xf32> to vector<16x32xf32>
    %124 = arith.mulf %119, %123 : vector<16x32xf32>
    %125 = vector.broadcast %105 : vector<1x32xf32> to vector<16x32xf32>
    %126 = arith.mulf %124, %125 : vector<16x32xf32>
    %127 = vector.broadcast %106 : vector<1x32xf32> to vector<16x32xf32>
    %128 = arith.addf %126, %127 : vector<16x32xf32>
    %c0_37 = arith.constant 0 : index
    %c0_38 = arith.constant 0 : index
    %129 = vector.load %arg5[%c0_37, %c0_38] : memref<8x32xf32, #tpu.memory_space<vmem>>, vector<8x32xf32>
    %130 = tpu.concatenate %129, %129 in 0 : vector<8x32xf32>, vector<8x32xf32> -> vector<16x32xf32>
    %131 = arith.addf %128, %130 : vector<16x32xf32>
    %132 = vector.extract_strided_slice %99 {offsets = [3, 0], sizes = [1, 32], strides = [1, 1]} : vector<5x32xf32> to vector<1x32xf32>
    %133 = vector.extract_strided_slice %99 {offsets = [4, 0], sizes = [1, 32], strides = [1, 1]} : vector<5x32xf32> to vector<1x32xf32>
    %cst_39 = arith.constant dense<0.000000e+00> : vector<16xf32>
    %134 = vector.multi_reduction <add>, %131, %cst_39 [1] : vector<16x32xf32> to vector<16xf32>
    %135 = vector.shape_cast %134 : vector<16xf32> to vector<16x1xf32>
    %cst_40 = arith.constant 3.200000e+01 : f32
    %136 = vector.broadcast %cst_40 : f32 to vector<16x1xf32>
    %137 = arith.divf %135, %136 : vector<16x1xf32>
    %138 = vector.broadcast %137 : vector<16x1xf32> to vector<16x32xf32>
    %139 = arith.subf %131, %138 : vector<16x32xf32>
    %140 = arith.mulf %139, %139 : vector<16x32xf32>
    %cst_41 = arith.constant dense<0.000000e+00> : vector<16xf32>
    %141 = vector.multi_reduction <add>, %140, %cst_41 [1] : vector<16x32xf32> to vector<16xf32>
    %142 = vector.shape_cast %141 : vector<16xf32> to vector<16x1xf32>
    %cst_42 = arith.constant 3.200000e+01 : f32
    %143 = vector.broadcast %cst_42 : f32 to vector<16x1xf32>
    %144 = arith.divf %142, %143 : vector<16x1xf32>
    %145 = vector.broadcast %137 : vector<16x1xf32> to vector<16x32xf32>
    %146 = arith.subf %131, %145 : vector<16x32xf32>
    %cst_43 = arith.constant 9.99999974E-6 : f32
    %147 = vector.broadcast %cst_43 : f32 to vector<16x1xf32>
    %148 = arith.addf %144, %147 : vector<16x1xf32>
    %149 = math.rsqrt %148 : vector<16x1xf32>
    %150 = vector.broadcast %149 : vector<16x1xf32> to vector<16x32xf32>
    %151 = arith.mulf %146, %150 : vector<16x32xf32>
    %152 = vector.broadcast %132 : vector<1x32xf32> to vector<16x32xf32>
    %153 = arith.mulf %151, %152 : vector<16x32xf32>
    %154 = vector.broadcast %133 : vector<1x32xf32> to vector<16x32xf32>
    %155 = arith.addf %153, %154 : vector<16x32xf32>
    %c0_44 = arith.constant 0 : index
    %c0_45 = arith.constant 0 : index
    %c0_46 = arith.constant 0 : index
    %c0_47 = arith.constant 0 : index
    %156 = vector.load %arg6[%c0_44, %c0_45, %c0_46, %c0_47] : memref<1x2x16x48xf32, #tpu.memory_space<vmem>>, vector<1x2x16x48xf32>
    %c0_48 = arith.constant 0 : index
    %c0_49 = arith.constant 0 : index
    %c0_50 = arith.constant 0 : index
    %c0_51 = arith.constant 0 : index
    %157 = vector.load %arg7[%c0_48, %c0_49, %c0_50, %c0_51] : memref<1x2x1x48xf32, #tpu.memory_space<vmem>>, vector<1x2x1x48xf32>
    %c0_52 = arith.constant 0 : index
    %c0_53 = arith.constant 0 : index
    %c0_54 = arith.constant 0 : index
    %c0_55 = arith.constant 0 : index
    %158 = vector.load %arg8[%c0_52, %c0_53, %c0_54, %c0_55] : memref<1x2x16x16xf32, #tpu.memory_space<vmem>>, vector<1x2x16x16xf32>
    %c0_56 = arith.constant 0 : index
    %c0_57 = arith.constant 0 : index
    %c0_58 = arith.constant 0 : index
    %c0_59 = arith.constant 0 : index
    %159 = vector.load %arg9[%c0_56, %c0_57, %c0_58, %c0_59] : memref<1x2x16x64xf32, #tpu.memory_space<vmem>>, vector<1x2x16x64xf32>
    %c0_60 = arith.constant 0 : index
    %c0_61 = arith.constant 0 : index
    %c0_62 = arith.constant 0 : index
    %c0_63 = arith.constant 0 : index
    %160 = vector.load %arg10[%c0_60, %c0_61, %c0_62, %c0_63] : memref<1x2x1x64xf32, #tpu.memory_space<vmem>>, vector<1x2x1x64xf32>
    %c0_64 = arith.constant 0 : index
    %c0_65 = arith.constant 0 : index
    %c0_66 = arith.constant 0 : index
    %c0_67 = arith.constant 0 : index
    %161 = vector.load %arg11[%c0_64, %c0_65, %c0_66, %c0_67] : memref<1x2x64x16xf32, #tpu.memory_space<vmem>>, vector<1x2x64x16xf32>
    %c0_68 = arith.constant 0 : index
    %c0_69 = arith.constant 0 : index
    %c0_70 = arith.constant 0 : index
    %c0_71 = arith.constant 0 : index
    %162 = vector.load %arg12[%c0_68, %c0_69, %c0_70, %c0_71] : memref<1x2x6x16xf32, #tpu.memory_space<vmem>>, vector<1x2x6x16xf32>
    %163 = vector.extract_strided_slice %155 {offsets = [0, 0], sizes = [16, 16], strides = [1, 1]} : vector<16x32xf32> to vector<16x16xf32>
    %164 = vector.extract_strided_slice %155 {offsets = [0, 16], sizes = [16, 16], strides = [1, 1]} : vector<16x32xf32> to vector<16x16xf32>
    %165 = vector.extract_strided_slice %156 {offsets = [0, 0, 0, 0], sizes = [1, 1, 16, 48], strides = [1, 1, 1, 1]} : vector<1x2x16x48xf32> to vector<1x1x16x48xf32>
    %166 = vector.shape_cast %165 : vector<1x1x16x48xf32> to vector<16x48xf32>
    %167 = vector.extract_strided_slice %157 {offsets = [0, 0, 0, 0], sizes = [1, 1, 1, 48], strides = [1, 1, 1, 1]} : vector<1x2x1x48xf32> to vector<1x1x1x48xf32>
    %168 = vector.shape_cast %167 : vector<1x1x1x48xf32> to vector<1x48xf32>
    %169 = vector.extract_strided_slice %158 {offsets = [0, 0, 0, 0], sizes = [1, 1, 16, 16], strides = [1, 1, 1, 1]} : vector<1x2x16x16xf32> to vector<1x1x16x16xf32>
    %170 = vector.shape_cast %169 : vector<1x1x16x16xf32> to vector<16x16xf32>
    %171 = vector.extract_strided_slice %159 {offsets = [0, 0, 0, 0], sizes = [1, 1, 16, 64], strides = [1, 1, 1, 1]} : vector<1x2x16x64xf32> to vector<1x1x16x64xf32>
    %172 = vector.shape_cast %171 : vector<1x1x16x64xf32> to vector<16x64xf32>
    %173 = vector.extract_strided_slice %160 {offsets = [0, 0, 0, 0], sizes = [1, 1, 1, 64], strides = [1, 1, 1, 1]} : vector<1x2x1x64xf32> to vector<1x1x1x64xf32>
    %174 = vector.shape_cast %173 : vector<1x1x1x64xf32> to vector<1x64xf32>
    %175 = vector.extract_strided_slice %161 {offsets = [0, 0, 0, 0], sizes = [1, 1, 64, 16], strides = [1, 1, 1, 1]} : vector<1x2x64x16xf32> to vector<1x1x64x16xf32>
    %176 = vector.shape_cast %175 : vector<1x1x64x16xf32> to vector<64x16xf32>
    %177 = vector.extract_strided_slice %162 {offsets = [0, 0, 0, 0], sizes = [1, 1, 6, 16], strides = [1, 1, 1, 1]} : vector<1x2x6x16xf32> to vector<1x1x6x16xf32>
    %178 = vector.shape_cast %177 : vector<1x1x6x16xf32> to vector<6x16xf32>
    %cst_72 = arith.constant dense<0.000000e+00> : vector<16x48xf32>
    %179 = tpu.matmul %163, %166, %cst_72 {dimension_numbers = #tpu.dot_dimension_numbers<[1], [0], [0], [1], [0, 0, 1, 1], [], []>} : vector<16x16xf32>, vector<16x48xf32>, vector<16x48xf32> -> vector<16x48xf32>
    %180 = vector.broadcast %168 : vector<1x48xf32> to vector<16x48xf32>
    %181 = arith.addf %179, %180 : vector<16x48xf32>
    %182 = vector.shape_cast %181 : vector<16x48xf32> to vector<2x8x48xf32>
    %183 = vector.extract_strided_slice %182 {offsets = [0, 0, 0], sizes = [2, 8, 8], strides = [1, 1, 1]} : vector<2x8x48xf32> to vector<2x8x8xf32>
    %184 = vector.extract_strided_slice %182 {offsets = [0, 0, 16], sizes = [2, 8, 8], strides = [1, 1, 1]} : vector<2x8x48xf32> to vector<2x8x8xf32>
    %185 = vector.extract_strided_slice %182 {offsets = [0, 0, 32], sizes = [2, 8, 8], strides = [1, 1, 1]} : vector<2x8x48xf32> to vector<2x8x8xf32>
    %cst_73 = arith.constant dense<0.000000e+00> : vector<2x8x8xf32>
    %186 = tpu.matmul %183, %184, %cst_73 {dimension_numbers = #tpu.dot_dimension_numbers<[2], [2], [1], [1], [0, 0, 0, 1, 1, 1], [0], [0]>} : vector<2x8x8xf32>, vector<2x8x8xf32>, vector<2x8x8xf32> -> vector<2x8x8xf32>
    %cst_74 = arith.constant 0.353553385 : f32
    %187 = vector.broadcast %cst_74 : f32 to vector<2x8x8xf32>
    %188 = arith.mulf %186, %187 : vector<2x8x8xf32>
    %cst_75 = arith.constant dense<0xFF800000> : vector<2x8xf32>
    %189 = vector.multi_reduction <maximumf>, %188, %cst_75 [2] : vector<2x8x8xf32> to vector<2x8xf32>
    %190 = vector.shape_cast %189 : vector<2x8xf32> to vector<2x8x1xf32>
    %191 = vector.broadcast %190 : vector<2x8x1xf32> to vector<2x8x8xf32>
    %192 = arith.subf %188, %191 : vector<2x8x8xf32>
    %193 = math.exp %192 : vector<2x8x8xf32>
    %cst_76 = arith.constant dense<0.000000e+00> : vector<2x8xf32>
    %194 = vector.multi_reduction <add>, %193, %cst_76 [2] : vector<2x8x8xf32> to vector<2x8xf32>
    %195 = vector.shape_cast %194 : vector<2x8xf32> to vector<2x8x1xf32>
    %196 = vector.broadcast %195 : vector<2x8x1xf32> to vector<2x8x8xf32>
    %197 = arith.divf %193, %196 : vector<2x8x8xf32>
    %cst_77 = arith.constant dense<0.000000e+00> : vector<2x8x8xf32>
    %198 = tpu.matmul %197, %185, %cst_77 {dimension_numbers = #tpu.dot_dimension_numbers<[2], [1], [1], [2], [0, 0, 0, 1, 1, 2], [0], [0]>} : vector<2x8x8xf32>, vector<2x8x8xf32>, vector<2x8x8xf32> -> vector<2x8x8xf32>
    %199 = vector.extract_strided_slice %182 {offsets = [0, 0, 8], sizes = [2, 8, 8], strides = [1, 1, 1]} : vector<2x8x48xf32> to vector<2x8x8xf32>
    %200 = vector.extract_strided_slice %182 {offsets = [0, 0, 24], sizes = [2, 8, 8], strides = [1, 1, 1]} : vector<2x8x48xf32> to vector<2x8x8xf32>
    %201 = vector.extract_strided_slice %182 {offsets = [0, 0, 40], sizes = [2, 8, 8], strides = [1, 1, 1]} : vector<2x8x48xf32> to vector<2x8x8xf32>
    %cst_78 = arith.constant dense<0.000000e+00> : vector<2x8x8xf32>
    %202 = tpu.matmul %199, %200, %cst_78 {dimension_numbers = #tpu.dot_dimension_numbers<[2], [2], [1], [1], [0, 0, 0, 1, 1, 1], [0], [0]>} : vector<2x8x8xf32>, vector<2x8x8xf32>, vector<2x8x8xf32> -> vector<2x8x8xf32>
    %cst_79 = arith.constant 0.353553385 : f32
    %203 = vector.broadcast %cst_79 : f32 to vector<2x8x8xf32>
    %204 = arith.mulf %202, %203 : vector<2x8x8xf32>
    %cst_80 = arith.constant dense<0xFF800000> : vector<2x8xf32>
    %205 = vector.multi_reduction <maximumf>, %204, %cst_80 [2] : vector<2x8x8xf32> to vector<2x8xf32>
    %206 = vector.shape_cast %205 : vector<2x8xf32> to vector<2x8x1xf32>
    %207 = vector.broadcast %206 : vector<2x8x1xf32> to vector<2x8x8xf32>
    %208 = arith.subf %204, %207 : vector<2x8x8xf32>
    %209 = math.exp %208 : vector<2x8x8xf32>
    %cst_81 = arith.constant dense<0.000000e+00> : vector<2x8xf32>
    %210 = vector.multi_reduction <add>, %209, %cst_81 [2] : vector<2x8x8xf32> to vector<2x8xf32>
    %211 = vector.shape_cast %210 : vector<2x8xf32> to vector<2x8x1xf32>
    %212 = vector.broadcast %211 : vector<2x8x1xf32> to vector<2x8x8xf32>
    %213 = arith.divf %209, %212 : vector<2x8x8xf32>
    %cst_82 = arith.constant dense<0.000000e+00> : vector<2x8x8xf32>
    %214 = tpu.matmul %213, %201, %cst_82 {dimension_numbers = #tpu.dot_dimension_numbers<[2], [1], [1], [2], [0, 0, 0, 1, 1, 2], [0], [0]>} : vector<2x8x8xf32>, vector<2x8x8xf32>, vector<2x8x8xf32> -> vector<2x8x8xf32>
    %215 = tpu.concatenate %198, %214 in 2 : vector<2x8x8xf32>, vector<2x8x8xf32> -> vector<2x8x16xf32>
    %216 = vector.shape_cast %215 : vector<2x8x16xf32> to vector<16x16xf32>
    %cst_83 = arith.constant dense<0.000000e+00> : vector<16x16xf32>
    %217 = tpu.matmul %216, %170, %cst_83 {dimension_numbers = #tpu.dot_dimension_numbers<[1], [0], [0], [1], [0, 0, 1, 1], [], []>} : vector<16x16xf32>, vector<16x16xf32>, vector<16x16xf32> -> vector<16x16xf32>
    %218 = vector.extract_strided_slice %178 {offsets = [0, 0], sizes = [1, 16], strides = [1, 1]} : vector<6x16xf32> to vector<1x16xf32>
    %219 = vector.broadcast %218 : vector<1x16xf32> to vector<16x16xf32>
    %220 = arith.addf %217, %219 : vector<16x16xf32>
    %221 = arith.addf %163, %220 : vector<16x16xf32>
    %222 = vector.extract_strided_slice %178 {offsets = [1, 0], sizes = [1, 16], strides = [1, 1]} : vector<6x16xf32> to vector<1x16xf32>
    %223 = vector.extract_strided_slice %178 {offsets = [2, 0], sizes = [1, 16], strides = [1, 1]} : vector<6x16xf32> to vector<1x16xf32>
    %cst_84 = arith.constant dense<0.000000e+00> : vector<16xf32>
    %224 = vector.multi_reduction <add>, %221, %cst_84 [1] : vector<16x16xf32> to vector<16xf32>
    %225 = vector.shape_cast %224 : vector<16xf32> to vector<16x1xf32>
    %cst_85 = arith.constant 1.600000e+01 : f32
    %226 = vector.broadcast %cst_85 : f32 to vector<16x1xf32>
    %227 = arith.divf %225, %226 : vector<16x1xf32>
    %228 = vector.broadcast %227 : vector<16x1xf32> to vector<16x16xf32>
    %229 = arith.subf %221, %228 : vector<16x16xf32>
    %230 = arith.mulf %229, %229 : vector<16x16xf32>
    %cst_86 = arith.constant dense<0.000000e+00> : vector<16xf32>
    %231 = vector.multi_reduction <add>, %230, %cst_86 [1] : vector<16x16xf32> to vector<16xf32>
    %232 = vector.shape_cast %231 : vector<16xf32> to vector<16x1xf32>
    %cst_87 = arith.constant 1.600000e+01 : f32
    %233 = vector.broadcast %cst_87 : f32 to vector<16x1xf32>
    %234 = arith.divf %232, %233 : vector<16x1xf32>
    %235 = vector.broadcast %227 : vector<16x1xf32> to vector<16x16xf32>
    %236 = arith.subf %221, %235 : vector<16x16xf32>
    %cst_88 = arith.constant 9.99999974E-6 : f32
    %237 = vector.broadcast %cst_88 : f32 to vector<16x1xf32>
    %238 = arith.addf %234, %237 : vector<16x1xf32>
    %239 = math.rsqrt %238 : vector<16x1xf32>
    %240 = vector.broadcast %239 : vector<16x1xf32> to vector<16x16xf32>
    %241 = arith.mulf %236, %240 : vector<16x16xf32>
    %242 = vector.broadcast %222 : vector<1x16xf32> to vector<16x16xf32>
    %243 = arith.mulf %241, %242 : vector<16x16xf32>
    %244 = vector.broadcast %223 : vector<1x16xf32> to vector<16x16xf32>
    %245 = arith.addf %243, %244 : vector<16x16xf32>
    %cst_89 = arith.constant dense<0.000000e+00> : vector<16x64xf32>
    %246 = tpu.matmul %245, %172, %cst_89 {dimension_numbers = #tpu.dot_dimension_numbers<[1], [0], [0], [1], [0, 0, 1, 1], [], []>} : vector<16x16xf32>, vector<16x64xf32>, vector<16x64xf32> -> vector<16x64xf32>
    %247 = vector.broadcast %174 : vector<1x64xf32> to vector<16x64xf32>
    %248 = arith.addf %246, %247 : vector<16x64xf32>
    %cst_90 = arith.constant 0.000000e+00 : f32
    %249 = vector.broadcast %cst_90 : f32 to vector<16x64xf32>
    %250 = arith.maximumf %248, %249 : vector<16x64xf32>
    %cst_91 = arith.constant dense<0.000000e+00> : vector<16x16xf32>
    %251 = tpu.matmul %250, %176, %cst_91 {dimension_numbers = #tpu.dot_dimension_numbers<[1], [0], [0], [1], [0, 0, 1, 1], [], []>} : vector<16x64xf32>, vector<64x16xf32>, vector<16x16xf32> -> vector<16x16xf32>
    %252 = vector.extract_strided_slice %178 {offsets = [3, 0], sizes = [1, 16], strides = [1, 1]} : vector<6x16xf32> to vector<1x16xf32>
    %253 = vector.broadcast %252 : vector<1x16xf32> to vector<16x16xf32>
    %254 = arith.addf %251, %253 : vector<16x16xf32>
    %255 = arith.addf %245, %254 : vector<16x16xf32>
    %256 = vector.extract_strided_slice %178 {offsets = [4, 0], sizes = [1, 16], strides = [1, 1]} : vector<6x16xf32> to vector<1x16xf32>
    %257 = vector.extract_strided_slice %178 {offsets = [5, 0], sizes = [1, 16], strides = [1, 1]} : vector<6x16xf32> to vector<1x16xf32>
    %cst_92 = arith.constant dense<0.000000e+00> : vector<16xf32>
    %258 = vector.multi_reduction <add>, %255, %cst_92 [1] : vector<16x16xf32> to vector<16xf32>
    %259 = vector.shape_cast %258 : vector<16xf32> to vector<16x1xf32>
    %cst_93 = arith.constant 1.600000e+01 : f32
    %260 = vector.broadcast %cst_93 : f32 to vector<16x1xf32>
    %261 = arith.divf %259, %260 : vector<16x1xf32>
    %262 = vector.broadcast %261 : vector<16x1xf32> to vector<16x16xf32>
    %263 = arith.subf %255, %262 : vector<16x16xf32>
    %264 = arith.mulf %263, %263 : vector<16x16xf32>
    %cst_94 = arith.constant dense<0.000000e+00> : vector<16xf32>
    %265 = vector.multi_reduction <add>, %264, %cst_94 [1] : vector<16x16xf32> to vector<16xf32>
    %266 = vector.shape_cast %265 : vector<16xf32> to vector<16x1xf32>
    %cst_95 = arith.constant 1.600000e+01 : f32
    %267 = vector.broadcast %cst_95 : f32 to vector<16x1xf32>
    %268 = arith.divf %266, %267 : vector<16x1xf32>
    %269 = vector.broadcast %261 : vector<16x1xf32> to vector<16x16xf32>
    %270 = arith.subf %255, %269 : vector<16x16xf32>
    %cst_96 = arith.constant 9.99999974E-6 : f32
    %271 = vector.broadcast %cst_96 : f32 to vector<16x1xf32>
    %272 = arith.addf %268, %271 : vector<16x1xf32>
    %273 = math.rsqrt %272 : vector<16x1xf32>
    %274 = vector.broadcast %273 : vector<16x1xf32> to vector<16x16xf32>
    %275 = arith.mulf %270, %274 : vector<16x16xf32>
    %276 = vector.broadcast %256 : vector<1x16xf32> to vector<16x16xf32>
    %277 = arith.mulf %275, %276 : vector<16x16xf32>
    %278 = vector.broadcast %257 : vector<1x16xf32> to vector<16x16xf32>
    %279 = arith.addf %277, %278 : vector<16x16xf32>
    %280 = vector.extract_strided_slice %156 {offsets = [0, 1, 0, 0], sizes = [1, 1, 16, 48], strides = [1, 1, 1, 1]} : vector<1x2x16x48xf32> to vector<1x1x16x48xf32>
    %281 = vector.shape_cast %280 : vector<1x1x16x48xf32> to vector<16x48xf32>
    %282 = vector.extract_strided_slice %157 {offsets = [0, 1, 0, 0], sizes = [1, 1, 1, 48], strides = [1, 1, 1, 1]} : vector<1x2x1x48xf32> to vector<1x1x1x48xf32>
    %283 = vector.shape_cast %282 : vector<1x1x1x48xf32> to vector<1x48xf32>
    %284 = vector.extract_strided_slice %158 {offsets = [0, 1, 0, 0], sizes = [1, 1, 16, 16], strides = [1, 1, 1, 1]} : vector<1x2x16x16xf32> to vector<1x1x16x16xf32>
    %285 = vector.shape_cast %284 : vector<1x1x16x16xf32> to vector<16x16xf32>
    %286 = vector.extract_strided_slice %159 {offsets = [0, 1, 0, 0], sizes = [1, 1, 16, 64], strides = [1, 1, 1, 1]} : vector<1x2x16x64xf32> to vector<1x1x16x64xf32>
    %287 = vector.shape_cast %286 : vector<1x1x16x64xf32> to vector<16x64xf32>
    %288 = vector.extract_strided_slice %160 {offsets = [0, 1, 0, 0], sizes = [1, 1, 1, 64], strides = [1, 1, 1, 1]} : vector<1x2x1x64xf32> to vector<1x1x1x64xf32>
    %289 = vector.shape_cast %288 : vector<1x1x1x64xf32> to vector<1x64xf32>
    %290 = vector.extract_strided_slice %161 {offsets = [0, 1, 0, 0], sizes = [1, 1, 64, 16], strides = [1, 1, 1, 1]} : vector<1x2x64x16xf32> to vector<1x1x64x16xf32>
    %291 = vector.shape_cast %290 : vector<1x1x64x16xf32> to vector<64x16xf32>
    %292 = vector.extract_strided_slice %162 {offsets = [0, 1, 0, 0], sizes = [1, 1, 6, 16], strides = [1, 1, 1, 1]} : vector<1x2x6x16xf32> to vector<1x1x6x16xf32>
    %293 = vector.shape_cast %292 : vector<1x1x6x16xf32> to vector<6x16xf32>
    %cst_97 = arith.constant dense<0.000000e+00> : vector<16x48xf32>
    %294 = tpu.matmul %164, %281, %cst_97 {dimension_numbers = #tpu.dot_dimension_numbers<[1], [0], [0], [1], [0, 0, 1, 1], [], []>} : vector<16x16xf32>, vector<16x48xf32>, vector<16x48xf32> -> vector<16x48xf32>
    %295 = vector.broadcast %283 : vector<1x48xf32> to vector<16x48xf32>
    %296 = arith.addf %294, %295 : vector<16x48xf32>
    %297 = vector.shape_cast %296 : vector<16x48xf32> to vector<2x8x48xf32>
    %298 = vector.extract_strided_slice %297 {offsets = [0, 0, 0], sizes = [2, 8, 8], strides = [1, 1, 1]} : vector<2x8x48xf32> to vector<2x8x8xf32>
    %299 = vector.extract_strided_slice %297 {offsets = [0, 0, 16], sizes = [2, 8, 8], strides = [1, 1, 1]} : vector<2x8x48xf32> to vector<2x8x8xf32>
    %300 = vector.extract_strided_slice %297 {offsets = [0, 0, 32], sizes = [2, 8, 8], strides = [1, 1, 1]} : vector<2x8x48xf32> to vector<2x8x8xf32>
    %cst_98 = arith.constant dense<0.000000e+00> : vector<2x8x8xf32>
    %301 = tpu.matmul %298, %299, %cst_98 {dimension_numbers = #tpu.dot_dimension_numbers<[2], [2], [1], [1], [0, 0, 0, 1, 1, 1], [0], [0]>} : vector<2x8x8xf32>, vector<2x8x8xf32>, vector<2x8x8xf32> -> vector<2x8x8xf32>
    %cst_99 = arith.constant 0.353553385 : f32
    %302 = vector.broadcast %cst_99 : f32 to vector<2x8x8xf32>
    %303 = arith.mulf %301, %302 : vector<2x8x8xf32>
    %cst_100 = arith.constant dense<0xFF800000> : vector<2x8xf32>
    %304 = vector.multi_reduction <maximumf>, %303, %cst_100 [2] : vector<2x8x8xf32> to vector<2x8xf32>
    %305 = vector.shape_cast %304 : vector<2x8xf32> to vector<2x8x1xf32>
    %306 = vector.broadcast %305 : vector<2x8x1xf32> to vector<2x8x8xf32>
    %307 = arith.subf %303, %306 : vector<2x8x8xf32>
    %308 = math.exp %307 : vector<2x8x8xf32>
    %cst_101 = arith.constant dense<0.000000e+00> : vector<2x8xf32>
    %309 = vector.multi_reduction <add>, %308, %cst_101 [2] : vector<2x8x8xf32> to vector<2x8xf32>
    %310 = vector.shape_cast %309 : vector<2x8xf32> to vector<2x8x1xf32>
    %311 = vector.broadcast %310 : vector<2x8x1xf32> to vector<2x8x8xf32>
    %312 = arith.divf %308, %311 : vector<2x8x8xf32>
    %cst_102 = arith.constant dense<0.000000e+00> : vector<2x8x8xf32>
    %313 = tpu.matmul %312, %300, %cst_102 {dimension_numbers = #tpu.dot_dimension_numbers<[2], [1], [1], [2], [0, 0, 0, 1, 1, 2], [0], [0]>} : vector<2x8x8xf32>, vector<2x8x8xf32>, vector<2x8x8xf32> -> vector<2x8x8xf32>
    %314 = vector.extract_strided_slice %297 {offsets = [0, 0, 8], sizes = [2, 8, 8], strides = [1, 1, 1]} : vector<2x8x48xf32> to vector<2x8x8xf32>
    %315 = vector.extract_strided_slice %297 {offsets = [0, 0, 24], sizes = [2, 8, 8], strides = [1, 1, 1]} : vector<2x8x48xf32> to vector<2x8x8xf32>
    %316 = vector.extract_strided_slice %297 {offsets = [0, 0, 40], sizes = [2, 8, 8], strides = [1, 1, 1]} : vector<2x8x48xf32> to vector<2x8x8xf32>
    %cst_103 = arith.constant dense<0.000000e+00> : vector<2x8x8xf32>
    %317 = tpu.matmul %314, %315, %cst_103 {dimension_numbers = #tpu.dot_dimension_numbers<[2], [2], [1], [1], [0, 0, 0, 1, 1, 1], [0], [0]>} : vector<2x8x8xf32>, vector<2x8x8xf32>, vector<2x8x8xf32> -> vector<2x8x8xf32>
    %cst_104 = arith.constant 0.353553385 : f32
    %318 = vector.broadcast %cst_104 : f32 to vector<2x8x8xf32>
    %319 = arith.mulf %317, %318 : vector<2x8x8xf32>
    %cst_105 = arith.constant dense<0xFF800000> : vector<2x8xf32>
    %320 = vector.multi_reduction <maximumf>, %319, %cst_105 [2] : vector<2x8x8xf32> to vector<2x8xf32>
    %321 = vector.shape_cast %320 : vector<2x8xf32> to vector<2x8x1xf32>
    %322 = vector.broadcast %321 : vector<2x8x1xf32> to vector<2x8x8xf32>
    %323 = arith.subf %319, %322 : vector<2x8x8xf32>
    %324 = math.exp %323 : vector<2x8x8xf32>
    %cst_106 = arith.constant dense<0.000000e+00> : vector<2x8xf32>
    %325 = vector.multi_reduction <add>, %324, %cst_106 [2] : vector<2x8x8xf32> to vector<2x8xf32>
    %326 = vector.shape_cast %325 : vector<2x8xf32> to vector<2x8x1xf32>
    %327 = vector.broadcast %326 : vector<2x8x1xf32> to vector<2x8x8xf32>
    %328 = arith.divf %324, %327 : vector<2x8x8xf32>
    %cst_107 = arith.constant dense<0.000000e+00> : vector<2x8x8xf32>
    %329 = tpu.matmul %328, %316, %cst_107 {dimension_numbers = #tpu.dot_dimension_numbers<[2], [1], [1], [2], [0, 0, 0, 1, 1, 2], [0], [0]>} : vector<2x8x8xf32>, vector<2x8x8xf32>, vector<2x8x8xf32> -> vector<2x8x8xf32>
    %330 = tpu.concatenate %313, %329 in 2 : vector<2x8x8xf32>, vector<2x8x8xf32> -> vector<2x8x16xf32>
    %331 = vector.shape_cast %330 : vector<2x8x16xf32> to vector<16x16xf32>
    %cst_108 = arith.constant dense<0.000000e+00> : vector<16x16xf32>
    %332 = tpu.matmul %331, %285, %cst_108 {dimension_numbers = #tpu.dot_dimension_numbers<[1], [0], [0], [1], [0, 0, 1, 1], [], []>} : vector<16x16xf32>, vector<16x16xf32>, vector<16x16xf32> -> vector<16x16xf32>
    %333 = vector.extract_strided_slice %293 {offsets = [0, 0], sizes = [1, 16], strides = [1, 1]} : vector<6x16xf32> to vector<1x16xf32>
    %334 = vector.broadcast %333 : vector<1x16xf32> to vector<16x16xf32>
    %335 = arith.addf %332, %334 : vector<16x16xf32>
    %336 = arith.addf %164, %335 : vector<16x16xf32>
    %337 = vector.extract_strided_slice %293 {offsets = [1, 0], sizes = [1, 16], strides = [1, 1]} : vector<6x16xf32> to vector<1x16xf32>
    %338 = vector.extract_strided_slice %293 {offsets = [2, 0], sizes = [1, 16], strides = [1, 1]} : vector<6x16xf32> to vector<1x16xf32>
    %cst_109 = arith.constant dense<0.000000e+00> : vector<16xf32>
    %339 = vector.multi_reduction <add>, %336, %cst_109 [1] : vector<16x16xf32> to vector<16xf32>
    %340 = vector.shape_cast %339 : vector<16xf32> to vector<16x1xf32>
    %cst_110 = arith.constant 1.600000e+01 : f32
    %341 = vector.broadcast %cst_110 : f32 to vector<16x1xf32>
    %342 = arith.divf %340, %341 : vector<16x1xf32>
    %343 = vector.broadcast %342 : vector<16x1xf32> to vector<16x16xf32>
    %344 = arith.subf %336, %343 : vector<16x16xf32>
    %345 = arith.mulf %344, %344 : vector<16x16xf32>
    %cst_111 = arith.constant dense<0.000000e+00> : vector<16xf32>
    %346 = vector.multi_reduction <add>, %345, %cst_111 [1] : vector<16x16xf32> to vector<16xf32>
    %347 = vector.shape_cast %346 : vector<16xf32> to vector<16x1xf32>
    %cst_112 = arith.constant 1.600000e+01 : f32
    %348 = vector.broadcast %cst_112 : f32 to vector<16x1xf32>
    %349 = arith.divf %347, %348 : vector<16x1xf32>
    %350 = vector.broadcast %342 : vector<16x1xf32> to vector<16x16xf32>
    %351 = arith.subf %336, %350 : vector<16x16xf32>
    %cst_113 = arith.constant 9.99999974E-6 : f32
    %352 = vector.broadcast %cst_113 : f32 to vector<16x1xf32>
    %353 = arith.addf %349, %352 : vector<16x1xf32>
    %354 = math.rsqrt %353 : vector<16x1xf32>
    %355 = vector.broadcast %354 : vector<16x1xf32> to vector<16x16xf32>
    %356 = arith.mulf %351, %355 : vector<16x16xf32>
    %357 = vector.broadcast %337 : vector<1x16xf32> to vector<16x16xf32>
    %358 = arith.mulf %356, %357 : vector<16x16xf32>
    %359 = vector.broadcast %338 : vector<1x16xf32> to vector<16x16xf32>
    %360 = arith.addf %358, %359 : vector<16x16xf32>
    %cst_114 = arith.constant dense<0.000000e+00> : vector<16x64xf32>
    %361 = tpu.matmul %360, %287, %cst_114 {dimension_numbers = #tpu.dot_dimension_numbers<[1], [0], [0], [1], [0, 0, 1, 1], [], []>} : vector<16x16xf32>, vector<16x64xf32>, vector<16x64xf32> -> vector<16x64xf32>
    %362 = vector.broadcast %289 : vector<1x64xf32> to vector<16x64xf32>
    %363 = arith.addf %361, %362 : vector<16x64xf32>
    %cst_115 = arith.constant 0.000000e+00 : f32
    %364 = vector.broadcast %cst_115 : f32 to vector<16x64xf32>
    %365 = arith.maximumf %363, %364 : vector<16x64xf32>
    %cst_116 = arith.constant dense<0.000000e+00> : vector<16x16xf32>
    %366 = tpu.matmul %365, %291, %cst_116 {dimension_numbers = #tpu.dot_dimension_numbers<[1], [0], [0], [1], [0, 0, 1, 1], [], []>} : vector<16x64xf32>, vector<64x16xf32>, vector<16x16xf32> -> vector<16x16xf32>
    %367 = vector.extract_strided_slice %293 {offsets = [3, 0], sizes = [1, 16], strides = [1, 1]} : vector<6x16xf32> to vector<1x16xf32>
    %368 = vector.broadcast %367 : vector<1x16xf32> to vector<16x16xf32>
    %369 = arith.addf %366, %368 : vector<16x16xf32>
    %370 = arith.addf %360, %369 : vector<16x16xf32>
    %371 = vector.extract_strided_slice %293 {offsets = [4, 0], sizes = [1, 16], strides = [1, 1]} : vector<6x16xf32> to vector<1x16xf32>
    %372 = vector.extract_strided_slice %293 {offsets = [5, 0], sizes = [1, 16], strides = [1, 1]} : vector<6x16xf32> to vector<1x16xf32>
    %cst_117 = arith.constant dense<0.000000e+00> : vector<16xf32>
    %373 = vector.multi_reduction <add>, %370, %cst_117 [1] : vector<16x16xf32> to vector<16xf32>
    %374 = vector.shape_cast %373 : vector<16xf32> to vector<16x1xf32>
    %cst_118 = arith.constant 1.600000e+01 : f32
    %375 = vector.broadcast %cst_118 : f32 to vector<16x1xf32>
    %376 = arith.divf %374, %375 : vector<16x1xf32>
    %377 = vector.broadcast %376 : vector<16x1xf32> to vector<16x16xf32>
    %378 = arith.subf %370, %377 : vector<16x16xf32>
    %379 = arith.mulf %378, %378 : vector<16x16xf32>
    %cst_119 = arith.constant dense<0.000000e+00> : vector<16xf32>
    %380 = vector.multi_reduction <add>, %379, %cst_119 [1] : vector<16x16xf32> to vector<16xf32>
    %381 = vector.shape_cast %380 : vector<16xf32> to vector<16x1xf32>
    %cst_120 = arith.constant 1.600000e+01 : f32
    %382 = vector.broadcast %cst_120 : f32 to vector<16x1xf32>
    %383 = arith.divf %381, %382 : vector<16x1xf32>
    %384 = vector.broadcast %376 : vector<16x1xf32> to vector<16x16xf32>
    %385 = arith.subf %370, %384 : vector<16x16xf32>
    %cst_121 = arith.constant 9.99999974E-6 : f32
    %386 = vector.broadcast %cst_121 : f32 to vector<16x1xf32>
    %387 = arith.addf %383, %386 : vector<16x1xf32>
    %388 = math.rsqrt %387 : vector<16x1xf32>
    %389 = vector.broadcast %388 : vector<16x1xf32> to vector<16x16xf32>
    %390 = arith.mulf %385, %389 : vector<16x16xf32>
    %391 = vector.broadcast %371 : vector<1x16xf32> to vector<16x16xf32>
    %392 = arith.mulf %390, %391 : vector<16x16xf32>
    %393 = vector.broadcast %372 : vector<1x16xf32> to vector<16x16xf32>
    %394 = arith.addf %392, %393 : vector<16x16xf32>
    %395 = tpu.concatenate %279, %394 in 1 : vector<16x16xf32>, vector<16x16xf32> -> vector<16x32xf32>
    %396 = vector.shape_cast %395 : vector<16x32xf32> to vector<2x8x32xf32>
    %c0_122 = arith.constant 0 : index
    %c0_123 = arith.constant 0 : index
    %c0_124 = arith.constant 0 : index
    %397 = vector.load %arg13[%c0_122, %c0_123, %c0_124] : memref<2x8x32xf32, #tpu.memory_space<vmem>>, vector<2x8x32xf32>
    tpu.vector_store %arg13[%c0_122, %c0_123, %c0_124], %396 {strides = array<i32>} : memref<2x8x32xf32, #tpu.memory_space<vmem>>, vector<2x8x32xf32>,
    return
  }
}

</mosaic_0001>

<bundles_post_ra>
// kernel: _lambda_.5
= control target key start
LH: loop header
LB: loop body
LE: loop exit
PB: predicated region body
PF: predicated region fallthrough
CT: control target
= control target key end

     0   :  { %vm37_vm0 = vcmask 261120   ;;  %s1535_s0 = inlined_call_operand.vmem [shape: f32[2,8,32], index: 0, kind: input, shape index: {}]   ;;  %s1536_s1 = inlined_call_operand.vmem [shape: f32[2,8,32], index: 1, kind: input, shape index: {}]   ;;  %s1537_s2 = inlined_call_operand.vmem [shape: f32[2,32], index: 2, kind: input, shape index: {}]   ;;  %s1538_s3 = inlined_call_operand.vmem [shape: f32[256,32], index: 3, kind: input, shape index: {}]   ;;  %s1539_s4 = inlined_call_operand.vmem [shape: f32[6,32], index: 4, kind: input, shape index: {}]   ;;  %s1540_s5 = inlined_call_operand.vmem [shape: f32[32,32], index: 5, kind: input, shape index: {}]   ;;  %s1541_s6 = inlined_call_operand.vmem [shape: f32[32,3], index: 6, kind: input, shape index: {}]   ;;  %s1542_s7 = inlined_call_operand.vmem [shape: f32[1,3], index: 7, kind: input, shape index: {}]   ;;  %s1543_s8 = inlined_call_operand.hbm [shape: f32[2,3], index: 8, kind: output, shape index: {}]  }
   0x1   :  { %v31_v0 = vld [vmem:[%s1535_s0] sm:$0xff]  ;;  %v32_v2 = vld [vmem:[%s1535_s0 + $0x8] sm:$0xff] }
   0x2   :  { %v33_v1 = vld [vmem:[%s1536_s1] sm:$0xff]  ;;  %v34_v4 = vld [vmem:[%s1536_s1 + $0x8] sm:$0xff] }
   0x3   :  { %v35_v3 = vadd.f32 %v33_v1, %v31_v0 }
   0x4   :  { %13 = vsyncpa [#allocation3], 0  ;;  %v36_v5 = vadd.f32 %v34_v4, %v32_v2  ;;  %v81_v18 = vld [vmem:[%s1538_s3 + $0x20] sm:$0xff]  ;;  %v82_v19 = vld [vmem:[%s1538_s3 + $0x28] sm:$0xff]  ;;  %v1223_v21 = vmov 0.0|0.0   ;;  %vm1224_vm1 = vmmov 0   ;;  %v65_v34 = vlaneseq }
   0x5   :  { %v38_v6 = vsel %vm37_vm0, %v35_v3, 0.0  ;;  %v1128_v20 = vpack.c.bf16 %v82_v19, %v81_v18  ;;  %1127 = vmatprep.subr.bf16.mxu0 %v1223_v21  ;;  %1133 = vmatprep.subr.bf16.mxu1 %v1223_v21  ;;  %v77_v22 = vld [vmem:[%s1538_s3] sm:$0xff]  ;;  %v78_v23 = vld [vmem:[%s1538_s3 + $0x8] sm:$0xff]  ;;  %v83_v25 = vld [vmem:[%s1538_s3 + $0x30] sm:$0xff]  ;;  %v1225_v31 = vmov 0.0   ;;  %vm113_vm2 = vcmask 1041409  }
   0x6   :  { %39 = vadd.xlane.f32.xlu0 %v38_v6  ;;  %v41_v7 = vsel %vm37_vm0, %v36_v5, 0.0  ;;  %v1134_v24 = vpack.c.bf16 %v78_v23, %v77_v22  ;;  %v84_v26 = vld [vmem:[%s1538_s3 + $0x38] sm:$0xff]  ;;  %v79_v28 = vld [vmem:[%s1538_s3 + $0x10] sm:$0xff]  ;;  %1025 = vmatprep.mubr.msk.f32.mxu0 %vm1224_vm1, %v1225_v31  ;;  %v1322_v38 = vshrl.u32 %v65_v34, 7  ;;  %v30_v41 = vld [vmem:[%s1537_s2] sm:$0x3] }
   0x7   :  { %1129 = vmatpush3.bf16.msra.mxu0 %v1128_v20  ;;  %v1131_v27 = vpack.c.bf16 %v84_v26, %v83_v25  ;;  %v80_v29 = vld [vmem:[%s1538_s3 + $0x18] sm:$0xff]  ;;  %1036 = vmatprep.mubr.msk.f32.mxu1 %vm1224_vm1, %v1225_v31  ;;  %v85_v51 = vld [vmem:[%s1538_s3 + $0x40] sm:$0xff]  ;;  %v86_v52 = vld [vmem:[%s1538_s3 + $0x48] sm:$0xff]  ;;  %vm725_vm4 = vcmask 254976   ;;  %s1226_s18 = smov [#allocation2]   ;;  %vm940_vm6 = vcmask 17408  }
   0x8   :  { %1130 = vmatprep.subr.bf16.mxu0 %v1223_v21  ;;  %1135 = vmatpush3.bf16.msra.mxu1 %v1134_v24  ;;  %v1137_v30 = vpack.c.bf16 %v80_v29, %v79_v28  ;;  %v67_v40 = vsub.s32 0, %v1322_v38  ;;  %v73_v42 = vsub.s32 1, %v1322_v38  ;;  %v89_v54 = vld [vmem:[%s1538_s3 + $0x60] sm:$0xff]  ;;  %v90_v55 = vld [vmem:[%s1538_s3 + $0x68] sm:$0xff]  ;;  %v1140_v58 = vpack.c.bf16 %v86_v52, %v85_v51  ;;  %v87_v59 = vld [vmem:[%s1538_s3 + $0x50] sm:$0xff]  ;;  %s948_s19 = sshll.u32 %s1226_s18, 4  ;;  %s949_s19 = int_to_ptr.vmem [resolvable:$true] %s948_s19 }
   0x9   :  { %1136 = vmatprep.subr.bf16.mxu1 %v1223_v21  ;;  %v88_v60 = vld [vmem:[%s1538_s3 + $0x58] sm:$0xff]  ;;  %v1146_v63 = vpack.c.bf16 %v90_v55, %v89_v54  ;;  %v91_v0 = vld [vmem:[%s1538_s3 + $0x70] sm:$0xff]  ;;  %v93_v4 = vld [vmem:[%s1538_s3 + $0x80] sm:$0xff]  ;;  %s1199_s20 = scalar_lea.vmem %s949_s19, 32  ;;  %p1204_p1 = scmp.lt.s32.totalorder %s949_s19, %s949_s19 }
   0xa   :  { %42 = vadd.xlane.f32.xlu0 %v41_v7  ;;  %v68_v43 = vrot.slane %v30_v41, %v67_v40  ;;  %v74_v46 = vrot.slane %v30_v41, %v73_v42  ;;  %v92_v1 = vld [vmem:[%s1538_s3 + $0x78] sm:$0xff]  ;;  %v99_v18 = vld [vmem:[%s1538_s3 + $0xb0] sm:$0xff]  ;;  %v101_v23 = vld [vmem:[%s1538_s3 + $0xc0] sm:$0xff]  ;;  %p1200_p0 = scmp.ne.s32.totalorder %s949_s19, %s1199_s20  ;;  %p1205_p2 = scmp.lt.s32.totalorder %s1199_s20, %s1199_s20 }
   0xb   :  { %1132 = vmatpush3.bf16.msra.mxu0 %v1131_v27  ;;  %v1149_v6 = vpack.c.bf16 %v92_v1, %v91_v0  ;;  %v100_v19 = vld [vmem:[%s1538_s3 + $0xb8] sm:$0xff]  ;;  %v102_v24 = vld [vmem:[%s1538_s3 + $0xc8] sm:$0xff]  ;;  %v105_v27 = vld [vmem:[%s1538_s3 + $0xe0] sm:$0xff] }
   0xc   :  { %1139 = vmatprep.subr.bf16.mxu0 %v1223_v21  ;;  %1138 = vmatpush3.bf16.msra.mxu1 %v1137_v30  ;;  %v1161_v25 = vpack.c.bf16 %v100_v19, %v99_v18  ;;  %v106_v28 = vld [vmem:[%s1538_s3 + $0xe8] sm:$0xff]  ;;  %v1164_v30 = vpack.c.bf16 %v102_v24, %v101_v23  ;;  %v104_v34 = vld [vmem:[%s1538_s3 + $0xd8] sm:$0xff]  ;;  %v751_v24 = vld [vmem:[%s1540_s5 + $0x10] sm:$0xff]  ;;  %p1206_p3 = por %p1205_p2, %p1204_p1 }
   0xd   :  { %1145 = vmatprep.subr.bf16.mxu1 %v1223_v21  ;;  %v108_v41 = vld [vmem:[%s1538_s3 + $0xf8] sm:$0xff] }
   0xe   :  { %p1207_p4 = pnand %p1206_p3, %p1200_p0 }
  0x93   :  { %v40_v8 = vpop.xlane.xlu0 %39 }
  0x94   :  { %v45_v9 = vmul.f32 0.03125, %v40_v8  ;;  %v97_v8 = vld [vmem:[%s1538_s3 + $0xa0] sm:$0xff] }
  0x96   :  { %v47_v10 = vsub.f32 %v35_v3, %v45_v9  ;;  %v1143_v3 = vpack.c.bf16 %v88_v60, %v87_v59  ;;  %v98_v9 = vld [vmem:[%s1538_s3 + $0xa8] sm:$0xff] }
  0x97   :  { %v43_v11 = vpop.xlane.xlu0 %42 }
  0x98   :  { %v46_v12 = vmul.f32 0.03125, %v43_v11  ;;  %v49_v13 = vmul.f32 %v47_v10, %v47_v10 }
  0x9a   :  { %v48_v14 = vsub.f32 %v36_v5, %v46_v12  ;;  %v51_v15 = vsel %vm37_vm0, %v49_v13, 0.0  ;;  %v94_v5 = vld [vmem:[%s1538_s3 + $0x88] sm:$0xff]  ;;  %v95_v13 = vld [vmem:[%s1538_s3 + $0x90] sm:$0xff] }
  0x9b   :  { %52 = vadd.xlane.f32.xlu1 %v51_v15  ;;  %v1152_v11 = vpack.c.bf16 %v94_v5, %v93_v4 }
  0x9c   :  { %v50_v16 = vmul.f32 %v48_v14, %v48_v14 }
  0x9e   :  { %v54_v17 = vsel %vm37_vm0, %v50_v16, 0.0 }
  0x9f   :  { %55 = vadd.xlane.f32.xlu1 %v54_v17  ;;  %v1158_v17 = vpack.c.bf16 %v98_v9, %v97_v8 }
 0x128   :  { %v53_v32 = vpop.xlane.xlu1 %52 }
 0x129   :  { %v57_v33 = vmul.f32 0.03125, %v53_v32 }
 0x12b   :  { %v59_v35 = vadd.f32 1e-05, %v57_v33  ;;  %v103_v33 = vld [vmem:[%s1538_s3 + $0xd0] sm:$0xff] }
 0x12c   :  { %v56_v36 = vpop.xlane.xlu1 %55 }
 0x12d   :  { %1191 = vrsqrt.f32 %v59_v35  ;;  %v58_v37 = vmul.f32 0.03125, %v56_v36 }
 0x12f   :  { %v60_v39 = vadd.f32 1e-05, %v58_v37  ;;  %v1170_v37 = vpack.c.bf16 %v106_v28, %v105_v27 }
 0x131   :  { %1193 = vrsqrt.f32 %v60_v39  ;;  %v107_v39 = vld [vmem:[%s1538_s3 + $0xf0] sm:$0xff] }
 0x137   :  { %v1192_v44 = vpop.eup %1191 }
 0x138   :  { %v63_v45 = vmul.f32 %v1192_v44, %v47_v10  ;;  %v1167_v44 = vpack.c.bf16 %v104_v34, %v103_v33 }
 0x13a   :  { %v69_v47 = vmul.f32 %v68_v43, %v63_v45  ;;  %v1173_v45 = vpack.c.bf16 %v108_v41, %v107_v39  ;;  %v755_v39 = vsub.s32 3, %v1322_v38 }
 0x13b   :  { %v1194_v48 = vpop.eup %1193 }
 0x13c   :  { %v1333_v49 = vadd.f32 %v74_v46, %v69_v47  ;;  %v64_v50 = vmul.f32 %v1194_v48, %v48_v14  ;;  %v96_v14 = vld [vmem:[%s1538_s3 + $0x98] sm:$0xff] }
 0x13d   :  { %v1155_v22 = vpack.c.bf16 %v96_v14, %v95_v13 }
 0x13e   :  { %v70_v53 = vmul.f32 %v68_v43, %v64_v50  ;;  %v112_v57 = vrot.slane %v1333_v49, 1  ;;  %v261_v10 = vrot.slane %v1333_v49, 2  ;;  %v337_v16 = vrot.slane %v1333_v49, 3 }
 0x13f   :  { %v413_v29 = vrot.slane %v1333_v49, 4  ;;  %v489_v36 = vrot.slane %v1333_v49, 5  ;;  %v565_v47 = vrot.slane %v1333_v49, 6  ;;  %v641_v51 = vrot.slane %v1333_v49, 7 }
 0x140   :  { %v1347_v56 = vadd.f32 %v74_v46, %v70_v53 }
 0x142   :  { %v114_v61 = vsel %vm113_vm2, %v1347_v56, %v112_v57  ;;  %v187_v62 = vrot.slane %v1347_v56, 7  ;;  %v262_v7 = vrot.slane %v1347_v56, 1  ;;  %v338_v12 = vrot.slane %v1347_v56, 2 }
 0x143   :  { %1026 = vmatmul.mubr.msk.f32.vlgmr.msra.gmra.mrb[0].mxu0 %vm37_vm0, %v114_v61  ;;  %v414_v26 = vrot.slane %v1347_v56, 3  ;;  %v490_v32 = vrot.slane %v1347_v56, 4  ;;  %v566_v46 = vrot.slane %v1347_v56, 5  ;;  %v642_v48 = vrot.slane %v1347_v56, 6 }
 0x144   :  { %1141 = vmatpush3.bf16.msra.mxu0 %v1140_v58  ;;  %v188_v2 = vsel %vm113_vm2, %v187_v62, %v1333_v49  ;;  %1047 = vmatprep.mubr.msk.f32.mxu0 %vm1224_vm1, %v1225_v31  ;;  %v263_v15 = vsel %vm113_vm2, %v262_v7, %v261_v10  ;;  %v339_v20 = vsel %vm113_vm2, %v338_v12, %v337_v16 }
 0x145   :  { %1037 = vmatmul.mubr.msk.f32.vlgmr.msra.gmra.mrb[0].mxu1 %vm37_vm0, %v188_v2  ;;  %1142 = vmatprep.subr.bf16.mxu0 %v1223_v21  ;;  %v415_v35 = vsel %vm113_vm2, %v414_v26, %v413_v29  ;;  %v491_v43 = vsel %vm113_vm2, %v490_v32, %v489_v36  ;;  %v567_v50 = vsel %vm113_vm2, %v566_v46, %v565_v47 }
 0x146   :  { %1147 = vmatpush3.bf16.msra.mxu1 %v1146_v63  ;;  %1058 = vmatprep.mubr.msk.f32.mxu1 %vm1224_vm1, %v1225_v31  ;;  %v643_v52 = vsel %vm113_vm2, %v642_v48, %v641_v51 }
 0x147   :  { %1148 = vmatprep.subr.bf16.mxu1 %v1223_v21 }
 0x148   :  { %1144 = vmatpush3.bf16.msra.mxu0 %v1143_v3 }
 0x149   :  { %1151 = vmatprep.subr.bf16.mxu0 %v1223_v21 }
 0x14a   :  { %1150 = vmatpush3.bf16.msra.mxu1 %v1149_v6 }
 0x14b   :  { %1048 = vmatmul.mubr.msk.f32.vlgmr.msra.gmra.mrb[2].mxu0 %vm37_vm0, %v263_v15  ;;  %1157 = vmatprep.subr.bf16.mxu1 %v1223_v21 }
 0x14c   :  { %1153 = vmatpush3.bf16.msra.mxu0 %v1152_v11  ;;  %1069 = vmatprep.mubr.msk.f32.mxu0 %vm1224_vm1, %v1225_v31 }
 0x14d   :  { %1059 = vmatmul.mubr.msk.f32.vlgmr.msra.gmra.mrb[2].mxu1 %vm37_vm0, %v339_v20  ;;  %1154 = vmatprep.subr.bf16.mxu0 %v1223_v21 }
 0x14e   :  { %1159 = vmatpush3.bf16.msra.mxu1 %v1158_v17  ;;  %1080 = vmatprep.mubr.msk.f32.mxu1 %vm1224_vm1, %v1225_v31 }
 0x14f   :  { %1160 = vmatprep.subr.bf16.mxu1 %v1223_v21 }
 0x150   :  { %1156 = vmatpush3.bf16.msra.mxu0 %v1155_v22  ;;  %v750_v22 = vld [vmem:[%s1540_s5 + $0x8] sm:$0xff] }
 0x151   :  { %1163 = vmatprep.subr.bf16.mxu0 %v1223_v21 }
 0x152   :  { %1162 = vmatpush3.bf16.msra.mxu1 %v1161_v25  ;;  %v752_v25 = vld [vmem:[%s1540_s5 + $0x18] sm:$0xff] }
 0x153   :  { %1070 = vmatmul.mubr.msk.f32.vlgmr.msra.gmra.mrb[4].mxu0 %vm37_vm0, %v415_v35  ;;  %1169 = vmatprep.subr.bf16.mxu1 %v1223_v21  ;;  %v1179_v26 = vpack.c.bf16 %v752_v25, %v751_v24 }
 0x154   :  { %1165 = vmatpush3.bf16.msra.mxu0 %v1164_v30  ;;  %1091 = vmatprep.mubr.msk.f32.mxu0 %vm1224_vm1, %v1225_v31  ;;  %v746_v30 = vsub.s32 2, %v1322_v38 }
 0x155   :  { %1081 = vmatmul.mubr.msk.f32.vlgmr.msra.gmra.mrb[4].mxu1 %vm37_vm0, %v491_v43  ;;  %1166 = vmatprep.subr.bf16.mxu0 %v1223_v21 }
 0x156   :  { %1171 = vmatpush3.bf16.msra.mxu1 %v1170_v37  ;;  %1102 = vmatprep.mubr.msk.f32.mxu1 %vm1224_vm1, %v1225_v31 }
 0x157   :  { %1172 = vmatprep.subr.bf16.mxu1 %v1223_v21 }
 0x158   :  { %1168 = vmatpush3.bf16.msra.mxu0 %v1167_v44 }
 0x159   :  { %1175 = vmatprep.subr.bf16.mxu0 %v1223_v21 }
 0x15a   :  { %1174 = vmatpush3.bf16.msra.mxu1 %v1173_v45 }
 0x15b   :  { %1092 = vmatmul.mubr.msk.f32.vlgmr.msra.gmra.mrb[6].mxu0 %vm37_vm0, %v567_v50  ;;  %1181 = vmatprep.subr.bf16.mxu1 %v1223_v21 }
 0x15c   :  { %1113 = vmatprep.mubr.msk.f32.mxu0 %vm1224_vm1, %v1225_v31 }
 0x15d   :  { %1103 = vmatmul.mubr.msk.f32.vlgmr.msra.gmra.mrb[6].mxu1 %vm37_vm0, %v643_v52 }
 0x15e   :  { %1124 = vmatprep.mubr.msk.f32.mxu1 %vm1224_vm1, %v1225_v31  ;;  %v1472_v31 = vld [vmem:[%s1539_s4] sm:$0x3f] }
 0x15f   :  { %v720_v8 = vrot.slane %v1472_v31, %v67_v40  ;;  %v749_v40 = vld [vmem:[%s1540_s5] sm:$0xff]  ;;  %v742_v32 = vrot.slane %v1472_v31, %v73_v42  ;;  %v747_v35 = vrot.slane %v1472_v31, %v746_v30  ;;  %v756_v41 = vrot.slane %v1472_v31, %v755_v39 }
 0x160   :  { %v1176_v23 = vpack.c.bf16 %v750_v22, %v749_v40 }
 0x162   :  { %1177 = vmatpush3.bf16.msra.mxu0 %v1176_v23 }
 0x163   :  { %1178 = vmatprep.subr.bf16.mxu0 %v1223_v21 }
 0x166   :  { %1180 = vmatpush3.bf16.msra.mxu0 %v1179_v26 }
 0x216   :  { %v183_v53 = vpop.f32.mrb[0].mxu0 }
 0x217   :  { %v1027_v54 = vpop.f32.mrb[1].mxu0 }
 0x218   :  { %v257_v55 = vpop.f32.mrb[0].mxu1  ;;  %v856_v54 = vld [vmem:[%s1541_s6] sm:$0xff] }
 0x219   :  { %v258_v56 = vadd.f32 %v257_v55, %v183_v53  ;;  %v1038_v57 = vpop.f32.mrb[1].mxu1  ;;  %v857_v55 = vld [vmem:[%s1541_s6 + $0x8] sm:$0xff] }
 0x21a   :  { %v858_v57 = vld [vmem:[%s1541_s6 + $0x10] sm:$0xff] }
 0x21e   :  { %v332_v49 = vpop.f32.mrb[2].mxu0 }
 0x21f   :  { %v336_v58 = vadd.f32 %v332_v49, %v258_v56  ;;  %v1049_v59 = vpop.f32.mrb[3].mxu0  ;;  %v1182_v56 = vpack.c.bf16 %v857_v55, %v856_v54  ;;  %v859_v49 = vld [vmem:[%s1541_s6 + $0x18] sm:$0xff] }
 0x220   :  { %v408_v60 = vpop.f32.mrb[2].mxu1 }
 0x221   :  { %v412_v61 = vadd.f32 %v408_v60, %v336_v58  ;;  %v1060_v62 = vpop.f32.mrb[3].mxu1  ;;  %1183 = vmatpush3.bf16.msra.mxu1 %v1182_v56  ;;  %v1185_v58 = vpack.c.bf16 %v859_v49, %v858_v57 }
 0x222   :  { %1184 = vmatprep.subr.bf16.mxu1 %v1223_v21  ;;  %v848_v62 = vsub.s32 4, %v1322_v38 }
 0x224   :  { %v849_v21 = vrot.slane %v1472_v31, %v848_v62 }
 0x225   :  { %1186 = vmatpush3.bf16.msra.mxu1 %v1185_v58 }
 0x226   :  { %v484_v63 = vpop.f32.mrb[4].mxu0 }
 0x227   :  { %v488_v0 = vadd.f32 %v484_v63, %v412_v61  ;;  %v1071_v1 = vpop.f32.mrb[5].mxu0  ;;  %v853_v63 = vsub.s32 5, %v1322_v38 }
 0x228   :  { %v560_v2 = vpop.f32.mrb[4].mxu1 }
 0x229   :  { %v564_v3 = vadd.f32 %v560_v2, %v488_v0  ;;  %v1082_v4 = vpop.f32.mrb[5].mxu1  ;;  %v854_v2 = vrot.slane %v1472_v31, %v853_v63 }
 0x22e   :  { %v636_v5 = vpop.f32.mrb[6].mxu0 }
 0x22f   :  { %v640_v6 = vadd.f32 %v636_v5, %v564_v3  ;;  %v1093_v7 = vpop.f32.mrb[7].mxu0  ;;  %v965_v5 = vld [vmem:[%s1542_s7] ss:$0 sm:$0xff] }
 0x230   :  { %v712_v9 = vpop.f32.mrb[6].mxu1 }
 0x231   :  { %v716_v10 = vadd.f32 %v712_v9, %v640_v6  ;;  %v1104_v11 = vpop.f32.mrb[7].mxu1 }
 0x233   :  { %v721_v12 = vadd.f32 %v720_v8, %v716_v10 }
 0x235   :  { %vm722_vm3 = vcmp.gt.f32.partialorder %v721_v12, 0.0  ;;  %v723_v13 = vmul.f32 0.01, %v721_v12 }
 0x237   :  { %v724_v14 = vsel %vm722_vm3, %v721_v12, %v723_v13 }
 0x238   :  { %v726_v15 = vsel %vm725_vm4, %v724_v14, 0.0 }
 0x239   :  { %727 = vadd.xlane.f32.xlu0 %v726_v15 }
 0x2c6   :  { %v728_v16 = vpop.xlane.xlu0 %727 }
 0x2c7   :  { %v729_v17 = vmul.f32 0.03125, %v728_v16 }
 0x2c9   :  { %v730_v18 = vsub.f32 %v724_v14, %v729_v17 }
 0x2cb   :  { %v731_v19 = vmul.f32 %v730_v18, %v730_v18 }
 0x2cd   :  { %v732_v20 = vsel %vm725_vm4, %v731_v19, 0.0 }
 0x2ce   :  { %733 = vadd.xlane.f32.xlu1 %v732_v20 }
 0x35b   :  { %v734_v27 = vpop.xlane.xlu1 %733 }
 0x35c   :  { %v735_v28 = vmul.f32 0.03125, %v734_v27 }
 0x35e   :  { %v736_v29 = vadd.f32 1e-05, %v735_v28 }
 0x360   :  { %1195 = vrsqrt.f32 %v736_v29 }
 0x36a   :  { %v1196_v33 = vpop.eup %1195 }
 0x36b   :  { %v738_v34 = vmul.f32 %v1196_v33, %v730_v18 }
 0x36d   :  { %v743_v36 = vmul.f32 %v742_v32, %v738_v34 }
 0x36f   :  { %v748_v37 = vadd.f32 %v747_v35, %v743_v36 }
 0x371   :  { %1114 = vmatmul.mubr.msk.f32.vlgmr.msra.gmra.mrb[8].mxu0 %vm37_vm0, %v748_v37 }
 0x444   :  { %v826_v43 = vpop.f32.mrb[8].mxu0 }
 0x445   :  { %v827_v44 = vadd.f32 %v826_v43, %v756_v41  ;;  %v1115_v45 = vpop.f32.mrb[9].mxu0 }
 0x447   :  { %v831_v46 = vmul.f32 0.01, %v827_v44  ;;  %vm830_vm5 = vcmp.gt.f32.partialorder %v827_v44, 0.0 }
 0x449   :  { %v832_v47 = vsel %vm830_vm5, %v827_v44, %v831_v46 }
 0x44a   :  { %v833_v42 = vsel %vm725_vm4, %v832_v47, 0.0 }
 0x44b   :  { %834 = vadd.xlane.f32.xlu0 %v833_v42 }
 0x4d8   :  { %v835_v48 = vpop.xlane.xlu0 %834 }
 0x4d9   :  { %v836_v50 = vmul.f32 0.03125, %v835_v48 }
 0x4db   :  { %v837_v51 = vsub.f32 %v832_v47, %v836_v50 }
 0x4dd   :  { %v838_v52 = vmul.f32 %v837_v51, %v837_v51 }
 0x4df   :  { %v839_v53 = vsel %vm725_vm4, %v838_v52, 0.0 }
 0x4e0   :  { %840 = vadd.xlane.f32.xlu1 %v839_v53 }
 0x56d   :  { %v841_v59 = vpop.xlane.xlu1 %840 }
 0x56e   :  { %v842_v60 = vmul.f32 0.03125, %v841_v59 }
 0x570   :  { %v843_v61 = vadd.f32 1e-05, %v842_v60 }
 0x572   :  { %1197 = vrsqrt.f32 %v843_v61 }
 0x57c   :  { %v1198_v0 = vpop.eup %1197 }
 0x57d   :  { %v845_v1 = vmul.f32 %v1198_v0, %v837_v51 }
 0x57f   :  { %v850_v3 = vmul.f32 %v849_v21, %v845_v1 }
 0x581   :  { %v855_v4 = vadd.f32 %v854_v2, %v850_v3 }
 0x583   :  { %1125 = vmatmul.mubr.msk.f32.vlgmr.msra.gmra.mrb[8].mxu1 %vm37_vm0, %v855_v4 }
 0x656   :  { %v936_v6 = vpop.f32.mrb[8].mxu1 }
 0x657   :  { %v937_v7 = vadd.f32 %v965_v5, %v936_v6  ;;  %v1126_v38 = vpop.f32.mrb[9].mxu1 }
 0x659   :  { %941 = vst.msk [vmem:[#allocation2] sm:$0x3] %vm940_vm6, %v937_v7 }
 0x65a   :  { %1210 = shalt.err (!%p1207_p4)
}
 0x65b   :  { %s1211_s23 = scalar_lea.hbm %s1543_s8, 32 }
 0x65c   :  { %p1212_p5 = scmp.ne.s32.totalorder %s1543_s8, %s1211_s23  ;;  %p1215_p6 = scmp.lt.u32.totalorder %s1211_s23, %s1543_s8 }
 0x65e   :  { %p1217_p7 = pnand %p1215_p6, %p1212_p5 }
 0x660   :  { %1220 = shalt.err (!%p1217_p7)
}
 0x661   :  { %951 = dma.vmem_to_hbm [thread:$0]  %s949_s19, 32, %s1543_s8, [#allocation3]  }
 0x662   :  { %1221 = dma.done.wait [#allocation3], 32  }
 0x663   :  { %1222 = vsyncadd [#allocation3], 4294967264 }
 0x664   :  { %955 = vsyncpa [#allocation3], 1 }

// kernel: _lambda_.4
= control target key start
LH: loop header
LB: loop body
LE: loop exit
PB: predicated region body
PF: predicated region fallthrough
CT: control target
= control target key end

     0   :  { %vm60_vm0 = vcmask 64512   ;;  %s4073_s0 = inlined_call_operand.vmem [shape: f32[2,32,8], index: 0, kind: input, shape index: {}]   ;;  %s4074_s1 = inlined_call_operand.vmem [shape: f32[8,16], index: 1, kind: input, shape index: {}]   ;;  %s4075_s2 = inlined_call_operand.vmem [shape: f32[1,16], index: 2, kind: input, shape index: {}]   ;;  %s4076_s3 = inlined_call_operand.vmem [shape: f32[1,16,48], index: 3, kind: input, shape index: {}]   ;;  %s4077_s4 = inlined_call_operand.vmem [shape: f32[1,1,48], index: 4, kind: input, shape index: {}]   ;;  %s4078_s5 = inlined_call_operand.vmem [shape: f32[1,16,16], index: 5, kind: input, shape index: {}]   ;;  %s4079_s6 = inlined_call_operand.vmem [shape: f32[1,16,32], index: 6, kind: input, shape index: {}]   ;;  %s4080_s7 = inlined_call_operand.vmem [shape: f32[1,1,32], index: 7, kind: input, shape index: {}]   ;;  %s4081_s8 = inlined_call_operand.vmem [shape: f32[1,32,16], index: 8, kind: input, shape index: {}]   ;;  %s4082_s9 = inlined_call_operand.vmem [shape: f32[1,6,16], index: 9, kind: input, shape index: {}]   ;;  %s4083_s10 = inlined_call_operand.vmem [shape: f32[16,8], index: 10, kind: input, shape index: {}]   ;;  %s4084_s11 = inlined_call_operand.vmem [shape: f32[3,8], index: 11, kind: input, shape index: {}]   ;;  %s4085_s12 = inlined_call_operand.vmem [shape: f32[2,32,8], index: 12, kind: output, shape index: {0}]   ;;  %s4086_s13 = inlined_call_operand.hbm [shape: f32[2,32,32], index: 13, kind: output, shape index: {1}]  }
   0x1   :  { %v52_v0 = vld [vmem:[%s4074_s1] sm:$0xff]  ;;  %v45_v2 = vld [vmem:[%s4073_s0 + $0x8] sm:$0xff]  ;;  %v46_v3 = vld [vmem:[%s4073_s0 + $0x10] sm:$0xff] }
   0x2   :  { %v44_v1 = vld [vmem:[%s4073_s0] sm:$0xff]  ;;  %2715 = vmatprep.subr.mxu0 %v52_v0 }
   0x3   :  { %2717 = vmatprep.mubr.msk.f32.mxu0 %vm60_vm0, %v44_v1  ;;  %2716 = vmatpush3.msra.mxu0 %v52_v0 }
   0x4   :  { %2718 = vmatmul.mubr.msk.f32.vlgmr.msra.gmra.mrb[0].mxu0 %vm60_vm0, %v45_v2 }
   0x5   :  { %19 = vsyncpa [#allocation3], 0  ;;  %2720 = vmatprep.mubr.msk.f32.mxu0 %vm60_vm0, %v46_v3  ;;  %v47_v4 = vld [vmem:[%s4073_s0 + $0x18] sm:$0xff]  ;;  %v48_v5 = vld [vmem:[%s4073_s0 + $0x20] sm:$0xff]  ;;  %vm209_vm1 = vcmask 130048   ;;  %s3255_s14 = smov 104  }
   0x6   :  { %v49_v6 = vld [vmem:[%s4073_s0 + $0x28] sm:$0xff]  ;;  %v50_v7 = vld [vmem:[%s4073_s0 + $0x30] sm:$0xff]  ;;  %v51_v8 = vld [vmem:[%s4073_s0 + $0x38] sm:$0xff]  ;;  %vm573_vm3 = vcmask 261120   ;;  %s3256_s15 = smov 120   ;;  %s3257_s1 = smov 88  }
   0x7   :  { %v190_v9 = vld [vmem:[%s4076_s3] sm:$0xff]  ;;  %v191_v10 = vld [vmem:[%s4076_s3 + $0x8] sm:$0xff]  ;;  %s3253_s3 = smov 112   ;;  %vm3460_vm2 = vmpackc.low %vm60_vm0, %vm60_vm0  ;;  %s3258_s20 = smov 8  }
   0x8   :  { %2721 = vmatmul.mubr.msk.f32.gmra.mrb[2].mxu0 %vm60_vm0, %v47_v4  ;;  %v2925_v11 = vpack.c.bf16 %v191_v10, %v190_v9  ;;  %v2491_v12 = vld [vmem:[%s4075_s2] ss:$0 sm:$0xff] }
   0x9   :  { %2723 = vmatprep.mubr.msk.f32.mxu0 %vm60_vm0, %v48_v5  ;;  %v2500_v29 = vld [vmem:[%s4077_s4] ss:$0 sm:$0xff]  ;;  %s3254_s4 = smov 96  }
   0xa   :  { %2926 = vmatprep.subr.bf16.mxu1 %v2925_v11 }
   0xb   :  { %2928 = vmatpush3.bf16.msra.mxu1 %v2925_v11 }
   0xc   :  { %2724 = vmatmul.mubr.msk.f32.gmra.mrb[4].mxu0 %vm60_vm0, %v49_v6 }
   0xd   :  { %2726 = vmatprep.mubr.msk.f32.mxu0 %vm60_vm0, %v50_v7 }
  0x10   :  { %2727 = vmatmul.mubr.msk.f32.gmra.mrb[6].mxu0 %vm60_vm0, %v51_v8 }
  0xd7   :  { %v2719_v13 = vpop.f32.mrb[0].mxu0 }
  0xd8   :  { %v151_v14 = vpop.f32.mrb[1].mxu0  ;;  %v3377_v16 = vadd.f32 %v2719_v13, %v2491_v12 }
  0xd9   :  { %v3375_v15 = vadd.f32 %v2491_v12, %v151_v14 }
  0xdb   :  { %v2722_v17 = vpop.f32.mrb[2].mxu0  ;;  %2733 = vmatprep.mubr.msk.f32.mxu1 %vm209_vm1, %v3375_v15 }
  0xdc   :  { %v3381_v18 = vadd.f32 %v2722_v17, %v2491_v12  ;;  %v161_v19 = vpop.f32.mrb[3].mxu0  ;;  %2734 = vmatmul.mubr.msk.f32.vlgmr.msra.gmra.mrb[0].mxu1 %vm209_vm1, %v3377_v16 }
  0xdd   :  { %v3385_v20 = vadd.f32 %v2491_v12, %v161_v19 }
  0xdf   :  { %v2725_v21 = vpop.f32.mrb[4].mxu0  ;;  %2736 = vmatprep.mubr.msk.f32.mxu1 %vm209_vm1, %v3385_v20 }
  0xe0   :  { %v3389_v22 = vadd.f32 %v2725_v21, %v2491_v12  ;;  %v171_v23 = vpop.f32.mrb[5].mxu0  ;;  %2737 = vmatmul.mubr.msk.f32.gmra.mrb[2].mxu1 %vm209_vm1, %v3381_v18 }
  0xe1   :  { %v3393_v24 = vadd.f32 %v2491_v12, %v171_v23 }
  0xe3   :  { %v2728_v25 = vpop.f32.mrb[6].mxu0  ;;  %2739 = vmatprep.mubr.msk.f32.mxu1 %vm209_vm1, %v3393_v24 }
  0xe4   :  { %v3397_v26 = vadd.f32 %v2728_v25, %v2491_v12  ;;  %v181_v27 = vpop.f32.mrb[7].mxu0  ;;  %2740 = vmatmul.mubr.msk.f32.gmra.mrb[4].mxu1 %vm209_vm1, %v3389_v22 }
  0xe5   :  { %v3401_v28 = vadd.f32 %v2491_v12, %v181_v27 }
  0xe7   :  { %2742 = vmatprep.mubr.msk.f32.mxu1 %vm209_vm1, %v3401_v28 }
  0xe8   :  { %2743 = vmatmul.mubr.msk.f32.gmra.mrb[6].mxu1 %vm209_vm1, %v3397_v26 }
 0x1af   :  { %v2735_v30 = vpop.f32.mrb[0].mxu1 }
 0x1b0   :  { %v3410_v31 = vadd.f32 %v2735_v30, %v2500_v29  ;;  %v300_v32 = vpop.f32.mrb[1].mxu1 }
 0x1b1   :  { %v3412_v33 = vadd.f32 %v2500_v29, %v300_v32 }
 0x1b3   :  { %v2738_v34 = vpop.f32.mrb[2].mxu1  ;;  %2753 = vmatprep.mubr.msk.f32.mxu0 %vm60_vm0, %v3412_v33  ;;  %v3418_v35 = vpack.i.bf16 %v3410_v31, %v3412_v33 }
 0x1b4   :  { %v3420_v36 = vadd.f32 %v2738_v34, %v2500_v29  ;;  %v310_v37 = vpop.f32.mrb[3].mxu1 }
 0x1b5   :  { %v3422_v38 = vadd.f32 %v2500_v29, %v310_v37  ;;  %3038 = vrot.lane.b32.xlu0 %v3418_v35, %s3253_s3 }
 0x1b7   :  { %v2741_v39 = vpop.f32.mrb[4].mxu1  ;;  %v3427_v40 = vpack.i.bf16 %v3420_v36, %v3422_v38 }
 0x1b8   :  { %v3429_v41 = vadd.f32 %v2741_v39, %v2500_v29  ;;  %v320_v42 = vpop.f32.mrb[5].mxu1 }
 0x1b9   :  { %v3431_v43 = vadd.f32 %v2500_v29, %v320_v42  ;;  %3043 = vrot.lane.b32.xlu0 %v3427_v40, %s3253_s3 }
 0x1bb   :  { %v2744_v44 = vpop.f32.mrb[6].mxu1  ;;  %v3436_v45 = vpack.i.bf16 %v3429_v41, %v3431_v43  ;;  %2767 = vmatprep.mubr.msk.f32.mxu1 %vm60_vm0, %v3431_v43 }
 0x1bc   :  { %v3440_v46 = vadd.f32 %v2744_v44, %v2500_v29  ;;  %v330_v47 = vpop.f32.mrb[7].mxu1 }
 0x1bd   :  { %v3442_v48 = vadd.f32 %v2500_v29, %v330_v47  ;;  %3048 = vrot.lane.b32.xlu1 %v3436_v45, %s3253_s3  ;;  %3063 = vrot.lane.b32.xlu0 %v3427_v40, %s3254_s4 }
 0x1bf   :  { %v3448_v49 = vpack.i.bf16 %v3440_v46, %v3442_v48 }
 0x1c1   :  { %3053 = vrot.lane.b32.xlu1 %v3448_v49, %s3253_s3  ;;  %3083 = vrot.lane.b32.xlu0 %v3436_v45, %s3255_s14 }
 0x1c5   :  { %3058 = vrot.lane.b32.xlu1 %v3418_v35, %s3254_s4  ;;  %3088 = vrot.lane.b32.xlu0 %v3448_v49, %s3254_s4 }
 0x1c9   :  { %3068 = vrot.lane.b32.xlu1 %v3436_v45, %s3254_s4 }
 0x1cd   :  { %3073 = vrot.lane.b32.xlu1 %v3418_v35, %s3255_s14 }
 0x1d1   :  { %3078 = vrot.lane.b32.xlu1 %v3427_v40, %s3255_s14 }
 0x1d5   :  { %3093 = vrot.lane.b32.xlu1 %v3448_v49, %s3255_s14 }
 0x227   :  { %v3039_v50 = vpop.permute.xlu0 %3038 }
 0x228   :  { %v3041_v51 = vunpack.i.h.bf16 %v3039_v50  ;;  %v3040_v52 = vunpack.i.l.bf16 %v3039_v50 }
 0x22a   :  { %v2929_v54 = vpack.c.bf16 %v3041_v51, %v3040_v52 }
 0x22b   :  { %v3044_v55 = vpop.permute.xlu0 %3043 }
 0x22c   :  { %v3046_v56 = vunpack.i.h.bf16 %v3044_v55  ;;  %v3045_v57 = vunpack.i.l.bf16 %v3044_v55  ;;  %2931 = vmatprep.subr.msk.bf16.mxu0 %vm3460_vm2, %v2929_v54 }
 0x22d   :  { %2934 = vmatpush3.bf16.xpose.msk.msra.mxu0 %vm3460_vm2, %v2929_v54 }
 0x22e   :  { %v2935_v58 = vpack.c.bf16 %v3046_v56, %v3045_v57 }
 0x22f   :  { %v3049_v59 = vpop.permute.xlu1 %3048  ;;  %v3064_v62 = vpop.permute.xlu0 %3063 }
 0x230   :  { %v3051_v60 = vunpack.i.h.bf16 %v3049_v59  ;;  %v3050_v61 = vunpack.i.l.bf16 %v3049_v59  ;;  %2937 = vmatprep.subr.msk.bf16.mxu0 %vm3460_vm2, %v2935_v58  ;;  %v3066_v8 = vunpack.i.h.bf16 %v3064_v62  ;;  %v3065_v9 = vunpack.i.l.bf16 %v3064_v62 }
 0x232   :  { %v2941_v63 = vpack.c.bf16 %v3051_v60, %v3050_v61  ;;  %v2957_v17 = vpack.c.bf16 %v3066_v8, %v3065_v9 }
 0x233   :  { %v3054_v0 = vpop.permute.xlu1 %3053  ;;  %v3084_v3 = vpop.permute.xlu0 %3083 }
 0x234   :  { %v3056_v1 = vunpack.i.h.bf16 %v3054_v0  ;;  %v3055_v2 = vunpack.i.l.bf16 %v3054_v0  ;;  %2943 = vmatprep.subr.msk.bf16.mxu1 %vm3460_vm2, %v2941_v63  ;;  %v3086_v32 = vunpack.i.h.bf16 %v3084_v3  ;;  %v3085_v34 = vunpack.i.l.bf16 %v3084_v3 }
 0x235   :  { %2940 = vmatpush3.bf16.xpose.msk.msra.mxu0 %vm3460_vm2, %v2935_v58  ;;  %2946 = vmatpush3.bf16.xpose.msk.msra.mxu1 %vm3460_vm2, %v2941_v63 }
 0x236   :  { %v2947_v4 = vpack.c.bf16 %v3056_v1, %v3055_v2  ;;  %v3495_v39 = vpack.c.bf16 %v3086_v32, %v3085_v34 }
 0x237   :  { %v3059_v5 = vpop.permute.xlu1 %3058  ;;  %v3089_v12 = vpop.permute.xlu0 %3088 }
 0x238   :  { %v3061_v6 = vunpack.i.h.bf16 %v3059_v5  ;;  %v3060_v7 = vunpack.i.l.bf16 %v3059_v5  ;;  %2949 = vmatprep.subr.msk.bf16.mxu1 %vm3460_vm2, %v2947_v4  ;;  %v3091_v19 = vunpack.i.h.bf16 %v3089_v12  ;;  %v3090_v21 = vunpack.i.l.bf16 %v3089_v12 }
 0x23a   :  { %v2953_v10 = vpack.c.bf16 %v3061_v6, %v3060_v7  ;;  %v2965_v37 = vpack.c.bf16 %v3091_v19, %v3090_v21 }
 0x23b   :  { %v3069_v11 = vpop.permute.xlu1 %3068 }
 0x23c   :  { %v3071_v13 = vunpack.i.h.bf16 %v3069_v11  ;;  %v3070_v14 = vunpack.i.l.bf16 %v3069_v11  ;;  %2754 = vmatmul.mubr.msk.f32.vlgmr.msra.gmra.mrb[8].mxu0 %vm60_vm0, %v3410_v31  ;;  %2954 = vmatprep.subr.bf16.mxu0 %v2953_v10 }
 0x23d   :  { %2756 = vmatprep.mubr.msk.f32.mxu0 %vm60_vm0, %v3422_v38  ;;  %2952 = vmatpush3.bf16.xpose.msk.msra.mxu1 %vm3460_vm2, %v2947_v4 }
 0x23e   :  { %2956 = vmatpush3.bf16.msra.mxu0 %v2953_v10  ;;  %v2961_v23 = vpack.c.bf16 %v3071_v13, %v3070_v14 }
 0x23f   :  { %2958 = vmatprep.subr.bf16.mxu0 %v2957_v17  ;;  %v3074_v25 = vpop.permute.xlu1 %3073 }
 0x240   :  { %v3076_v27 = vunpack.i.h.bf16 %v3074_v25  ;;  %v3075_v29 = vunpack.i.l.bf16 %v3074_v25  ;;  %2757 = vmatmul.mubr.msk.f32.gmra.mrb[10].mxu0 %vm60_vm0, %v3420_v36  ;;  %2962 = vmatprep.subr.bf16.mxu1 %v2961_v23 }
 0x242   :  { %v3486_v30 = vpack.c.bf16 %v3076_v27, %v3075_v29  ;;  %2960 = vmatpush3.bf16.msra.mxu0 %v2957_v17 }
 0x243   :  { %v3514_v8 = vpop.permute.xlu1 %3078 }
 0x244   :  { %2768 = vmatmul.mubr.msk.f32.vlgmr.msra.gmra.mrb[8].mxu1 %vm60_vm0, %v3429_v41  ;;  %2971 = vmatprep.subr.msk.bf16.mxu0 %vm3460_vm2, %v3486_v30 }
 0x245   :  { %2770 = vmatprep.mubr.msk.f32.mxu1 %vm60_vm0, %v3442_v48  ;;  %2964 = vmatpush3.bf16.msra.mxu1 %v2961_v23 }
 0x246   :  { %2966 = vmatprep.subr.bf16.mxu1 %v2965_v37 }
 0x247   :  { %v3516_v9 = vpop.permute.xlu1 %3093 }
 0x248   :  { %2771 = vmatmul.mubr.msk.f32.gmra.mrb[10].mxu1 %vm60_vm0, %v3440_v46 }
 0x249   :  { %2968 = vmatpush3.bf16.msra.mxu1 %v2965_v37 }
 0x24a   :  { %2983 = vmatprep.subr.msk.bf16.mxu1 %vm3460_vm2, %v3495_v39 }
 0x30f   :  { %v2755_v42 = vpop.f32.mrb[8].mxu0 }
 0x310   :  { %v566_v44 = vmul.f32 0.35355338, %v2755_v42  ;;  %v433_v47 = vpop.f32.mrb[9].mxu0 }
 0x311   :  { %v565_v50 = vmul.f32 0.35355338, %v433_v47 }
 0x312   :  { %v577_v51 = vsel %vm573_vm3, %v566_v44, -inf }
 0x313   :  { %578 = vmax.xlane.f32.xlu1 %v577_v51  ;;  %v2758_v52 = vpop.f32.mrb[10].mxu0  ;;  %v574_v54 = vsel %vm573_vm3, %v565_v50, -inf }
 0x314   :  { %v568_v55 = vmul.f32 0.35355338, %v2758_v52  ;;  %575 = vmax.xlane.f32.xlu0 %v574_v54  ;;  %v443_v56 = vpop.f32.mrb[11].mxu0 }
 0x315   :  { %v567_v57 = vmul.f32 0.35355338, %v443_v56 }
 0x316   :  { %v583_v58 = vsel %vm573_vm3, %v568_v55, -inf }
 0x317   :  { %v2769_v59 = vpop.f32.mrb[8].mxu1  ;;  %v580_v60 = vsel %vm573_vm3, %v567_v57, -inf }
 0x318   :  { %v570_v61 = vmul.f32 0.35355338, %v2769_v59  ;;  %v546_v62 = vpop.f32.mrb[9].mxu1  ;;  %584 = vmax.xlane.f32.xlu0 %v583_v58  ;;  %581 = vmax.xlane.f32.xlu1 %v580_v60 }
 0x319   :  { %v569_v0 = vmul.f32 0.35355338, %v546_v62 }
 0x31a   :  { %v589_v63 = vsel %vm573_vm3, %v570_v61, -inf }
 0x31b   :  { %v2772_v1 = vpop.f32.mrb[10].mxu1  ;;  %v586_v4 = vsel %vm573_vm3, %v569_v0, -inf }
 0x31c   :  { %v556_v2 = vpop.f32.mrb[11].mxu1  ;;  %590 = vmax.xlane.f32.xlu0 %v589_v63  ;;  %v572_v3 = vmul.f32 0.35355338, %v2772_v1 }
 0x31d   :  { %v571_v6 = vmul.f32 0.35355338, %v556_v2 }
 0x31e   :  { %v595_v5 = vsel %vm573_vm3, %v572_v3, -inf }
 0x31f   :  { %v592_v7 = vsel %vm573_vm3, %v571_v6, -inf }
 0x320   :  { %587 = vmax.xlane.f32.xlu0 %v586_v4 }
 0x324   :  { %596 = vmax.xlane.f32.xlu0 %v595_v5 }
 0x329   :  { %882 = vrot.lane.b32.xlu1 %v3410_v31, %s3256_s15 }
 0x33a   :  { %880 = vrot.lane.b32.xlu0 %v3412_v33, %s3256_s15 }
 0x34d   :  { %593 = vmax.xlane.f32.xlu1 %v592_v7 }
 0x3a0   :  { %v579_v10 = vpop.xlane.xlu1 %578 }
 0x3a1   :  { %v599_v11 = vsub.f32 %v566_v44, %v579_v10  ;;  %v576_v12 = vpop.xlane.xlu0 %575 }
 0x3a2   :  { %v598_v13 = vsub.f32 %v565_v50, %v576_v12  ;;  %v3081_v12 = vunpack.i.h.bf16 %v3514_v8 }
 0x3a3   :  { %v608_v14 = vmul.f32 1.442695, %v599_v11 }
 0x3a4   :  { %v606_v17 = vmul.f32 1.442695, %v598_v13  ;;  %v3080_v13 = vunpack.i.l.bf16 %v3514_v8 }
 0x3a5   :  { %3117 = vpow2.f32 %v608_v14  ;;  %v585_v19 = vpop.xlane.xlu0 %584  ;;  %v582_v31 = vpop.xlane.xlu1 %581 }
 0x3a6   :  { %3119 = vpow2.f32 %v606_v17  ;;  %v601_v21 = vsub.f32 %v568_v55, %v585_v19  ;;  %v600_v33 = vsub.f32 %v567_v57, %v582_v31  ;;  %v2975_v19 = vpack.c.bf16 %v3081_v12, %v3080_v13 }
 0x3a8   :  { %v612_v23 = vmul.f32 1.442695, %v601_v21  ;;  %v610_v25 = vmul.f32 1.442695, %v600_v33 }
 0x3a9   :  { %v591_v27 = vpop.xlane.xlu0 %590 }
 0x3aa   :  { %3121 = vpow2.f32 %v612_v23  ;;  %v603_v29 = vsub.f32 %v570_v61, %v591_v27 }
 0x3ab   :  { %3123 = vpow2.f32 %v610_v25 }
 0x3ac   :  { %v616_v32 = vmul.f32 1.442695, %v603_v29 }
 0x3ad   :  { %v588_v56 = vpop.xlane.xlu0 %587 }
 0x3ae   :  { %3125 = vpow2.f32 %v616_v32  ;;  %v602_v57 = vsub.f32 %v569_v0, %v588_v56  ;;  %v3096_v32 = vunpack.i.h.bf16 %v3516_v9 }
 0x3af   :  { %v3118_v34 = vpop.eup %3117 }
 0x3b0   :  { %v3120_v37 = vpop.eup %3119  ;;  %v625_v42 = vsel %vm573_vm3, %v3118_v34, 0.0  ;;  %v614_v60 = vmul.f32 1.442695, %v602_v57 }
 0x3b1   :  { %626 = vadd.xlane.f32.xlu0 %v625_v42  ;;  %v622_v44 = vsel %vm573_vm3, %v3120_v37, 0.0  ;;  %v597_v58 = vpop.xlane.xlu0 %596 }
 0x3b2   :  { %623 = vadd.xlane.f32.xlu1 %v622_v44  ;;  %v605_v59 = vsub.f32 %v572_v3, %v597_v58  ;;  %3127 = vpow2.f32 %v614_v60 }
 0x3b4   :  { %v3122_v47 = vpop.eup %3121  ;;  %v620_v61 = vmul.f32 1.442695, %v605_v59 }
 0x3b5   :  { %v3124_v50 = vpop.eup %3123  ;;  %v631_v51 = vsel %vm573_vm3, %v3122_v47, 0.0  ;;  %v881_v7 = vpop.permute.xlu0 %880 }
 0x3b6   :  { %632 = vadd.xlane.f32.xlu0 %v631_v51  ;;  %v628_v52 = vsel %vm573_vm3, %v3124_v50, 0.0  ;;  %3129 = vpow2.f32 %v620_v61 }
 0x3b7   :  { %629 = vadd.xlane.f32.xlu1 %v628_v52 }
 0x3b8   :  { %v3522_v54 = vpop.eup %3125 }
 0x3b9   :  { %v637_v55 = vsel %vm573_vm3, %v3522_v54, 0.0 }
 0x3ba   :  { %638 = vadd.xlane.f32.xlu0 %v637_v55 }
 0x3bc   :  { %v3128_v62 = vpop.eup %3127 }
 0x3bd   :  { %v634_v1 = vsel %vm573_vm3, %v3128_v62, 0.0 }
 0x3c0   :  { %v3530_v63 = vpop.eup %3129 }
 0x3c8   :  { %886 = vrot.lane.b32.xlu1 %v3420_v36, %s3256_s15  ;;  %v643_v36 = vsel %vm573_vm3, %v3530_v63, 0.0 }
 0x3d0   :  { %884 = vrot.lane.b32.xlu0 %v3422_v38, %s3256_s15  ;;  %v883_v38 = vpop.permute.xlu1 %882 }
 0x3da   :  { %v594_v0 = vpop.xlane.xlu1 %593 }
 0x3db   :  { %v604_v2 = vsub.f32 %v571_v6, %v594_v0 }
 0x3dd   :  { %v618_v3 = vmul.f32 1.442695, %v604_v2 }
 0x3df   :  { %3131 = vpow2.f32 %v618_v3 }
 0x3e9   :  { %v3132_v4 = vpop.eup %3131 }
 0x3ea   :  { %v640_v5 = vsel %vm573_vm3, %v3132_v4, 0.0 }
 0x3ec   :  { %635 = vadd.xlane.f32.xlu1 %v634_v1 }
 0x3ef   :  { %644 = vadd.xlane.f32.xlu0 %v643_v36 }
 0x3fd   :  { %999 = vrot.lane.b32.xlu1 %v3429_v41, %s3256_s15 }
 0x405   :  { %997 = vrot.lane.b32.xlu0 %v3431_v43, %s3256_s15 }
 0x409   :  { %1001 = vrot.lane.b32.xlu0 %v3442_v48, %s3256_s15 }
 0x421   :  { %641 = vadd.xlane.f32.xlu1 %v640_v5 }
 0x432   :  { %1003 = vrot.lane.b32.xlu1 %v3440_v46, %s3256_s15 }
 0x43e   :  { %v627_v41 = vpop.xlane.xlu0 %626 }
 0x43f   :  { %3133 = vrcp.f32 %v627_v41  ;;  %v624_v10 = vpop.xlane.xlu1 %623 }
 0x440   :  { %3135 = vrcp.f32 %v624_v10 }
 0x443   :  { %v633_v43 = vpop.xlane.xlu0 %632 }
 0x444   :  { %3137 = vrcp.f32 %v633_v43  ;;  %v630_v11 = vpop.xlane.xlu1 %629 }
 0x445   :  { %3139 = vrcp.f32 %v630_v11 }
 0x447   :  { %v639_v33 = vpop.xlane.xlu0 %638 }
 0x448   :  { %v887_v23 = vpop.permute.xlu1 %886  ;;  %3141 = vrcp.f32 %v639_v33 }
 0x449   :  { %v3134_v48 = vpop.eup %3133 }
 0x44a   :  { %v3136_v6 = vpop.eup %3135  ;;  %v3548_v17 = vmul.f32 %v3134_v48, %v3118_v34  ;;  %v3095_v34 = vunpack.i.l.bf16 %v3516_v9 }
 0x44b   :  { %v3546_v14 = vmul.f32 %v3136_v6, %v3120_v37 }
 0x44c   :  { %v2987_v44 = vpack.c.bf16 %v3096_v32, %v3095_v34 }
 0x44d   :  { %2781 = vmatprep.mubr.msk.f32.mxu0 %vm573_vm3, %v3546_v14 }
 0x44e   :  { %v3138_v46 = vpop.eup %3137  ;;  %2782 = vmatmul.mubr.msk.f32.vlgmr.msra.gmra.mrb[12].mxu0 %vm573_vm3, %v3548_v17 }
 0x44f   :  { %v3140_v31 = vpop.eup %3139  ;;  %2974 = vmatpush3.bf16.xpose.msk.msra.mxu0 %vm3460_vm2, %v3486_v30  ;;  %v3557_v21 = vmul.f32 %v3138_v46, %v3122_v47  ;;  %v885_v30 = vpop.permute.xlu0 %884 }
 0x450   :  { %2977 = vmatprep.subr.msk.bf16.mxu0 %vm3460_vm2, %v2975_v19  ;;  %v3561_v8 = vmul.f32 %v3140_v31, %v3124_v50 }
 0x452   :  { %2784 = vmatprep.mubr.msk.f32.mxu0 %vm573_vm3, %v3561_v8  ;;  %v3142_v27 = vpop.eup %3141 }
 0x453   :  { %2785 = vmatmul.mubr.msk.f32.gmra.mrb[14].mxu0 %vm573_vm3, %v3557_v21  ;;  %v3578_v42 = vmul.f32 %v3142_v27, %v3522_v54 }
 0x454   :  { %2809 = vmatprep.mubr.msk.f32.mxu0 %vm60_vm0, %v881_v7 }
 0x457   :  { %2980 = vmatpush3.bf16.xpose.msk.msra.mxu0 %vm3460_vm2, %v2975_v19 }
 0x45e   :  { %2810 = vmatmul.mubr.msk.f32.vlgmr.msra.gmra.mrb[16].mxu0 %vm60_vm0, %v883_v38 }
 0x45f   :  { %2812 = vmatprep.mubr.msk.f32.mxu0 %vm60_vm0, %v885_v30 }
 0x462   :  { %2813 = vmatmul.mubr.msk.f32.gmra.mrb[18].mxu0 %vm60_vm0, %v887_v23 }
 0x479   :  { %v636_v25 = vpop.xlane.xlu1 %635 }
 0x47a   :  { %3143 = vrcp.f32 %v636_v25 }
 0x47c   :  { %v645_v47 = vpop.xlane.xlu0 %644 }
 0x47d   :  { %v1000_v9 = vpop.permute.xlu1 %999  ;;  %3145 = vrcp.f32 %v645_v47 }
 0x480   :  { %v998_v55 = vpop.permute.xlu0 %997 }
 0x484   :  { %v3144_v29 = vpop.eup %3143  ;;  %v1002_v53 = vpop.permute.xlu0 %1001 }
 0x485   :  { %v3575_v37 = vmul.f32 %v3144_v29, %v3128_v62 }
 0x487   :  { %2795 = vmatprep.mubr.msk.f32.mxu1 %vm573_vm3, %v3575_v37  ;;  %v3146_v51 = vpop.eup %3145 }
 0x488   :  { %2796 = vmatmul.mubr.msk.f32.vlgmr.msra.gmra.mrb[12].mxu1 %vm573_vm3, %v3578_v42  ;;  %v3594_v56 = vmul.f32 %v3146_v51, %v3530_v63 }
 0x489   :  { %2986 = vmatpush3.bf16.xpose.msk.msra.mxu1 %vm3460_vm2, %v3495_v39 }
 0x48a   :  { %2989 = vmatprep.subr.msk.bf16.mxu1 %vm3460_vm2, %v2987_v44 }
 0x491   :  { %2992 = vmatpush3.bf16.xpose.msk.msra.mxu1 %vm3460_vm2, %v2987_v44 }
 0x4ae   :  { %v642_v50 = vpop.xlane.xlu1 %641 }
 0x4af   :  { %3147 = vrcp.f32 %v642_v50 }
 0x4b2   :  { %v1004_v39 = vpop.permute.xlu1 %1003 }
 0x4b9   :  { %v3148_v52 = vpop.eup %3147 }
 0x4ba   :  { %v3591_v54 = vmul.f32 %v3148_v52, %v3132_v4 }
 0x4bc   :  { %2798 = vmatprep.mubr.msk.f32.mxu1 %vm573_vm3, %v3591_v54 }
 0x4bd   :  { %2799 = vmatmul.mubr.msk.f32.gmra.mrb[14].mxu1 %vm573_vm3, %v3594_v56 }
 0x4be   :  { %2823 = vmatprep.mubr.msk.f32.mxu1 %vm60_vm0, %v998_v55 }
 0x4c1   :  { %2824 = vmatmul.mubr.msk.f32.vlgmr.msra.gmra.mrb[16].mxu1 %vm60_vm0, %v1000_v9 }
 0x4c2   :  { %2826 = vmatprep.mubr.msk.f32.mxu1 %vm60_vm0, %v1002_v53 }
 0x4c5   :  { %2827 = vmatmul.mubr.msk.f32.gmra.mrb[18].mxu1 %vm60_vm0, %v1004_v39 }
 0x521   :  { %v3604_v57 = vpop.f32.mrb[12].mxu0 }
 0x522   :  { %v3606_v58 = vpop.f32.mrb[13].mxu0 }
 0x526   :  { %v3608_v59 = vpop.f32.mrb[14].mxu0 }
 0x527   :  { %v3610_v60 = vpop.f32.mrb[15].mxu0 }
 0x531   :  { %v2811_v61 = vpop.f32.mrb[16].mxu0 }
 0x532   :  { %v1115_v62 = vmul.f32 0.35355338, %v2811_v61  ;;  %v978_v63 = vpop.f32.mrb[17].mxu0 }
 0x533   :  { %v1114_v1 = vmul.f32 0.35355338, %v978_v63 }
 0x534   :  { %v1125_v36 = vsel %vm573_vm3, %v1115_v62, -inf }
 0x535   :  { %1126 = vmax.xlane.f32.xlu1 %v1125_v36  ;;  %v2814_v38 = vpop.f32.mrb[18].mxu0  ;;  %v1122_v0 = vsel %vm573_vm3, %v1114_v1, -inf }
 0x536   :  { %1123 = vmax.xlane.f32.xlu0 %v1122_v0  ;;  %v988_v2 = vpop.f32.mrb[19].mxu0  ;;  %v1117_v4 = vmul.f32 0.35355338, %v2814_v38 }
 0x537   :  { %v1116_v3 = vmul.f32 0.35355338, %v988_v2 }
 0x538   :  { %v1131_v7 = vsel %vm573_vm3, %v1117_v4, -inf }
 0x539   :  { %v1128_v5 = vsel %vm573_vm3, %v1116_v3, -inf }
 0x53a   :  { %1129 = vmax.xlane.f32.xlu0 %v1128_v5 }
 0x53e   :  { %1132 = vmax.xlane.f32.xlu0 %v1131_v7 }
 0x55b   :  { %v3616_v41 = vpop.f32.mrb[12].mxu1 }
 0x55c   :  { %v3618_v10 = vpop.f32.mrb[13].mxu1 }
 0x590   :  { %v3620_v43 = vpop.f32.mrb[14].mxu1 }
 0x591   :  { %v3622_v11 = vpop.f32.mrb[15].mxu1 }
 0x594   :  { %v2825_v48 = vpop.f32.mrb[16].mxu1 }
 0x595   :  { %v1119_v6 = vmul.f32 0.35355338, %v2825_v48  ;;  %v1095_v12 = vpop.f32.mrb[17].mxu1 }
 0x596   :  { %v1118_v13 = vmul.f32 0.35355338, %v1095_v12 }
 0x597   :  { %v1137_v46 = vsel %vm573_vm3, %v1119_v6, -inf }
 0x598   :  { %1138 = vmax.xlane.f32.xlu0 %v1137_v46  ;;  %v2828_v19 = vpop.f32.mrb[18].mxu1  ;;  %v1134_v31 = vsel %vm573_vm3, %v1118_v13, -inf }
 0x599   :  { %v1121_v33 = vmul.f32 0.35355338, %v2828_v19  ;;  %1135 = vmax.xlane.f32.xlu1 %v1134_v31  ;;  %v1105_v30 = vpop.f32.mrb[19].mxu1 }
 0x59a   :  { %v3626_v23 = vmul.f32 0.35355338, %v1105_v30 }
 0x59b   :  { %v1143_v25 = vsel %vm573_vm3, %v1121_v33, -inf }
 0x59c   :  { %1144 = vmax.xlane.f32.xlu0 %v1143_v25  ;;  %v1140_v27 = vsel %vm573_vm3, %v3626_v23, -inf }
 0x59d   :  { %1141 = vmax.xlane.f32.xlu1 %v1140_v27 }
 0x5ae   :  { %3098 = vrot.lane.b32.xlu1 %v3418_v35, %s3257_s1 }
 0x5c2   :  { %v1127_v29 = vpop.xlane.xlu1 %1126 }
 0x5c3   :  { %v1147_v32 = vsub.f32 %v1115_v62, %v1127_v29  ;;  %v1124_v34 = vpop.xlane.xlu0 %1123 }
 0x5c4   :  { %v1146_v44 = vsub.f32 %v1114_v1, %v1124_v34 }
 0x5c5   :  { %v1156_v9 = vmul.f32 1.442695, %v1147_v32 }
 0x5c6   :  { %v1154_v47 = vmul.f32 1.442695, %v1146_v44 }
 0x5c7   :  { %3149 = vpow2.f32 %v1156_v9  ;;  %v1130_v50 = vpop.xlane.xlu0 %1129 }
 0x5c8   :  { %3151 = vpow2.f32 %v1154_v47  ;;  %v1148_v51 = vsub.f32 %v1116_v3, %v1130_v50 }
 0x5ca   :  { %v1158_v52 = vmul.f32 1.442695, %v1148_v51 }
 0x5cb   :  { %v1133_v55 = vpop.xlane.xlu0 %1132 }
 0x5cc   :  { %3153 = vpow2.f32 %v1158_v52  ;;  %v1149_v53 = vsub.f32 %v1117_v4, %v1133_v55 }
 0x5ce   :  { %v1160_v39 = vmul.f32 1.442695, %v1149_v53 }
 0x5d0   :  { %3155 = vpow2.f32 %v1160_v39 }
 0x5d1   :  { %v3150_v61 = vpop.eup %3149 }
 0x5d2   :  { %v3152_v63 = vpop.eup %3151  ;;  %v1173_v35 = vsel %vm573_vm3, %v3150_v61, 0.0 }
 0x5d3   :  { %1174 = vadd.xlane.f32.xlu0 %v1173_v35  ;;  %v1170_v62 = vsel %vm573_vm3, %v3152_v63, 0.0 }
 0x5d4   :  { %1171 = vadd.xlane.f32.xlu1 %v1170_v62 }
 0x5d6   :  { %v3154_v1 = vpop.eup %3153 }
 0x5d7   :  { %v1176_v36 = vsel %vm573_vm3, %v3154_v1, 0.0 }
 0x5d8   :  { %1177 = vadd.xlane.f32.xlu1 %v1176_v36 }
 0x5da   :  { %v3636_v38 = vpop.eup %3155 }
 0x5db   :  { %v1179_v0 = vsel %vm573_vm3, %v3636_v38, 0.0 }
 0x5dc   :  { %1180 = vadd.xlane.f32.xlu0 %v1179_v0 }
 0x625   :  { %v1139_v2 = vpop.xlane.xlu0 %1138 }
 0x626   :  { %v1151_v3 = vsub.f32 %v1119_v6, %v1139_v2  ;;  %v1136_v4 = vpop.xlane.xlu1 %1135 }
 0x627   :  { %v1150_v5 = vsub.f32 %v1118_v13, %v1136_v4 }
 0x628   :  { %v1164_v7 = vmul.f32 1.442695, %v1151_v3 }
 0x629   :  { %v1162_v48 = vmul.f32 1.442695, %v1150_v5  ;;  %v1145_v12 = vpop.xlane.xlu0 %1144 }
 0x62a   :  { %3157 = vpow2.f32 %v1164_v7  ;;  %v1153_v46 = vsub.f32 %v1121_v33, %v1145_v12  ;;  %v1142_v19 = vpop.xlane.xlu1 %1141 }
 0x62b   :  { %3159 = vpow2.f32 %v1162_v48  ;;  %v1152_v9 = vsub.f32 %v3626_v23, %v1142_v19 }
 0x62c   :  { %v1168_v31 = vmul.f32 1.442695, %v1153_v46 }
 0x62d   :  { %v1166_v47 = vmul.f32 1.442695, %v1152_v9 }
 0x62e   :  { %3161 = vpow2.f32 %v1168_v31  ;;  %v3099_v30 = vpop.permute.xlu1 %3098 }
 0x62f   :  { %v3101_v25 = vunpack.i.h.bf16 %v3099_v30  ;;  %v3100_v27 = vunpack.i.l.bf16 %v3099_v30  ;;  %3163 = vpow2.f32 %v1166_v47 }
 0x631   :  { %v2993_v29 = vpack.c.bf16 %v3101_v25, %v3100_v27 }
 0x633   :  { %2994 = vmatprep.subr.bf16.mxu0 %v2993_v29 }
 0x634   :  { %v3640_v32 = vpop.eup %3157  ;;  %2996 = vmatpush3.bf16.msra.mxu0 %v2993_v29 }
 0x635   :  { %v3642_v6 = vpop.eup %3159  ;;  %v1185_v13 = vsel %vm573_vm3, %v3640_v32, 0.0 }
 0x636   :  { %1186 = vadd.xlane.f32.xlu0 %v1185_v13  ;;  %v1182_v33 = vsel %vm573_vm3, %v3642_v6, 0.0 }
 0x637   :  { %1183 = vadd.xlane.f32.xlu1 %v1182_v33 }
 0x638   :  { %v3648_v34 = vpop.eup %3161 }
 0x639   :  { %v1191_v44 = vsel %vm573_vm3, %v3648_v34, 0.0  ;;  %v3657_v55 = vpop.eup %3163 }
 0x63a   :  { %1192 = vadd.xlane.f32.xlu0 %v1191_v44 }
 0x648   :  { %3108 = vrot.lane.b32.xlu1 %v3436_v45, %s3257_s1  ;;  %v1188_v45 = vsel %vm573_vm3, %v3657_v55, 0.0 }
 0x650   :  { %3103 = vrot.lane.b32.xlu0 %v3427_v40, %s3257_s1 }
 0x660   :  { %v1175_v50 = vpop.xlane.xlu0 %1174 }
 0x661   :  { %3165 = vrcp.f32 %v1175_v50  ;;  %v1172_v51 = vpop.xlane.xlu1 %1171 }
 0x662   :  { %3167 = vrcp.f32 %v1172_v51 }
 0x665   :  { %v1178_v52 = vpop.xlane.xlu1 %1177 }
 0x666   :  { %3169 = vrcp.f32 %v1178_v52 }
 0x669   :  { %v1181_v53 = vpop.xlane.xlu0 %1180 }
 0x66a   :  { %3171 = vrcp.f32 %v1181_v53 }
 0x66b   :  { %v3166_v39 = vpop.eup %3165 }
 0x66c   :  { %v3168_v35 = vpop.eup %3167  ;;  %v1197_v40 = vmul.f32 %v3166_v39, %v3150_v61  ;;  %1189 = vadd.xlane.f32.xlu1 %v1188_v45 }
 0x66d   :  { %v1195_v23 = vmul.f32 %v3168_v35, %v3152_v63 }
 0x66e   :  { %v1211_v62 = vadd.f32 %v1197_v40, %v3548_v17 }
 0x66f   :  { %v1210_v36 = vadd.f32 %v1195_v23, %v3546_v14  ;;  %2837 = vmatprep.mubr.msk.f32.mxu0 %vm573_vm3, %v1195_v23  ;;  %v194_v23 = vld [vmem:[%s4078_s5 + $0x8] sm:$0xff] }
 0x670   :  { %v3170_v0 = vpop.eup %3169  ;;  %v2159_v2 = vmul.f32 0.5, %v1211_v62 }
 0x671   :  { %v2158_v3 = vmul.f32 0.5, %v1210_v36  ;;  %v1199_v4 = vmul.f32 %v3170_v0, %v3154_v1 }
 0x672   :  { %2167 = vst.msk [vmem:[#allocation2 + $0x8] sm:$0xff] %vm573_vm3, %v2159_v2 }
 0x673   :  { %2166 = vst.msk [vmem:[#allocation2] sm:$0xff] %vm573_vm3, %v2158_v3  ;;  %v1212_v5 = vadd.f32 %v1199_v4, %v3561_v8 }
 0x674   :  { %v3172_v7 = vpop.eup %3171 }
 0x675   :  { %v2160_v61 = vmul.f32 0.5, %v1212_v5  ;;  %v1201_v63 = vmul.f32 %v3172_v7, %v3636_v38 }
 0x677   :  { %2168 = vst.msk [vmem:[#allocation2 + $0x10] sm:$0xff] %vm573_vm3, %v2160_v61  ;;  %v1213_v14 = vadd.f32 %v1201_v63, %v3557_v21 }
 0x679   :  { %v2161_v17 = vmul.f32 0.5, %v1213_v14 }
 0x67b   :  { %2169 = vst.msk [vmem:[#allocation2 + $0x18] sm:$0xff] %vm573_vm3, %v2161_v17 }
 0x67d   :  { %3113 = vrot.lane.b32.xlu1 %v3448_v49, %s3257_s1 }
 0x6c3   :  { %v1187_v1 = vpop.xlane.xlu0 %1186 }
 0x6c4   :  { %3173 = vrcp.f32 %v1187_v1  ;;  %v1184_v48 = vpop.xlane.xlu1 %1183 }
 0x6c5   :  { %3175 = vrcp.f32 %v1184_v48 }
 0x6c7   :  { %v1193_v12 = vpop.xlane.xlu0 %1192 }
 0x6c8   :  { %3177 = vrcp.f32 %v1193_v12  ;;  %v3109_v8 = vpop.permute.xlu1 %3108 }
 0x6c9   :  { %v3111_v46 = vunpack.i.h.bf16 %v3109_v8  ;;  %v3110_v19 = vunpack.i.l.bf16 %v3109_v8 }
 0x6cb   :  { %v3001_v38 = vpack.c.bf16 %v3111_v46, %v3110_v19  ;;  %v3104_v31 = vpop.permute.xlu0 %3103 }
 0x6cc   :  { %v3106_v30 = vunpack.i.h.bf16 %v3104_v31  ;;  %v3105_v25 = vunpack.i.l.bf16 %v3104_v31 }
 0x6cd   :  { %3002 = vmatprep.subr.bf16.mxu1 %v3001_v38 }
 0x6ce   :  { %v3174_v21 = vpop.eup %3173  ;;  %v2997_v27 = vpack.c.bf16 %v3106_v30, %v3105_v25  ;;  %3004 = vmatpush3.bf16.msra.mxu1 %v3001_v38  ;;  %v3736_v30 = vld [vmem:[%s4082_s9] sm:$0x3f] }
 0x6cf   :  { %v3176_v29 = vpop.eup %3175  ;;  %v1205_v49 = vmul.f32 %v3174_v21, %v3640_v32 }
 0x6d0   :  { %2998 = vmatprep.subr.bf16.mxu0 %v2997_v27  ;;  %v1203_v13 = vmul.f32 %v3176_v29, %v3642_v6 }
 0x6d1   :  { %v1215_v33 = vadd.f32 %v1205_v49, %v3578_v42  ;;  %3000 = vmatpush3.bf16.msra.mxu0 %v2997_v27 }
 0x6d2   :  { %v3178_v44 = vpop.eup %3177  ;;  %v1214_v9 = vadd.f32 %v1203_v13, %v3575_v37  ;;  %2851 = vmatprep.mubr.msk.f32.mxu1 %vm573_vm3, %v1203_v13 }
 0x6d3   :  { %v2163_v47 = vmul.f32 0.5, %v1215_v33  ;;  %v1209_v50 = vmul.f32 %v3178_v44, %v3648_v34 }
 0x6d4   :  { %v2162_v51 = vmul.f32 0.5, %v1214_v9  ;;  %2838 = vmatmul.mubr.msk.f32.vlgmr.msra.gmra.mrb[20].mxu0 %vm573_vm3, %v1197_v40  ;;  %v193_v40 = vld [vmem:[%s4078_s5] sm:$0xff] }
 0x6d5   :  { %2171 = vst.msk [vmem:[#allocation2 + $0x28] sm:$0xff] %vm573_vm3, %v2163_v47  ;;  %2840 = vmatprep.mubr.msk.f32.mxu0 %vm573_vm3, %v1199_v4  ;;  %v1217_v32 = vadd.f32 %v1209_v50, %v3594_v56 }
 0x6d6   :  { %2170 = vst.msk [vmem:[#allocation2 + $0x20] sm:$0xff] %vm573_vm3, %v2162_v51 }
 0x6d7   :  { %v2165_v42 = vmul.f32 0.5, %v1217_v32 }
 0x6d8   :  { %2841 = vmatmul.mubr.msk.f32.gmra.mrb[22].mxu0 %vm573_vm3, %v1201_v63 }
 0x6d9   :  { %2173 = vst.msk [vmem:[#allocation2 + $0x38] sm:$0xff] %vm573_vm3, %v2165_v42 }
 0x6f9   :  { %v1190_v37 = vpop.xlane.xlu1 %1189 }
 0x6fa   :  { %3179 = vrcp.f32 %v1190_v37 }
 0x6fd   :  { %v3114_v6 = vpop.permute.xlu1 %3113 }
 0x6fe   :  { %v3116_v34 = vunpack.i.h.bf16 %v3114_v6  ;;  %v3115_v52 = vunpack.i.l.bf16 %v3114_v6 }
 0x700   :  { %v3005_v53 = vpack.c.bf16 %v3116_v34, %v3115_v52 }
 0x702   :  { %3006 = vmatprep.subr.bf16.mxu1 %v3005_v53 }
 0x703   :  { %3008 = vmatpush3.bf16.msra.mxu1 %v3005_v53 }
 0x704   :  { %v3180_v39 = vpop.eup %3179 }
 0x705   :  { %v1207_v45 = vmul.f32 %v3180_v39, %v3657_v55  ;;  %v3009_v55 = vpack.c.bf16 %v194_v23, %v193_v40 }
 0x706   :  { %2852 = vmatmul.mubr.msk.f32.vlgmr.msra.gmra.mrb[20].mxu1 %vm573_vm3, %v1205_v49 }
 0x707   :  { %v1216_v56 = vadd.f32 %v1207_v45, %v3591_v54  ;;  %2854 = vmatprep.mubr.msk.f32.mxu1 %vm573_vm3, %v1207_v45  ;;  %3010 = vmatprep.subr.bf16.mxu0 %v3009_v55 }
 0x708   :  { %3012 = vmatpush3.bf16.msra.mxu0 %v3009_v55 }
 0x709   :  { %v2164_v35 = vmul.f32 0.5, %v1216_v56 }
 0x70a   :  { %2855 = vmatmul.mubr.msk.f32.gmra.mrb[22].mxu1 %vm573_vm3, %v1209_v50 }
 0x70b   :  { %2172 = vst.msk [vmem:[#allocation2 + $0x30] sm:$0xff] %vm573_vm3, %v2164_v35 }
 0x7a7   :  { %v2839_v62 = vpop.f32.mrb[20].mxu0 }
 0x7a8   :  { %1446 = vrot.lane.b32.xlu1 %v2839_v62, %s3258_s20  ;;  %v1308_v54 = vpop.f32.mrb[21].mxu0 }
 0x7a9   :  { %1444 = vrot.lane.b32.xlu0 %v1308_v54, %s3258_s20 }
 0x7ab   :  { %v2842_v36 = vpop.f32.mrb[22].mxu0 }
 0x7ac   :  { %1450 = vrot.lane.b32.xlu1 %v2842_v36, %s3258_s20  ;;  %v1318_v0 = vpop.f32.mrb[23].mxu0 }
 0x7ad   :  { %1448 = vrot.lane.b32.xlu0 %v1318_v0, %s3258_s20 }
 0x7d9   :  { %v2853_v2 = vpop.f32.mrb[20].mxu1 }
 0x7da   :  { %v1417_v3 = vpop.f32.mrb[21].mxu1  ;;  %1454 = vrot.lane.b32.xlu1 %v2853_v2, %s3258_s20 }
 0x7db   :  { %1452 = vrot.lane.b32.xlu0 %v1417_v3, %s3258_s20 }
 0x7dd   :  { %v2856_v4 = vpop.f32.mrb[22].mxu1 }
 0x7de   :  { %v1427_v5 = vpop.f32.mrb[23].mxu1  ;;  %1458 = vrot.lane.b32.xlu1 %v2856_v4, %s3258_s20 }
 0x7df   :  { %1456 = vrot.lane.b32.xlu0 %v1427_v5, %s3258_s20 }
 0x81a   :  { %v1447_v7 = vpop.permute.xlu1 %1446 }
 0x81b   :  { %v1445_v61 = vpop.permute.xlu0 %1444  ;;  %v1469_v14 = vsel %vm60_vm0, %v3604_v57, %v1447_v7 }
 0x81c   :  { %v1468_v63 = vsel %vm60_vm0, %v3606_v58, %v1445_v61 }
 0x81d   :  { %2861 = vmatprep.mubr.msk.f32.mxu0 %vm209_vm1, %v1468_v63 }
 0x81e   :  { %2862 = vmatmul.mubr.msk.f32.vlgmr.msra.gmra.mrb[24].mxu0 %vm209_vm1, %v1469_v14  ;;  %v1451_v17 = vpop.permute.xlu1 %1450 }
 0x81f   :  { %v1449_v1 = vpop.permute.xlu0 %1448  ;;  %v1471_v12 = vsel %vm60_vm0, %v3608_v59, %v1451_v17 }
 0x820   :  { %v1470_v48 = vsel %vm60_vm0, %v3610_v60, %v1449_v1 }
 0x821   :  { %2864 = vmatprep.mubr.msk.f32.mxu0 %vm209_vm1, %v1470_v48 }
 0x822   :  { %2865 = vmatmul.mubr.msk.f32.gmra.mrb[26].mxu0 %vm209_vm1, %v1471_v12 }
 0x84c   :  { %v1455_v58 = vpop.permute.xlu1 %1454 }
 0x84d   :  { %v1453_v8 = vpop.permute.xlu0 %1452  ;;  %v1473_v46 = vsel %vm60_vm0, %v3616_v41, %v1455_v58 }
 0x84e   :  { %v1472_v57 = vsel %vm60_vm0, %v3618_v10, %v1453_v8  ;;  %v1476_v10 = vlaneseq  ;;  %v195_v8 = vld [vmem:[%s4079_s6] sm:$0xff] }
 0x84f   :  { %2867 = vmatprep.mubr.msk.f32.mxu0 %vm209_vm1, %v1472_v57  ;;  %v196_v57 = vld [vmem:[%s4079_s6 + $0x8] sm:$0xff] }
 0x850   :  { %v1459_v19 = vpop.permute.xlu1 %1458  ;;  %2868 = vmatmul.mubr.msk.f32.gmra.mrb[28].mxu0 %vm209_vm1, %v1473_v46  ;;  %v3730_v31 = vshrl.u32 %v1476_v10, 7  ;;  %v3013_v46 = vpack.c.bf16 %v196_v57, %v195_v8 }
 0x851   :  { %v1457_v60 = vpop.permute.xlu0 %1456  ;;  %v1475_v38 = vsel %vm60_vm0, %v3620_v43, %v1459_v19 }
 0x852   :  { %v1474_v59 = vsel %vm60_vm0, %v3622_v11, %v1457_v60  ;;  %v1478_v41 = vsub.s32 0, %v3730_v31  ;;  %3014 = vmatprep.subr.bf16.mxu1 %v3013_v46 }
 0x853   :  { %2870 = vmatprep.mubr.msk.f32.mxu0 %vm209_vm1, %v1474_v59  ;;  %3016 = vmatpush3.bf16.msra.mxu1 %v3013_v46 }
 0x854   :  { %2871 = vmatmul.mubr.msk.f32.gmra.mrb[30].mxu0 %vm209_vm1, %v1475_v38  ;;  %v1479_v11 = vrot.slane %v3736_v30, %v1478_v41 }
 0x8f1   :  { %v2863_v25 = vpop.f32.mrb[24].mxu0 }
 0x8f2   :  { %v1576_v43 = vadd.f32 %v2863_v25, %v1479_v11  ;;  %v1570_v21 = vpop.f32.mrb[25].mxu0 }
 0x8f3   :  { %v1571_v27 = vadd.f32 %v1570_v21, %v1479_v11 }
 0x8f4   :  { %v1610_v29 = vadd.f32 %v1576_v43, %v3377_v16 }
 0x8f5   :  { %v2866_v49 = vpop.f32.mrb[26].mxu0  ;;  %v1609_v13 = vadd.f32 %v1571_v27, %v3375_v15 }
 0x8f6   :  { %v1580_v33 = vpop.f32.mrb[27].mxu0  ;;  %v1620_v44 = vsel %vm209_vm1, %v1610_v29, 0.0  ;;  %v1586_v9 = vadd.f32 %v2866_v49, %v1479_v11 }
 0x8f7   :  { %v1581_v47 = vadd.f32 %v1580_v33, %v1479_v11  ;;  %1621 = vadd.xlane.f32.xlu1 %v1620_v44  ;;  %v1617_v50 = vsel %vm209_vm1, %v1609_v13, 0.0 }
 0x8f8   :  { %1618 = vadd.xlane.f32.xlu0 %v1617_v50  ;;  %v1612_v42 = vadd.f32 %v1586_v9, %v3381_v18 }
 0x8f9   :  { %v1611_v51 = vadd.f32 %v1581_v47, %v3385_v20 }
 0x8fa   :  { %v1626_v16 = vsel %vm209_vm1, %v1612_v42, 0.0 }
 0x8fb   :  { %v1623_v32 = vsel %vm209_vm1, %v1611_v51, 0.0 }
 0x8fc   :  { %1624 = vadd.xlane.f32.xlu0 %v1623_v32 }
 0x900   :  { %1627 = vadd.xlane.f32.xlu0 %v1626_v16  ;;  %v199_v16 = vld [vmem:[%s4081_s8 + $0x8] sm:$0xff] }
 0x923   :  { %v2869_v15 = vpop.f32.mrb[28].mxu0 }
 0x924   :  { %v1596_v37 = vadd.f32 %v2869_v15, %v1479_v11  ;;  %v1590_v6 = vpop.f32.mrb[29].mxu0 }
 0x925   :  { %v1591_v34 = vadd.f32 %v1590_v6, %v1479_v11 }
 0x926   :  { %v1614_v52 = vadd.f32 %v1596_v37, %v3389_v22 }
 0x927   :  { %v2872_v53 = vpop.f32.mrb[30].mxu0  ;;  %v1613_v39 = vadd.f32 %v1591_v34, %v3393_v24 }
 0x928   :  { %v1606_v45 = vadd.f32 %v2872_v53, %v1479_v11  ;;  %v1600_v56 = vpop.f32.mrb[31].mxu0  ;;  %v1632_v20 = vsel %vm209_vm1, %v1614_v52, 0.0 }
 0x929   :  { %v1601_v35 = vadd.f32 %v1600_v56, %v1479_v11  ;;  %1633 = vadd.xlane.f32.xlu0 %v1632_v20  ;;  %v1629_v18 = vsel %vm209_vm1, %v1613_v39, 0.0 }
 0x92a   :  { %1630 = vadd.xlane.f32.xlu1 %v1629_v18  ;;  %v1616_v40 = vadd.f32 %v1606_v45, %v3397_v26  ;;  %v1724_v18 = vsub.s32 1, %v3730_v31 }
 0x92b   :  { %v1615_v23 = vadd.f32 %v1601_v35, %v3401_v28 }
 0x92c   :  { %v1638_v55 = vsel %vm209_vm1, %v1616_v40, 0.0 }
 0x92d   :  { %1639 = vadd.xlane.f32.xlu0 %v1638_v55  ;;  %v1635_v22 = vsel %vm209_vm1, %v1615_v23, 0.0  ;;  %v1736_v55 = vsub.s32 2, %v3730_v31 }
 0x92e   :  { %1636 = vadd.xlane.f32.xlu1 %v1635_v22  ;;  %v1725_v22 = vrot.slane %v3736_v30, %v1724_v18 }
 0x984   :  { %v1622_v24 = vpop.xlane.xlu1 %1621 }
 0x985   :  { %v1643_v62 = vmul.f32 0.0625, %v1622_v24  ;;  %v1619_v54 = vpop.xlane.xlu0 %1618 }
 0x986   :  { %v1642_v36 = vmul.f32 0.0625, %v1619_v54 }
 0x987   :  { %v3757_v0 = vsub.f32 %v1610_v29, %v1643_v62 }
 0x988   :  { %v3759_v2 = vsub.f32 %v1609_v13, %v1642_v36  ;;  %v1737_v36 = vrot.slane %v3736_v30, %v1736_v55 }
 0x989   :  { %v1625_v3 = vpop.xlane.xlu0 %1624  ;;  %v1659_v26 = vmul.f32 %v3757_v0, %v3757_v0 }
 0x98a   :  { %v1644_v4 = vmul.f32 0.0625, %v1625_v3  ;;  %v1658_v28 = vmul.f32 %v3759_v2, %v3759_v2 }
 0x98b   :  { %v1669_v5 = vsel %vm209_vm1, %v1659_v26, 0.0 }
 0x98c   :  { %v3766_v7 = vsub.f32 %v1611_v51, %v1644_v4  ;;  %1670 = vadd.xlane.f32.xlu0 %v1669_v5  ;;  %v1666_v61 = vsel %vm209_vm1, %v1658_v28, 0.0 }
 0x98d   :  { %1667 = vadd.xlane.f32.xlu1 %v1666_v61  ;;  %v1628_v63 = vpop.xlane.xlu0 %1627 }
 0x98e   :  { %v1645_v14 = vmul.f32 0.0625, %v1628_v63  ;;  %v1660_v17 = vmul.f32 %v3766_v7, %v3766_v7 }
 0x990   :  { %v3771_v1 = vsub.f32 %v1612_v42, %v1645_v14  ;;  %v1672_v48 = vsel %vm209_vm1, %v1660_v17, 0.0  ;;  %v198_v42 = vld [vmem:[%s4081_s8] sm:$0xff] }
 0x991   :  { %1673 = vadd.xlane.f32.xlu1 %v1672_v48  ;;  %v3017_v15 = vpack.c.bf16 %v199_v16, %v198_v42 }
 0x992   :  { %v1661_v12 = vmul.f32 %v3771_v1, %v3771_v1 }
 0x993   :  { %3018 = vmatprep.subr.bf16.mxu0 %v3017_v15 }
 0x994   :  { %v1675_v58 = vsel %vm209_vm1, %v1661_v12, 0.0  ;;  %3020 = vmatpush3.bf16.msra.mxu0 %v3017_v15 }
 0x995   :  { %1676 = vadd.xlane.f32.xlu0 %v1675_v58 }
 0x9b6   :  { %v1634_v19 = vpop.xlane.xlu0 %1633 }
 0x9b7   :  { %v1647_v60 = vmul.f32 0.0625, %v1634_v19  ;;  %v1631_v59 = vpop.xlane.xlu1 %1630 }
 0x9b8   :  { %v1646_v38 = vmul.f32 0.0625, %v1631_v59 }
 0x9b9   :  { %v3783_v10 = vsub.f32 %v1614_v52, %v1647_v60 }
 0x9ba   :  { %v3785_v11 = vsub.f32 %v1613_v39, %v1646_v38  ;;  %v1640_v25 = vpop.xlane.xlu0 %1639 }
 0x9bb   :  { %v1649_v43 = vmul.f32 0.0625, %v1640_v25  ;;  %v1637_v21 = vpop.xlane.xlu1 %1636  ;;  %v1663_v27 = vmul.f32 %v3783_v10, %v3783_v10 }
 0x9bc   :  { %v1648_v29 = vmul.f32 0.0625, %v1637_v21  ;;  %v1662_v49 = vmul.f32 %v3785_v11, %v3785_v11 }
 0x9bd   :  { %v3791_v13 = vsub.f32 %v1616_v40, %v1649_v43  ;;  %v1681_v33 = vsel %vm209_vm1, %v1663_v27, 0.0 }
 0x9be   :  { %v3794_v44 = vsub.f32 %v1615_v23, %v1648_v29  ;;  %1682 = vadd.xlane.f32.xlu0 %v1681_v33  ;;  %v1678_v9 = vsel %vm209_vm1, %v1662_v49, 0.0 }
 0x9bf   :  { %1679 = vadd.xlane.f32.xlu1 %v1678_v9  ;;  %v1665_v47 = vmul.f32 %v3791_v13, %v3791_v13 }
 0x9c0   :  { %v1664_v50 = vmul.f32 %v3794_v44, %v3794_v44 }
 0x9c1   :  { %v1687_v51 = vsel %vm209_vm1, %v1665_v47, 0.0 }
 0x9c2   :  { %1688 = vadd.xlane.f32.xlu0 %v1687_v51  ;;  %v1684_v32 = vsel %vm209_vm1, %v1664_v50, 0.0 }
 0x9c3   :  { %1685 = vadd.xlane.f32.xlu1 %v1684_v32 }
 0xa19   :  { %v1671_v37 = vpop.xlane.xlu0 %1670 }
 0xa1a   :  { %v1691_v6 = vmul.f32 0.0625, %v1671_v37  ;;  %v1668_v34 = vpop.xlane.xlu1 %1667 }
 0xa1b   :  { %v1690_v52 = vmul.f32 0.0625, %v1668_v34  ;;  %v2565_v34 = vld [vmem:[%s4080_s7] ss:$0 sm:$0xff] }
 0xa1c   :  { %v1699_v53 = vadd.f32 1e-05, %v1691_v6 }
 0xa1d   :  { %v1698_v39 = vadd.f32 1e-05, %v1690_v52 }
 0xa1e   :  { %3181 = vrsqrt.f32 %v1699_v53  ;;  %v1674_v45 = vpop.xlane.xlu1 %1673 }
 0xa1f   :  { %3183 = vrsqrt.f32 %v1698_v39  ;;  %v1692_v56 = vmul.f32 0.0625, %v1674_v45 }
 0xa21   :  { %v1700_v20 = vadd.f32 1e-05, %v1692_v56 }
 0xa22   :  { %v1677_v35 = vpop.xlane.xlu0 %1676 }
 0xa23   :  { %3185 = vrsqrt.f32 %v1700_v20  ;;  %v1693_v40 = vmul.f32 0.0625, %v1677_v35 }
 0xa25   :  { %v1701_v23 = vadd.f32 1e-05, %v1693_v40 }
 0xa27   :  { %3187 = vrsqrt.f32 %v1701_v23 }
 0xa28   :  { %v3182_v24 = vpop.eup %3181 }
 0xa29   :  { %v3184_v62 = vpop.eup %3183  ;;  %v1715_v54 = vmul.f32 %v3182_v24, %v3757_v0 }
 0xa2a   :  { %v1714_v3 = vmul.f32 %v3184_v62, %v3759_v2 }
 0xa2b   :  { %v1727_v26 = vmul.f32 %v1725_v22, %v1715_v54 }
 0xa2c   :  { %v1726_v4 = vmul.f32 %v1725_v22, %v1714_v3 }
 0xa2d   :  { %v3186_v28 = vpop.eup %3185  ;;  %v3822_v63 = vadd.f32 %v1737_v36, %v1727_v26 }
 0xa2e   :  { %v3819_v5 = vadd.f32 %v1737_v36, %v1726_v4  ;;  %v1716_v61 = vmul.f32 %v3186_v28, %v3766_v7 }
 0xa30   :  { %2877 = vmatprep.mubr.msk.f32.mxu1 %vm209_vm1, %v3819_v5  ;;  %v1728_v14 = vmul.f32 %v1725_v22, %v1716_v61 }
 0xa31   :  { %v3188_v0 = vpop.eup %3187  ;;  %2878 = vmatmul.mubr.msk.f32.vlgmr.msra.gmra.mrb[24].mxu1 %vm209_vm1, %v3822_v63 }
 0xa32   :  { %v3828_v17 = vadd.f32 %v1737_v36, %v1728_v14  ;;  %v1717_v2 = vmul.f32 %v3188_v0, %v3771_v1 }
 0xa34   :  { %2880 = vmatprep.mubr.msk.f32.mxu1 %vm209_vm1, %v3828_v17  ;;  %v1729_v48 = vmul.f32 %v1725_v22, %v1717_v2 }
 0xa36   :  { %v3833_v12 = vadd.f32 %v1737_v36, %v1729_v48 }
 0xa38   :  { %2881 = vmatmul.mubr.msk.f32.gmra.mrb[26].mxu1 %vm209_vm1, %v3833_v12 }
 0xa4b   :  { %v1683_v7 = vpop.xlane.xlu0 %1682 }
 0xa4c   :  { %v1695_v58 = vmul.f32 0.0625, %v1683_v7  ;;  %v1680_v8 = vpop.xlane.xlu1 %1679 }
 0xa4d   :  { %v1694_v57 = vmul.f32 0.0625, %v1680_v8 }
 0xa4e   :  { %v1703_v46 = vadd.f32 1e-05, %v1695_v58  ;;  %v1891_v58 = vsub.s32 3, %v3730_v31 }
 0xa4f   :  { %v1702_v19 = vadd.f32 1e-05, %v1694_v57  ;;  %v1689_v60 = vpop.xlane.xlu0 %1688 }
 0xa50   :  { %3189 = vrsqrt.f32 %v1703_v46  ;;  %v1697_v59 = vmul.f32 0.0625, %v1689_v60  ;;  %v1686_v38 = vpop.xlane.xlu1 %1685  ;;  %v1892_v8 = vrot.slane %v3736_v30, %v1891_v58 }
 0xa51   :  { %3191 = vrsqrt.f32 %v1702_v19  ;;  %v1696_v1 = vmul.f32 0.0625, %v1686_v38 }
 0xa52   :  { %v1705_v25 = vadd.f32 1e-05, %v1697_v59 }
 0xa53   :  { %v1704_v43 = vadd.f32 1e-05, %v1696_v1 }
 0xa54   :  { %3193 = vrsqrt.f32 %v1705_v25 }
 0xa55   :  { %3195 = vrsqrt.f32 %v1704_v43 }
 0xa5a   :  { %v3190_v21 = vpop.eup %3189 }
 0xa5b   :  { %v3192_v27 = vpop.eup %3191  ;;  %v1719_v29 = vmul.f32 %v3190_v21, %v3783_v10 }
 0xa5c   :  { %v1718_v49 = vmul.f32 %v3192_v27, %v3785_v11 }
 0xa5d   :  { %v1731_v33 = vmul.f32 %v1725_v22, %v1719_v29 }
 0xa5e   :  { %v3194_v9 = vpop.eup %3193  ;;  %v1730_v47 = vmul.f32 %v1725_v22, %v1718_v49 }
 0xa5f   :  { %v3196_v50 = vpop.eup %3195  ;;  %v1721_v51 = vmul.f32 %v3194_v9, %v3791_v13  ;;  %v3843_v16 = vadd.f32 %v1737_v36, %v1731_v33  ;;  %v200_v13 = vld [vmem:[%s4081_s8 + $0x10] sm:$0xff] }
 0xa60   :  { %v3840_v32 = vadd.f32 %v1737_v36, %v1730_v47  ;;  %v1720_v42 = vmul.f32 %v3196_v50, %v3794_v44  ;;  %v201_v44 = vld [vmem:[%s4081_s8 + $0x18] sm:$0xff] }
 0xa61   :  { %v1733_v15 = vmul.f32 %v1725_v22, %v1721_v51  ;;  %v3021_v6 = vpack.c.bf16 %v201_v44, %v200_v13 }
 0xa62   :  { %2883 = vmatprep.mubr.msk.f32.mxu1 %vm209_vm1, %v3840_v32  ;;  %v1732_v37 = vmul.f32 %v1725_v22, %v1720_v42 }
 0xa63   :  { %2884 = vmatmul.mubr.msk.f32.gmra.mrb[28].mxu1 %vm209_vm1, %v3843_v16  ;;  %v3851_v11 = vadd.f32 %v1737_v36, %v1733_v15  ;;  %3022 = vmatprep.subr.bf16.mxu0 %v3021_v6 }
 0xa64   :  { %v3849_v10 = vadd.f32 %v1737_v36, %v1732_v37  ;;  %3024 = vmatpush3.bf16.msra.mxu0 %v3021_v6 }
 0xa66   :  { %2886 = vmatprep.mubr.msk.f32.mxu1 %vm209_vm1, %v3849_v10 }
 0xa67   :  { %2887 = vmatmul.mubr.msk.f32.gmra.mrb[30].mxu1 %vm209_vm1, %v3851_v11 }
 0xb04   :  { %v2879_v52 = vpop.f32.mrb[24].mxu1 }
 0xb05   :  { %v1848_v53 = vadd.f32 %v2879_v52, %v2565_v34  ;;  %v1842_v39 = vpop.f32.mrb[25].mxu1 }
 0xb06   :  { %v1843_v45 = vadd.f32 %v2565_v34, %v1842_v39 }
 0xb07   :  { %v1882_v20 = vmax.f32 %v1848_v53, 0.0 }
 0xb08   :  { %v1881_v56 = vmax.f32 %v1843_v45, 0.0 }
 0xb0a   :  { %2897 = vmatprep.mubr.msk.f32.mxu0 %vm573_vm3, %v1881_v56 }
 0xb0b   :  { %v2882_v35 = vpop.f32.mrb[26].mxu1  ;;  %2898 = vmatmul.mubr.msk.f32.vlgmr.msra.gmra.mrb[32].mxu0 %vm573_vm3, %v1882_v20 }
 0xb0c   :  { %v1858_v40 = vadd.f32 %v2882_v35, %v2565_v34  ;;  %v1852_v23 = vpop.f32.mrb[27].mxu1 }
 0xb0d   :  { %v1853_v22 = vadd.f32 %v2565_v34, %v1852_v23 }
 0xb0e   :  { %v1884_v62 = vmax.f32 %v1858_v40, 0.0 }
 0xb0f   :  { %v1883_v24 = vmax.f32 %v1853_v22, 0.0 }
 0xb11   :  { %2900 = vmatprep.mubr.msk.f32.mxu0 %vm573_vm3, %v1883_v24 }
 0xb12   :  { %2901 = vmatmul.mubr.msk.f32.gmra.mrb[34].mxu0 %vm573_vm3, %v1884_v62 }
 0xb36   :  { %v2885_v54 = vpop.f32.mrb[28].mxu1 }
 0xb37   :  { %v1868_v36 = vadd.f32 %v2885_v54, %v2565_v34  ;;  %v1862_v3 = vpop.f32.mrb[29].mxu1 }
 0xb38   :  { %v1863_v26 = vadd.f32 %v2565_v34, %v1862_v3 }
 0xb39   :  { %v1886_v61 = vmax.f32 %v1868_v36, 0.0 }
 0xb3a   :  { %v1885_v4 = vmax.f32 %v1863_v26, 0.0  ;;  %v2888_v28 = vpop.f32.mrb[30].mxu1 }
 0xb3b   :  { %v1878_v14 = vadd.f32 %v2888_v28, %v2565_v34  ;;  %v1872_v0 = vpop.f32.mrb[31].mxu1 }
 0xb3c   :  { %v1873_v2 = vadd.f32 %v2565_v34, %v1872_v0  ;;  %2903 = vmatprep.mubr.msk.f32.mxu0 %vm573_vm3, %v1885_v4  ;;  %v2176_v0 = vld [vmem:[%s4083_s10 + $0x8] sm:$0xff] }
 0xb3d   :  { %2904 = vmatmul.mubr.msk.f32.gmra.mrb[36].mxu0 %vm573_vm3, %v1886_v61  ;;  %v1888_v7 = vmax.f32 %v1878_v14, 0.0  ;;  %v2175_v14 = vld [vmem:[%s4083_s10] sm:$0xff] }
 0xb3e   :  { %v1887_v48 = vmax.f32 %v1873_v2, 0.0  ;;  %v3025_v2 = vpack.c.bf16 %v2176_v0, %v2175_v14 }
 0xb40   :  { %2906 = vmatprep.mubr.msk.f32.mxu0 %vm573_vm3, %v1887_v48  ;;  %3026 = vmatprep.subr.bf16.mxu1 %v3025_v2 }
 0xb41   :  { %2907 = vmatmul.mubr.msk.f32.gmra.mrb[38].mxu0 %vm573_vm3, %v1888_v7  ;;  %3028 = vmatpush3.bf16.msra.mxu1 %v3025_v2 }
 0xbde   :  { %v2899_v57 = vpop.f32.mrb[32].mxu0 }
 0xbdf   :  { %v1989_v46 = vadd.f32 %v2899_v57, %v1892_v8  ;;  %v1983_v19 = vpop.f32.mrb[33].mxu0 }
 0xbe0   :  { %v1984_v60 = vadd.f32 %v1983_v19, %v1892_v8 }
 0xbe1   :  { %v2023_v59 = vadd.f32 %v1989_v46, %v3822_v63 }
 0xbe2   :  { %v2022_v38 = vadd.f32 %v1984_v60, %v3819_v5 }
 0xbe3   :  { %v2033_v1 = vsel %vm209_vm1, %v2023_v59, 0.0 }
 0xbe4   :  { %2034 = vadd.xlane.f32.xlu0 %v2033_v1  ;;  %v2030_v25 = vsel %vm209_vm1, %v2022_v38, 0.0 }
 0xbe5   :  { %2031 = vadd.xlane.f32.xlu1 %v2030_v25  ;;  %v2902_v43 = vpop.f32.mrb[34].mxu0 }
 0xbe6   :  { %v1999_v21 = vadd.f32 %v2902_v43, %v1892_v8  ;;  %v1993_v27 = vpop.f32.mrb[35].mxu0 }
 0xbe7   :  { %v1994_v29 = vadd.f32 %v1993_v27, %v1892_v8 }
 0xbe8   :  { %v2025_v49 = vadd.f32 %v1999_v21, %v3833_v12 }
 0xbe9   :  { %v2024_v33 = vadd.f32 %v1994_v29, %v3828_v17 }
 0xbea   :  { %v2039_v9 = vsel %vm209_vm1, %v2025_v49, 0.0 }
 0xbeb   :  { %2040 = vadd.xlane.f32.xlu0 %v2039_v9  ;;  %v2036_v63 = vsel %vm209_vm1, %v2024_v33, 0.0 }
 0xbec   :  { %2037 = vadd.xlane.f32.xlu1 %v2036_v63 }
 0xc10   :  { %v2905_v5 = vpop.f32.mrb[36].mxu0 }
 0xc11   :  { %v2009_v47 = vadd.f32 %v2905_v5, %v1892_v8  ;;  %v2003_v50 = vpop.f32.mrb[37].mxu0 }
 0xc12   :  { %v2004_v51 = vadd.f32 %v2003_v50, %v1892_v8 }
 0xc13   :  { %v2027_v42 = vadd.f32 %v2009_v47, %v3843_v16 }
 0xc14   :  { %v2908_v15 = vpop.f32.mrb[38].mxu0  ;;  %v2026_v37 = vadd.f32 %v2004_v51, %v3840_v32 }
 0xc15   :  { %v2019_v13 = vadd.f32 %v2908_v15, %v1892_v8  ;;  %v2013_v44 = vpop.f32.mrb[39].mxu0  ;;  %v2045_v12 = vsel %vm209_vm1, %v2027_v42, 0.0 }
 0xc16   :  { %v2014_v17 = vadd.f32 %v2013_v44, %v1892_v8  ;;  %2046 = vadd.xlane.f32.xlu0 %v2045_v12  ;;  %v2042_v6 = vsel %vm209_vm1, %v2026_v37, 0.0 }
 0xc17   :  { %2043 = vadd.xlane.f32.xlu1 %v2042_v6  ;;  %v2029_v34 = vadd.f32 %v2019_v13, %v3851_v11 }
 0xc18   :  { %v2028_v52 = vadd.f32 %v2014_v17, %v3849_v10  ;;  %v2136_v17 = vsub.s32 4, %v3730_v31 }
 0xc19   :  { %v2051_v53 = vsel %vm209_vm1, %v2029_v34, 0.0 }
 0xc1a   :  { %2052 = vadd.xlane.f32.xlu0 %v2051_v53  ;;  %v2048_v16 = vsel %vm209_vm1, %v2028_v52, 0.0  ;;  %v2137_v53 = vrot.slane %v3736_v30, %v2136_v17 }
 0xc1b   :  { %2049 = vadd.xlane.f32.xlu1 %v2048_v16 }
 0xc71   :  { %v2035_v32 = vpop.xlane.xlu0 %2034 }
 0xc72   :  { %v2055_v39 = vmul.f32 0.0625, %v2035_v32  ;;  %v2032_v45 = vpop.xlane.xlu1 %2031 }
 0xc73   :  { %v2054_v56 = vmul.f32 0.0625, %v2032_v45 }
 0xc74   :  { %v3892_v20 = vsub.f32 %v2023_v59, %v2055_v39 }
 0xc75   :  { %v3894_v35 = vsub.f32 %v2022_v38, %v2054_v56 }
 0xc76   :  { %v2071_v40 = vmul.f32 %v3892_v20, %v3892_v20 }
 0xc77   :  { %v2070_v10 = vmul.f32 %v3894_v35, %v3894_v35 }
 0xc78   :  { %v2041_v11 = vpop.xlane.xlu0 %2040  ;;  %v2081_v23 = vsel %vm209_vm1, %v2071_v40, 0.0 }
 0xc79   :  { %v2057_v22 = vmul.f32 0.0625, %v2041_v11  ;;  %v2038_v24 = vpop.xlane.xlu1 %2037  ;;  %2082 = vadd.xlane.f32.xlu0 %v2081_v23  ;;  %v2078_v62 = vsel %vm209_vm1, %v2070_v10, 0.0 }
 0xc7a   :  { %v2056_v54 = vmul.f32 0.0625, %v2038_v24  ;;  %2079 = vadd.xlane.f32.xlu1 %v2078_v62 }
 0xc7b   :  { %v3902_v36 = vsub.f32 %v2025_v49, %v2057_v22 }
 0xc7c   :  { %v3904_v3 = vsub.f32 %v2024_v33, %v2056_v54 }
 0xc7d   :  { %v2073_v26 = vmul.f32 %v3902_v36, %v3902_v36 }
 0xc7e   :  { %v2072_v4 = vmul.f32 %v3904_v3, %v3904_v3 }
 0xc7f   :  { %v2087_v28 = vsel %vm209_vm1, %v2073_v26, 0.0 }
 0xc80   :  { %2088 = vadd.xlane.f32.xlu0 %v2087_v28  ;;  %v2084_v61 = vsel %vm209_vm1, %v2072_v4, 0.0 }
 0xc81   :  { %2085 = vadd.xlane.f32.xlu1 %v2084_v61 }
 0xca3   :  { %v2047_v48 = vpop.xlane.xlu0 %2046 }
 0xca4   :  { %v2059_v7 = vmul.f32 0.0625, %v2047_v48  ;;  %v2044_v58 = vpop.xlane.xlu1 %2043 }
 0xca5   :  { %v2058_v8 = vmul.f32 0.0625, %v2044_v58 }
 0xca6   :  { %v3918_v57 = vsub.f32 %v2027_v42, %v2059_v7 }
 0xca7   :  { %v3920_v46 = vsub.f32 %v2026_v37, %v2058_v8  ;;  %v2053_v19 = vpop.xlane.xlu0 %2052 }
 0xca8   :  { %v2061_v60 = vmul.f32 0.0625, %v2053_v19  ;;  %v2050_v59 = vpop.xlane.xlu1 %2049  ;;  %v2075_v38 = vmul.f32 %v3918_v57, %v3918_v57 }
 0xca9   :  { %v2060_v1 = vmul.f32 0.0625, %v2050_v59  ;;  %v2074_v25 = vmul.f32 %v3920_v46, %v3920_v46 }
 0xcaa   :  { %v3926_v43 = vsub.f32 %v2029_v34, %v2061_v60  ;;  %v2093_v21 = vsel %vm209_vm1, %v2075_v38, 0.0 }
 0xcab   :  { %v3929_v27 = vsub.f32 %v2028_v52, %v2060_v1  ;;  %2094 = vadd.xlane.f32.xlu0 %v2093_v21  ;;  %v2090_v29 = vsel %vm209_vm1, %v2074_v25, 0.0  ;;  %v2148_v52 = vsub.s32 5, %v3730_v31 }
 0xcac   :  { %2091 = vadd.xlane.f32.xlu1 %v2090_v29  ;;  %v2077_v49 = vmul.f32 %v3926_v43, %v3926_v43 }
 0xcad   :  { %v2076_v33 = vmul.f32 %v3929_v27, %v3929_v27  ;;  %v2149_v45 = vrot.slane %v3736_v30, %v2148_v52 }
 0xcae   :  { %v2099_v9 = vsel %vm209_vm1, %v2077_v49, 0.0 }
 0xcaf   :  { %2100 = vadd.xlane.f32.xlu0 %v2099_v9  ;;  %v2096_v63 = vsel %vm209_vm1, %v2076_v33, 0.0 }
 0xcb0   :  { %2097 = vadd.xlane.f32.xlu1 %v2096_v63 }
 0xd06   :  { %v2083_v5 = vpop.xlane.xlu0 %2082 }
 0xd07   :  { %v2103_v47 = vmul.f32 0.0625, %v2083_v5  ;;  %v2080_v50 = vpop.xlane.xlu1 %2079 }
 0xd08   :  { %v2102_v51 = vmul.f32 0.0625, %v2080_v50 }
 0xd09   :  { %v2111_v42 = vadd.f32 1e-05, %v2103_v47 }
 0xd0a   :  { %v2110_v15 = vadd.f32 1e-05, %v2102_v51 }
 0xd0b   :  { %3197 = vrsqrt.f32 %v2111_v42 }
 0xd0c   :  { %3199 = vrsqrt.f32 %v2110_v15 }
 0xd0d   :  { %v2089_v37 = vpop.xlane.xlu0 %2088 }
 0xd0e   :  { %v2105_v13 = vmul.f32 0.0625, %v2089_v37  ;;  %v2086_v44 = vpop.xlane.xlu1 %2085 }
 0xd0f   :  { %v2104_v12 = vmul.f32 0.0625, %v2086_v44 }
 0xd10   :  { %v2113_v6 = vadd.f32 1e-05, %v2105_v13 }
 0xd11   :  { %v2112_v34 = vadd.f32 1e-05, %v2104_v12 }
 0xd12   :  { %3201 = vrsqrt.f32 %v2113_v6 }
 0xd13   :  { %3203 = vrsqrt.f32 %v2112_v34 }
 0xd15   :  { %v3198_v16 = vpop.eup %3197 }
 0xd16   :  { %v3200_v32 = vpop.eup %3199  ;;  %v2127_v39 = vmul.f32 %v3198_v16, %v3892_v20 }
 0xd17   :  { %v2126_v56 = vmul.f32 %v3200_v32, %v3894_v35 }
 0xd18   :  { %v2139_v40 = vmul.f32 %v2137_v53, %v2127_v39 }
 0xd19   :  { %v2138_v10 = vmul.f32 %v2137_v53, %v2126_v56 }
 0xd1a   :  { %v2151_v22 = vadd.f32 %v2149_v45, %v2139_v40 }
 0xd1b   :  { %v2150_v11 = vadd.f32 %v2149_v45, %v2138_v10 }
 0xd1c   :  { %v3202_v23 = vpop.eup %3201 }
 0xd1d   :  { %v3204_v24 = vpop.eup %3203  ;;  %2913 = vmatprep.mubr.msk.f32.mxu1 %vm209_vm1, %v2150_v11  ;;  %v2129_v62 = vmul.f32 %v3202_v23, %v3902_v36 }
 0xd1e   :  { %2914 = vmatmul.mubr.msk.f32.vlgmr.msra.gmra.mrb[32].mxu1 %vm209_vm1, %v2151_v22  ;;  %v2128_v54 = vmul.f32 %v3204_v24, %v3904_v3 }
 0xd1f   :  { %v2141_v26 = vmul.f32 %v2137_v53, %v2129_v62 }
 0xd20   :  { %v2140_v20 = vmul.f32 %v2137_v53, %v2128_v54 }
 0xd21   :  { %v2153_v30 = vadd.f32 %v2149_v45, %v2141_v26 }
 0xd22   :  { %v2152_v4 = vadd.f32 %v2149_v45, %v2140_v20 }
 0xd24   :  { %2916 = vmatprep.mubr.msk.f32.mxu1 %vm209_vm1, %v2152_v4 }
 0xd25   :  { %2917 = vmatmul.mubr.msk.f32.gmra.mrb[34].mxu1 %vm209_vm1, %v2153_v30 }
 0xd38   :  { %v2095_v35 = vpop.xlane.xlu0 %2094 }
 0xd39   :  { %v2107_v28 = vmul.f32 0.0625, %v2095_v35  ;;  %v2092_v61 = vpop.xlane.xlu1 %2091 }
 0xd3a   :  { %v2106_v14 = vmul.f32 0.0625, %v2092_v61 }
 0xd3b   :  { %v2115_v0 = vadd.f32 1e-05, %v2107_v28 }
 0xd3c   :  { %v2114_v2 = vadd.f32 1e-05, %v2106_v14  ;;  %v2101_v48 = vpop.xlane.xlu0 %2100 }
 0xd3d   :  { %3205 = vrsqrt.f32 %v2115_v0  ;;  %v2109_v36 = vmul.f32 0.0625, %v2101_v48  ;;  %v2098_v7 = vpop.xlane.xlu1 %2097 }
 0xd3e   :  { %3207 = vrsqrt.f32 %v2114_v2  ;;  %v2108_v3 = vmul.f32 0.0625, %v2098_v7 }
 0xd3f   :  { %v2117_v58 = vadd.f32 1e-05, %v2109_v36 }
 0xd40   :  { %v2116_v8 = vadd.f32 1e-05, %v2108_v3 }
 0xd41   :  { %3209 = vrsqrt.f32 %v2117_v58 }
 0xd42   :  { %3211 = vrsqrt.f32 %v2116_v8 }
 0xd47   :  { %v3206_v19 = vpop.eup %3205 }
 0xd48   :  { %v3208_v60 = vpop.eup %3207  ;;  %v2131_v59 = vmul.f32 %v3206_v19, %v3918_v57 }
 0xd49   :  { %v2130_v38 = vmul.f32 %v3208_v60, %v3920_v46  ;;  %v3961_v46 = vld [vmem:[%s4084_s11] sm:$0x7]  ;;  %s3259_s11 = smov [#allocation2]  }
 0xd4a   :  { %v2143_v1 = vmul.f32 %v2137_v53, %v2131_v59  ;;  %s2478_s1 = sshll.u32 %s3259_s11, 4  ;;  %s2479_s1 = int_to_ptr.vmem [resolvable:$true] %s2478_s1 }
 0xd4b   :  { %v3210_v25 = vpop.eup %3209  ;;  %v2142_v21 = vmul.f32 %v2137_v53, %v2130_v38  ;;  %s3229_s16 = scalar_lea.vmem %s2479_s1, 1024  ;;  %p3234_p1 = scmp.lt.s32.totalorder %s2479_s1, %s2479_s1 }
 0xd4c   :  { %v3212_v29 = vpop.eup %3211  ;;  %v2133_v49 = vmul.f32 %v3210_v25, %v3926_v43  ;;  %v2155_v63 = vadd.f32 %v2149_v45, %v2143_v1  ;;  %v2180_v43 = vrot.slane %v3961_v46, %v1478_v41  ;;  %p3230_p0 = scmp.ne.s32.totalorder %s2479_s1, %s3229_s16  ;;  %p3235_p2 = scmp.lt.s32.totalorder %s3229_s16, %s3229_s16 }
 0xd4d   :  { %v2154_v33 = vadd.f32 %v2149_v45, %v2142_v21  ;;  %v2132_v9 = vmul.f32 %v3212_v29, %v3929_v27 }
 0xd4e   :  { %v2145_v5 = vmul.f32 %v2137_v53, %v2133_v49  ;;  %p3236_p3 = por %p3235_p2, %p3234_p1 }
 0xd4f   :  { %2919 = vmatprep.mubr.msk.f32.mxu1 %vm209_vm1, %v2154_v33  ;;  %v2144_v47 = vmul.f32 %v2137_v53, %v2132_v9 }
 0xd50   :  { %2920 = vmatmul.mubr.msk.f32.gmra.mrb[36].mxu1 %vm209_vm1, %v2155_v63  ;;  %v2157_v57 = vadd.f32 %v2149_v45, %v2145_v5  ;;  %p3237_p4 = pnand %p3236_p3, %p3230_p0 }
 0xd51   :  { %v2156_v50 = vadd.f32 %v2149_v45, %v2144_v47 }
 0xd53   :  { %2922 = vmatprep.mubr.msk.f32.mxu1 %vm209_vm1, %v2156_v50 }
 0xd54   :  { %2923 = vmatmul.mubr.msk.f32.gmra.mrb[38].mxu1 %vm209_vm1, %v2157_v57 }
 0xdf1   :  { %v2915_v27 = vpop.f32.mrb[32].mxu1 }
 0xdf2   :  { %v2277_v51 = vadd.f32 %v2915_v27, %v2180_v43  ;;  %v2271_v42 = vpop.f32.mrb[33].mxu1 }
 0xdf3   :  { %v2272_v15 = vadd.f32 %v2271_v42, %v2180_v43 }
 0xdf4   :  { %v2319_v37 = vmul.f32 0.01, %v2277_v51  ;;  %vm2311_vm4 = vcmp.gt.f32.partialorder %v2277_v51, 0.0 }
 0xdf5   :  { %v2318_v13 = vmul.f32 0.01, %v2272_v15  ;;  %vm2310_vm5 = vcmp.gt.f32.partialorder %v2272_v15, 0.0 }
 0xdf6   :  { %v2327_v44 = vsel %vm2311_vm4, %v2277_v51, %v2319_v37 }
 0xdf7   :  { %v2337_v12 = vsel %vm60_vm0, %v2327_v44, 0.0  ;;  %v2326_v17 = vsel %vm2310_vm5, %v2272_v15, %v2318_v13 }
 0xdf8   :  { %2338 = vadd.xlane.f32.xlu0 %v2337_v12  ;;  %v2918_v6 = vpop.f32.mrb[34].mxu1  ;;  %v2334_v34 = vsel %vm60_vm0, %v2326_v17, 0.0 }
 0xdf9   :  { %v2287_v52 = vadd.f32 %v2918_v6, %v2180_v43  ;;  %2335 = vadd.xlane.f32.xlu1 %v2334_v34  ;;  %v2281_v53 = vpop.f32.mrb[35].mxu1 }
 0xdfa   :  { %v2282_v41 = vadd.f32 %v2281_v53, %v2180_v43 }
 0xdfb   :  { %v2321_v16 = vmul.f32 0.01, %v2287_v52  ;;  %vm2313_vm6 = vcmp.gt.f32.partialorder %v2287_v52, 0.0 }
 0xdfc   :  { %v2320_v32 = vmul.f32 0.01, %v2282_v41  ;;  %vm2312_vm7 = vcmp.gt.f32.partialorder %v2282_v41, 0.0 }
 0xdfd   :  { %v2329_v39 = vsel %vm2313_vm6, %v2287_v52, %v2321_v16 }
 0xdfe   :  { %v2343_v45 = vsel %vm60_vm0, %v2329_v39, 0.0  ;;  %v2328_v56 = vsel %vm2312_vm7, %v2282_v41, %v2320_v32 }
 0xdff   :  { %2344 = vadd.xlane.f32.xlu0 %v2343_v45  ;;  %v2340_v40 = vsel %vm60_vm0, %v2328_v56, 0.0 }
 0xe00   :  { %2341 = vadd.xlane.f32.xlu1 %v2340_v40 }
 0xe23   :  { %v2921_v10 = vpop.f32.mrb[36].mxu1 }
 0xe24   :  { %v2297_v11 = vadd.f32 %v2921_v10, %v2180_v43  ;;  %v2291_v23 = vpop.f32.mrb[37].mxu1 }
 0xe25   :  { %v2292_v22 = vadd.f32 %v2291_v23, %v2180_v43 }
 0xe26   :  { %v2323_v24 = vmul.f32 0.01, %v2297_v11  ;;  %vm2315_vm8 = vcmp.gt.f32.partialorder %v2297_v11, 0.0 }
 0xe27   :  { %v2322_v62 = vmul.f32 0.01, %v2292_v22  ;;  %v2924_v54 = vpop.f32.mrb[38].mxu1  ;;  %vm2314_vm9 = vcmp.gt.f32.partialorder %v2292_v22, 0.0 }
 0xe28   :  { %v2307_v26 = vadd.f32 %v2924_v54, %v2180_v43  ;;  %v2301_v20 = vpop.f32.mrb[39].mxu1  ;;  %v2331_v4 = vsel %vm2315_vm8, %v2297_v11, %v2323_v24 }
 0xe29   :  { %v2302_v30 = vadd.f32 %v2301_v20, %v2180_v43  ;;  %v2349_v35 = vsel %vm60_vm0, %v2331_v4, 0.0  ;;  %v2330_v28 = vsel %vm2314_vm9, %v2292_v22, %v2322_v62 }
 0xe2a   :  { %v2325_v61 = vmul.f32 0.01, %v2307_v26  ;;  %2350 = vadd.xlane.f32.xlu0 %v2349_v35  ;;  %v2346_v14 = vsel %vm60_vm0, %v2330_v28, 0.0  ;;  %vm2317_vm10 = vcmp.gt.f32.partialorder %v2307_v26, 0.0 }
 0xe2b   :  { %v2324_v0 = vmul.f32 0.01, %v2302_v30  ;;  %2347 = vadd.xlane.f32.xlu1 %v2346_v14  ;;  %vm2316_vm11 = vcmp.gt.f32.partialorder %v2302_v30, 0.0 }
 0xe2c   :  { %v2333_v2 = vsel %vm2317_vm10, %v2307_v26, %v2325_v61 }
 0xe2d   :  { %v2355_v48 = vsel %vm60_vm0, %v2333_v2, 0.0  ;;  %v2332_v36 = vsel %vm2316_vm11, %v2302_v30, %v2324_v0 }
 0xe2e   :  { %2356 = vadd.xlane.f32.xlu0 %v2355_v48  ;;  %v2352_v7 = vsel %vm60_vm0, %v2332_v36, 0.0 }
 0xe2f   :  { %2353 = vadd.xlane.f32.xlu1 %v2352_v7 }
 0xe85   :  { %v2339_v3 = vpop.xlane.xlu0 %2338 }
 0xe86   :  { %v2360_v58 = vmul.f32 0.125, %v2339_v3  ;;  %v2336_v8 = vpop.xlane.xlu1 %2335 }
 0xe87   :  { %v2359_v19 = vmul.f32 0.125, %v2336_v8 }
 0xe88   :  { %v3974_v60 = vsub.f32 %v2327_v44, %v2360_v58 }
 0xe89   :  { %v3976_v59 = vsub.f32 %v2326_v17, %v2359_v19 }
 0xe8a   :  { %v2376_v38 = vmul.f32 %v3974_v60, %v3974_v60 }
 0xe8b   :  { %v2375_v1 = vmul.f32 %v3976_v59, %v3976_v59 }
 0xe8c   :  { %v2345_v25 = vpop.xlane.xlu0 %2344  ;;  %v2386_v21 = vsel %vm60_vm0, %v2376_v38, 0.0 }
 0xe8d   :  { %v2362_v29 = vmul.f32 0.125, %v2345_v25  ;;  %v2342_v49 = vpop.xlane.xlu1 %2341  ;;  %2387 = vadd.xlane.f32.xlu0 %v2386_v21  ;;  %v2383_v33 = vsel %vm60_vm0, %v2375_v1, 0.0 }
 0xe8e   :  { %v2361_v9 = vmul.f32 0.125, %v2342_v49  ;;  %2384 = vadd.xlane.f32.xlu1 %v2383_v33 }
 0xe8f   :  { %v3984_v63 = vsub.f32 %v2329_v39, %v2362_v29 }
 0xe90   :  { %v3986_v5 = vsub.f32 %v2328_v56, %v2361_v9 }
 0xe91   :  { %v2378_v47 = vmul.f32 %v3984_v63, %v3984_v63 }
 0xe92   :  { %v2377_v50 = vmul.f32 %v3986_v5, %v3986_v5 }
 0xe93   :  { %v2392_v57 = vsel %vm60_vm0, %v2378_v47, 0.0 }
 0xe94   :  { %2393 = vadd.xlane.f32.xlu0 %v2392_v57  ;;  %v2389_v43 = vsel %vm60_vm0, %v2377_v50, 0.0 }
 0xe95   :  { %2390 = vadd.xlane.f32.xlu1 %v2389_v43 }
 0xeb7   :  { %v2351_v27 = vpop.xlane.xlu0 %2350 }
 0xeb8   :  { %v2364_v51 = vmul.f32 0.125, %v2351_v27  ;;  %v2348_v42 = vpop.xlane.xlu1 %2347 }
 0xeb9   :  { %v2363_v15 = vmul.f32 0.125, %v2348_v42 }
 0xeba   :  { %v3994_v37 = vsub.f32 %v2331_v4, %v2364_v51 }
 0xebb   :  { %v3996_v13 = vsub.f32 %v2330_v28, %v2363_v15  ;;  %v2357_v44 = vpop.xlane.xlu0 %2356 }
 0xebc   :  { %v2366_v12 = vmul.f32 0.125, %v2357_v44  ;;  %v2354_v17 = vpop.xlane.xlu1 %2353  ;;  %v2380_v6 = vmul.f32 %v3994_v37, %v3994_v37 }
 0xebd   :  { %v2365_v34 = vmul.f32 0.125, %v2354_v17  ;;  %v2379_v52 = vmul.f32 %v3996_v13, %v3996_v13 }
 0xebe   :  { %v4002_v53 = vsub.f32 %v2333_v2, %v2366_v12  ;;  %v2398_v41 = vsel %vm60_vm0, %v2380_v6, 0.0 }
 0xebf   :  { %v4005_v16 = vsub.f32 %v2332_v36, %v2365_v34  ;;  %2399 = vadd.xlane.f32.xlu0 %v2398_v41  ;;  %v2395_v32 = vsel %vm60_vm0, %v2379_v52, 0.0 }
 0xec0   :  { %2396 = vadd.xlane.f32.xlu1 %v2395_v32  ;;  %v2382_v39 = vmul.f32 %v4002_v53, %v4002_v53 }
 0xec1   :  { %v2381_v45 = vmul.f32 %v4005_v16, %v4005_v16 }
 0xec2   :  { %v2404_v56 = vsel %vm60_vm0, %v2382_v39, 0.0 }
 0xec3   :  { %2405 = vadd.xlane.f32.xlu0 %v2404_v56  ;;  %v2401_v40 = vsel %vm60_vm0, %v2381_v45, 0.0 }
 0xec4   :  { %2402 = vadd.xlane.f32.xlu1 %v2401_v40 }
 0xec5   :  { %3240 = shalt.err (!%p3237_p4)
}
 0xec6   :  { %s3241_s19 = scalar_lea.hbm %s4086_s13, 1024 }
 0xec7   :  { %p3242_p5 = scmp.ne.s32.totalorder %s4086_s13, %s3241_s19  ;;  %p3245_p6 = scmp.lt.u32.totalorder %s3241_s19, %s4086_s13 }
 0xec9   :  { %p3247_p7 = pnand %p3245_p6, %p3242_p5 }
 0xecb   :  { %3250 = shalt.err (!%p3247_p7)
}
 0xecc   :  { %s3260_s23 = smov 128   ;;  %v2442_v28 = vrot.slane %v3961_v46, %v1724_v18  ;;  %v2454_v0 = vrot.slane %v3961_v46, %v1736_v55 }
 0xecd   :  { %2484 = dma.vmem_to_hbm [thread:$0]  %s2479_s1, 1024, %s4086_s13, [#allocation3], %s3260_s23, %s3260_s23, %s3258_s20  }
 0xf1a   :  { %v2388_v10 = vpop.xlane.xlu0 %2387 }
 0xf1b   :  { %v2408_v11 = vmul.f32 0.125, %v2388_v10  ;;  %v2385_v23 = vpop.xlane.xlu1 %2384 }
 0xf1c   :  { %v2407_v22 = vmul.f32 0.125, %v2385_v23 }
 0xf1d   :  { %v2416_v24 = vadd.f32 1e-05, %v2408_v11 }
 0xf1e   :  { %v2415_v62 = vadd.f32 1e-05, %v2407_v22 }
 0xf1f   :  { %3213 = vrsqrt.f32 %v2416_v24 }
 0xf20   :  { %3215 = vrsqrt.f32 %v2415_v62 }
 0xf21   :  { %v2394_v54 = vpop.xlane.xlu0 %2393 }
 0xf22   :  { %v2410_v26 = vmul.f32 0.125, %v2394_v54  ;;  %v2391_v20 = vpop.xlane.xlu1 %2390 }
 0xf23   :  { %v2409_v4 = vmul.f32 0.125, %v2391_v20 }
 0xf24   :  { %v2418_v30 = vadd.f32 1e-05, %v2410_v26 }
 0xf25   :  { %v2417_v35 = vadd.f32 1e-05, %v2409_v4 }
 0xf26   :  { %3217 = vrsqrt.f32 %v2418_v30 }
 0xf27   :  { %3219 = vrsqrt.f32 %v2417_v35 }
 0xf29   :  { %v3214_v61 = vpop.eup %3213 }
 0xf2a   :  { %v3216_v14 = vpop.eup %3215  ;;  %v2432_v2 = vmul.f32 %v3214_v61, %v3974_v60 }
 0xf2b   :  { %v2431_v48 = vmul.f32 %v3216_v14, %v3976_v59 }
 0xf2c   :  { %v2444_v36 = vmul.f32 %v2442_v28, %v2432_v2 }
 0xf2d   :  { %v2443_v7 = vmul.f32 %v2442_v28, %v2431_v48 }
 0xf2e   :  { %v2456_v3 = vadd.f32 %v2454_v0, %v2444_v36 }
 0xf2f   :  { %v2455_v58 = vadd.f32 %v2454_v0, %v2443_v7 }
 0xf30   :  { %v3218_v8 = vpop.eup %3217  ;;  %2464 = vst.msk [vmem:[%s4085_s12 + $0x8] sm:$0xff] %vm60_vm0, %v2456_v3 }
 0xf31   :  { %v3220_v18 = vpop.eup %3219  ;;  %2463 = vst.msk [vmem:[%s4085_s12] sm:$0xff] %vm60_vm0, %v2455_v58  ;;  %v2434_v31 = vmul.f32 %v3218_v8, %v3984_v63 }
 0xf32   :  { %v2433_v55 = vmul.f32 %v3220_v18, %v3986_v5 }
 0xf33   :  { %v2446_v46 = vmul.f32 %v2442_v28, %v2434_v31 }
 0xf34   :  { %v2445_v19 = vmul.f32 %v2442_v28, %v2433_v55 }
 0xf35   :  { %v2458_v60 = vadd.f32 %v2454_v0, %v2446_v46 }
 0xf36   :  { %v2457_v59 = vadd.f32 %v2454_v0, %v2445_v19 }
 0xf37   :  { %2466 = vst.msk [vmem:[%s4085_s12 + $0x18] sm:$0xff] %vm60_vm0, %v2458_v60 }
 0xf38   :  { %2465 = vst.msk [vmem:[%s4085_s12 + $0x10] sm:$0xff] %vm60_vm0, %v2457_v59 }
 0xf4c   :  { %v2400_v38 = vpop.xlane.xlu0 %2399 }
 0xf4d   :  { %v2412_v1 = vmul.f32 0.125, %v2400_v38  ;;  %v2397_v25 = vpop.xlane.xlu1 %2396 }
 0xf4e   :  { %v2411_v21 = vmul.f32 0.125, %v2397_v25 }
 0xf4f   :  { %v2420_v29 = vadd.f32 1e-05, %v2412_v1 }
 0xf50   :  { %v2419_v49 = vadd.f32 1e-05, %v2411_v21  ;;  %v2406_v33 = vpop.xlane.xlu0 %2405 }
 0xf51   :  { %3221 = vrsqrt.f32 %v2420_v29  ;;  %v2414_v9 = vmul.f32 0.125, %v2406_v33  ;;  %v2403_v63 = vpop.xlane.xlu1 %2402 }
 0xf52   :  { %3223 = vrsqrt.f32 %v2419_v49  ;;  %v2413_v5 = vmul.f32 0.125, %v2403_v63 }
 0xf53   :  { %v2422_v47 = vadd.f32 1e-05, %v2414_v9 }
 0xf54   :  { %v2421_v50 = vadd.f32 1e-05, %v2413_v5 }
 0xf55   :  { %3225 = vrsqrt.f32 %v2422_v47 }
 0xf56   :  { %3227 = vrsqrt.f32 %v2421_v50 }
 0xf5b   :  { %v3222_v57 = vpop.eup %3221 }
 0xf5c   :  { %v3224_v43 = vpop.eup %3223  ;;  %v2436_v27 = vmul.f32 %v3222_v57, %v3994_v37 }
 0xf5d   :  { %v2435_v51 = vmul.f32 %v3224_v43, %v3996_v13 }
 0xf5e   :  { %v2448_v42 = vmul.f32 %v2442_v28, %v2436_v27 }
 0xf5f   :  { %v3226_v15 = vpop.eup %3225  ;;  %v2447_v44 = vmul.f32 %v2442_v28, %v2435_v51 }
 0xf60   :  { %v3228_v12 = vpop.eup %3227  ;;  %v2460_v17 = vadd.f32 %v2454_v0, %v2448_v42  ;;  %v2438_v6 = vmul.f32 %v3226_v15, %v4002_v53 }
 0xf61   :  { %v2459_v34 = vadd.f32 %v2454_v0, %v2447_v44  ;;  %v2437_v52 = vmul.f32 %v3228_v12, %v4005_v16 }
 0xf62   :  { %2468 = vst.msk [vmem:[%s4085_s12 + $0x28] sm:$0xff] %vm60_vm0, %v2460_v17  ;;  %v2450_v41 = vmul.f32 %v2442_v28, %v2438_v6 }
 0xf63   :  { %2467 = vst.msk [vmem:[%s4085_s12 + $0x20] sm:$0xff] %vm60_vm0, %v2459_v34  ;;  %v2449_v37 = vmul.f32 %v2442_v28, %v2437_v52 }
 0xf64   :  { %v2462_v13 = vadd.f32 %v2454_v0, %v2450_v41 }
 0xf65   :  { %v2461_v32 = vadd.f32 %v2454_v0, %v2449_v37 }
 0xf66   :  { %2470 = vst.msk [vmem:[%s4085_s12 + $0x38] sm:$0xff] %vm60_vm0, %v2462_v13 }
 0xf67   :  { %2469 = vst.msk [vmem:[%s4085_s12 + $0x30] sm:$0xff] %vm60_vm0, %v2461_v32 }
 0xf68   :  { %3251 = dma.done.wait [#allocation3], 1024  }
 0xf69   :  { %3252 = vsyncadd [#allocation3], 4294966272 }
 0xf6a   :  { %2490 = vsyncpa [#allocation3], 1 }

// kernel: _lambda_.3
= control target key start
LH: loop header
LB: loop body
LE: loop exit
PB: predicated region body
PF: predicated region fallthrough
CT: control target
= control target key end

     0   :  { %s3301_s27 = smov 120   ;;  %vm46_vm0 = vcmask 64512   ;;  %v3302_v8 = vmov 0.0   ;;  %v85_v25 = vlaneseq  ;;  %vm170_vm5 = vcmask 130048   ;;  %s3305_s16 = smov 112   ;;  %s3864_s0 = inlined_call_operand.vmem [shape: f32[2,8,16], index: 0, kind: input, shape index: {}]   ;;  %s3865_s1 = inlined_call_operand.vmem [shape: f32[2,8,16], index: 1, kind: input, shape index: {}]   ;;  %s3866_s2 = inlined_call_operand.vmem [shape: f32[2,3,16], index: 2, kind: input, shape index: {}]   ;;  %s3867_s3 = inlined_call_operand.vmem [shape: f32[32,32], index: 3, kind: input, shape index: {}]   ;;  %s3868_s4 = inlined_call_operand.vmem [shape: f32[5,32], index: 4, kind: input, shape index: {}]   ;;  %s3869_s5 = inlined_call_operand.vmem [shape: f32[8,32], index: 5, kind: input, shape index: {}]   ;;  %s3870_s6 = inlined_call_operand.vmem [shape: f32[1,2,16,48], index: 6, kind: input, shape index: {}]   ;;  %s3871_s7 = inlined_call_operand.vmem [shape: f32[1,2,1,48], index: 7, kind: input, shape index: {}]   ;;  %s3872_s8 = inlined_call_operand.vmem [shape: f32[1,2,16,16], index: 8, kind: input, shape index: {}]   ;;  %s3873_s12 = inlined_call_operand.vmem [shape: f32[1,2,6,16], index: 12, kind: input, shape index: {}]   ;;  %s3874_s9 = inlined_call_operand.vmem [shape: f32[1,2,16,64], index: 9, kind: input, shape index: {}]   ;;  %s3875_s11 = inlined_call_operand.vmem [shape: f32[1,2,64,16], index: 11, kind: input, shape index: {}]   ;;  %s3876_s10 = inlined_call_operand.vmem [shape: f32[1,2,1,64], index: 10, kind: input, shape index: {}]   ;;  %s3877_s13 = inlined_call_operand.vmem [shape: f32[2,8,32], index: 13, kind: output, shape index: {}]  }
   0x1   :  { %v44_v0 = vld [vmem:[%s3864_s0] sm:$0xff]  ;;  %v45_v1 = vld [vmem:[%s3864_s0 + $0x8] sm:$0xff]  ;;  %vm370_vm9 = vcmask 261120   ;;  %vm3304_vm11 = vmmov 0   ;;  %s3306_s17 = smov 96   ;;  %s3307_s18 = smov 104  }
   0x2   :  { %61 = vrot.lane.b32.xlu0 %v44_v0, %s3301_s27  ;;  %v80_v6 = vld [vmem:[%s3865_s1 + $0x8] sm:$0xff]  ;;  %v47_v14 = vsel %vm46_vm0, %v44_v0, 0.0  ;;  %v50_v15 = vsel %vm46_vm0, %v45_v1, 0.0  ;;  %v79_v16 = vld [vmem:[%s3865_s1] sm:$0xff]  ;;  %v3409_v26 = vshrl.u32 %v85_v25, 7  ;;  %s3309_s23 = smov 8  }
   0x3   :  { %2988 = vmatprep.subr.mxu1 %v80_v6  ;;  %2983 = vmatprep.subr.mxu0 %v79_v16  ;;  %v3417_v28 = vld [vmem:[%s3866_s2 + $0x4] sm:$0x7]  ;;  %v3426_v36 = vld [vmem:[%s3866_s2] sm:$0x7]  ;;  %s3308_s2 = smov 88   ;;  %vm1543_vm12 = vcmask 523264  }
   0x4   :  { %2989 = vmatpush3.msra.mxu1 %v80_v6  ;;  %2984 = vmatpush3.msra.mxu0 %v79_v16  ;;  %v3412_v27 = vsub.s32 0, %v3409_v26 }
   0x5   :  { %3016 = vmatprep.subr.mxu0 %v3302_v8 }
   0x6   :  { %63 = vrot.lane.b32.xlu0 %v45_v1, %s3301_s27  ;;  %v221_v29 = vrot.slane %v3417_v28, %v3412_v27  ;;  %v88_v37 = vrot.slane %v3426_v36, %v3412_v27 }
  0x74   :  { %v62_v2 = vpop.permute.xlu0 %61 }
  0x75   :  { %v67_v3 = vsel %vm46_vm0, %v62_v2, 0.0 }
  0x76   :  { %68 = vadd.xlane.f32.xlu1 %v67_v3 }
  0x78   :  { %v64_v4 = vpop.permute.xlu0 %63 }
  0x79   :  { %v70_v5 = vsel %vm46_vm0, %v64_v4, 0.0 }
  0x7a   :  { %71 = vadd.xlane.f32.xlu1 %v70_v5 }
 0x103   :  { %v69_v7 = vpop.xlane.xlu1 %68 }
 0x104   :  { %vm73_vm1 = vcmp.ne.f32.partialorder %v69_v7, 0.0 }
 0x105   :  { %v2843_v9 = vsel %vm73_vm1, 1.0, %v3302_v8 }
 0x106   :  { %v216_v10 = vmul.f32 %v2843_v9, %v44_v0 }
 0x107   :  { %v72_v11 = vpop.xlane.xlu1 %71 }
 0x108   :  { %vm74_vm2 = vcmp.ne.f32.partialorder %v72_v11, 0.0  ;;  %224 = vrot.lane.b32.xlu0 %v216_v10, %s3301_s27  ;;  %v3443_v10 = vsub.s32 1, %v3409_v26  ;;  %v364_v11 = vld [vmem:[%s3867_s3 + $0x10] sm:$0xff] }
 0x109   :  { %v2844_v12 = vsel %vm74_vm2, 1.0, %v3302_v8 }
 0x10a   :  { %v217_v13 = vmul.f32 %v2844_v12, %v45_v1  ;;  %v365_v12 = vld [vmem:[%s3867_s3 + $0x18] sm:$0xff] }
 0x10c   :  { %226 = vrot.lane.b32.xlu1 %v217_v13, %s3301_s27  ;;  %v3168_v13 = vpack.c.bf16 %v365_v12, %v364_v11 }
 0x127   :  { %48 = vadd.xlane.f32.xlu0 %v47_v14  ;;  %v3452_v14 = vsub.s32 2, %v3409_v26 }
 0x130   :  { %51 = vadd.xlane.f32.xlu1 %v50_v15  ;;  %v336_v15 = vrot.slane %v3417_v28, %v3443_v10 }
 0x17a   :  { %v225_v17 = vpop.permute.xlu0 %224 }
 0x17b   :  { %2990 = vmatprep.mubr.msk.f32.mxu1 %vm46_vm0, %v225_v17  ;;  %v342_v17 = vrot.slane %v3417_v28, %v3452_v14 }
 0x17e   :  { %v227_v18 = vpop.permute.xlu1 %226 }
 0x17f   :  { %2991 = vmatmul.mubr.msk.f32.vlgmr.msra.gmra.mrb[0].mxu1 %vm46_vm0, %v227_v18 }
 0x1b4   :  { %v49_v19 = vpop.xlane.xlu0 %48 }
 0x1b5   :  { %vm53_vm3 = vcmp.ne.f32.partialorder %v49_v19, 0.0 }
 0x1b6   :  { %v2841_v20 = vsel %vm53_vm3, 1.0, %v3302_v8 }
 0x1b7   :  { %v83_v21 = vmul.f32 %v2841_v20, %v44_v0  ;;  %v362_v0 = vld [vmem:[%s3867_s3] sm:$0xff] }
 0x1b9   :  { %2985 = vmatprep.mubr.msk.f32.mxu0 %vm46_vm0, %v83_v21 }
 0x1bd   :  { %v52_v22 = vpop.xlane.xlu1 %51 }
 0x1be   :  { %vm54_vm4 = vcmp.ne.f32.partialorder %v52_v22, 0.0 }
 0x1bf   :  { %v2842_v23 = vsel %vm54_vm4, 1.0, %v3302_v8 }
 0x1c0   :  { %v84_v24 = vmul.f32 %v2842_v23, %v45_v1  ;;  %v363_v1 = vld [vmem:[%s3867_s3 + $0x8] sm:$0xff]  ;;  %s3303_s3 = smov 16  }
 0x1c1   :  { %v3164_v2 = vpack.c.bf16 %v363_v1, %v362_v0 }
 0x1c2   :  { %2986 = vmatmul.mubr.msk.f32.vlgmr.msra.gmra.mrb[0].mxu0 %vm46_vm0, %v84_v24 }
 0x1c3   :  { %3165 = vmatprep.subr.bf16.mxu1 %v3164_v2  ;;  %3018 = vmatprep.mubr.msk.f32.mxu0 %vm3304_vm11, %v3302_v8 }
 0x1c4   :  { %3167 = vmatpush3.bf16.msra.mxu1 %v3164_v2 }
 0x1c5   :  { %3169 = vmatprep.subr.bf16.mxu1 %v3168_v13 }
 0x1c8   :  { %3171 = vmatpush3.bf16.msra.mxu1 %v3168_v13 }
 0x252   :  { %v2992_v30 = vpop.f32.mrb[0].mxu1 }
 0x253   :  { %v298_v31 = vpop.f32.mrb[1].mxu1  ;;  %v304_v33 = vadd.f32 %v2992_v30, %v221_v29 }
 0x254   :  { %v299_v32 = vadd.f32 %v298_v31, %v221_v29 }
 0x255   :  { %v310_v35 = vsel %vm170_vm5, %v304_v33, 0.0 }
 0x256   :  { %v307_v34 = vsel %vm170_vm5, %v299_v32, 0.0 }
 0x257   :  { %308 = vadd.xlane.f32.xlu0 %v307_v34 }
 0x25b   :  { %311 = vadd.xlane.f32.xlu0 %v310_v35 }
 0x295   :  { %v2987_v38 = vpop.f32.mrb[0].mxu0 }
 0x296   :  { %v161_v39 = vpop.f32.mrb[1].mxu0  ;;  %v167_v40 = vadd.f32 %v2987_v38, %v88_v37 }
 0x297   :  { %v162_v41 = vadd.f32 %v161_v39, %v88_v37  ;;  %v201_v39 = vrot.slane %v3426_v36, %v3443_v10 }
 0x298   :  { %v174_v43 = vsel %vm170_vm5, %v167_v40, 0.0 }
 0x299   :  { %v171_v42 = vsel %vm170_vm5, %v162_v41, 0.0 }
 0x29a   :  { %172 = vadd.xlane.f32.xlu0 %v171_v42  ;;  %v207_v42 = vrot.slane %v3426_v36, %v3452_v14 }
 0x29e   :  { %175 = vadd.xlane.f32.xlu0 %v174_v43 }
 0x2e4   :  { %v309_v44 = vpop.xlane.xlu0 %308 }
 0x2e5   :  { %v313_v45 = vmul.f32 0.0625, %v309_v44 }
 0x2e7   :  { %v315_v46 = vsub.f32 %v299_v32, %v313_v45 }
 0x2e8   :  { %v312_v47 = vpop.xlane.xlu0 %311 }
 0x2e9   :  { %v314_v48 = vmul.f32 0.0625, %v312_v47  ;;  %v317_v49 = vmul.f32 %v315_v46, %v315_v46 }
 0x2eb   :  { %v316_v50 = vsub.f32 %v304_v33, %v314_v48  ;;  %v319_v51 = vsel %vm170_vm5, %v317_v49, 0.0 }
 0x2ec   :  { %320 = vadd.xlane.f32.xlu0 %v319_v51 }
 0x2ed   :  { %v318_v52 = vmul.f32 %v316_v50, %v316_v50 }
 0x2ef   :  { %v322_v53 = vsel %vm170_vm5, %v318_v52, 0.0 }
 0x2f0   :  { %323 = vadd.xlane.f32.xlu1 %v322_v53 }
 0x327   :  { %v173_v54 = vpop.xlane.xlu0 %172 }
 0x328   :  { %v178_v55 = vmul.f32 0.0625, %v173_v54 }
 0x32a   :  { %v180_v56 = vsub.f32 %v162_v41, %v178_v55  ;;  %v3471_v55 = vld [vmem:[%s3868_s4] sm:$0x1f] }
 0x32b   :  { %v176_v57 = vpop.xlane.xlu0 %175 }
 0x32c   :  { %v179_v58 = vmul.f32 0.0625, %v176_v57  ;;  %v182_v59 = vmul.f32 %v180_v56, %v180_v56 }
 0x32e   :  { %v181_v60 = vsub.f32 %v167_v40, %v179_v58  ;;  %v184_v61 = vsel %vm170_vm5, %v182_v59, 0.0 }
 0x32f   :  { %185 = vadd.xlane.f32.xlu0 %v184_v61 }
 0x330   :  { %v183_v62 = vmul.f32 %v181_v60, %v181_v60 }
 0x332   :  { %v187_v63 = vsel %vm170_vm5, %v183_v62, 0.0 }
 0x333   :  { %188 = vadd.xlane.f32.xlu1 %v187_v63 }
 0x379   :  { %v321_v3 = vpop.xlane.xlu0 %320 }
 0x37a   :  { %v325_v4 = vmul.f32 0.0625, %v321_v3 }
 0x37c   :  { %v327_v5 = vadd.f32 1e-05, %v325_v4 }
 0x37d   :  { %v324_v6 = vpop.xlane.xlu1 %323 }
 0x37e   :  { %3237 = vrsqrt.f32 %v327_v5  ;;  %v326_v7 = vmul.f32 0.0625, %v324_v6 }
 0x380   :  { %v328_v9 = vadd.f32 1e-05, %v326_v7 }
 0x382   :  { %3239 = vrsqrt.f32 %v328_v9 }
 0x388   :  { %v3238_v16 = vpop.eup %3237 }
 0x389   :  { %v331_v18 = vmul.f32 %v3238_v16, %v315_v46 }
 0x38b   :  { %v337_v19 = vmul.f32 %v336_v15, %v331_v18  ;;  %v482_v18 = vrot.slane %v3471_v55, %v3443_v10 }
 0x38c   :  { %v3240_v20 = vpop.eup %3239 }
 0x38d   :  { %v343_v21 = vadd.f32 %v342_v17, %v337_v19  ;;  %v332_v22 = vmul.f32 %v3240_v20, %v316_v50 }
 0x38f   :  { %vm345_vm6 = vcmp.gt.f32.partialorder %v343_v21, 0.0  ;;  %v347_v23 = vmul.f32 0.01, %v343_v21  ;;  %v338_v24 = vmul.f32 %v336_v15, %v332_v22  ;;  %v488_v22 = vrot.slane %v3471_v55, %v3452_v14 }
 0x391   :  { %v349_v25 = vsel %vm345_vm6, %v343_v21, %v347_v23  ;;  %v344_v29 = vadd.f32 %v342_v17, %v338_v24 }
 0x392   :  { %353 = vrot.lane.b32.xlu0 %v349_v25, %s3303_s3  ;;  %v491_v25 = vld [vmem:[%s3869_s5] sm:$0xff] }
 0x393   :  { %vm346_vm7 = vcmp.gt.f32.partialorder %v344_v29, 0.0  ;;  %v348_v30 = vmul.f32 0.01, %v344_v29 }
 0x395   :  { %v350_v31 = vsel %vm346_vm7, %v344_v29, %v348_v30 }
 0x396   :  { %355 = vrot.lane.b32.xlu1 %v350_v31, %s3303_s3 }
 0x3bc   :  { %v186_v32 = vpop.xlane.xlu0 %185 }
 0x3bd   :  { %v190_v28 = vmul.f32 0.0625, %v186_v32 }
 0x3bf   :  { %v192_v34 = vadd.f32 1e-05, %v190_v28 }
 0x3c0   :  { %v189_v33 = vpop.xlane.xlu1 %188 }
 0x3c1   :  { %v191_v35 = vmul.f32 0.0625, %v189_v33  ;;  %3241 = vrsqrt.f32 %v192_v34 }
 0x3c3   :  { %v193_v37 = vadd.f32 1e-05, %v191_v35 }
 0x3c5   :  { %3243 = vrsqrt.f32 %v193_v37 }
 0x3cb   :  { %v3242_v38 = vpop.eup %3241 }
 0x3cc   :  { %v196_v40 = vmul.f32 %v3242_v38, %v180_v56  ;;  %v369_v56 = vrot.slane %v3471_v55, %v3412_v27 }
 0x3ce   :  { %v202_v43 = vmul.f32 %v201_v39, %v196_v40 }
 0x3cf   :  { %v3244_v41 = vpop.eup %3243 }
 0x3d0   :  { %v197_v44 = vmul.f32 %v3244_v41, %v181_v60  ;;  %v208_v45 = vadd.f32 %v207_v42, %v202_v43 }
 0x3d2   :  { %v203_v46 = vmul.f32 %v201_v39, %v197_v44  ;;  %v212_v47 = vmul.f32 0.01, %v208_v45  ;;  %vm210_vm8 = vcmp.gt.f32.partialorder %v208_v45, 0.0 }
 0x3d4   :  { %v209_v48 = vadd.f32 %v207_v42, %v203_v46  ;;  %v214_v49 = vsel %vm210_vm8, %v208_v45, %v212_v47  ;;  %v532_v46 = vld [vmem:[%s3870_s6] sm:$0xff]  ;;  %v533_v47 = vld [vmem:[%s3870_s6 + $0x8] sm:$0xff] }
 0x3d6   :  { %v213_v51 = vmul.f32 0.01, %v209_v48  ;;  %vm211_vm10 = vcmp.gt.f32.partialorder %v209_v48, 0.0 }
 0x3d8   :  { %v215_v53 = vsel %vm211_vm10, %v209_v48, %v213_v51  ;;  %v3172_v48 = vpack.c.bf16 %v533_v47, %v532_v46 }
 0x3da   :  { %3173 = vmatprep.subr.bf16.mxu1 %v3172_v48 }
 0x404   :  { %v354_v50 = vpop.permute.xlu0 %353 }
 0x405   :  { %v359_v52 = vsel %vm170_vm5, %v214_v49, %v354_v50 }
 0x406   :  { %3001 = vmatprep.mubr.msk.f32.mxu1 %vm370_vm9, %v359_v52 }
 0x408   :  { %v356_v54 = vpop.permute.xlu1 %355 }
 0x409   :  { %v360_v36 = vsel %vm170_vm5, %v215_v53, %v356_v54 }
 0x40a   :  { %3002 = vmatmul.mubr.msk.f32.vlgmr.msra.gmra.mrb[2].mxu1 %vm370_vm9, %v360_v36  ;;  %v3498_v36 = vsub.s32 3, %v3409_v26 }
 0x40b   :  { %3175 = vmatpush3.bf16.msra.mxu1 %v3172_v48 }
 0x40c   :  { %3011 = vmatprep.subr.mxu1 %v3302_v8 }
 0x4dd   :  { %v3003_v57 = vpop.f32.mrb[2].mxu1 }
 0x4de   :  { %v449_v58 = vadd.f32 %v3003_v57, %v369_v56  ;;  %v443_v59 = vpop.f32.mrb[3].mxu1  ;;  %v523_v57 = vrot.slane %v3471_v55, %v3498_v36 }
 0x4df   :  { %v444_v60 = vadd.f32 %v443_v59, %v369_v56  ;;  %v3501_v56 = vsub.s32 4, %v3409_v26 }
 0x4e0   :  { %v455_v61 = vsel %vm370_vm9, %v449_v58, 0.0 }
 0x4e1   :  { %456 = vadd.xlane.f32.xlu0 %v455_v61  ;;  %v452_v62 = vsel %vm370_vm9, %v444_v60, 0.0 }
 0x4e2   :  { %453 = vadd.xlane.f32.xlu1 %v452_v62  ;;  %v529_v62 = vrot.slane %v3471_v55, %v3501_v56  ;;  %v2851_v55 = vld [vmem:[%s3871_s7] ss:$0 sm:$0xff] }
 0x56e   :  { %v457_v63 = vpop.xlane.xlu0 %456 }
 0x56f   :  { %v460_v0 = vmul.f32 0.03125, %v457_v63  ;;  %v454_v1 = vpop.xlane.xlu1 %453 }
 0x570   :  { %v459_v2 = vmul.f32 0.03125, %v454_v1 }
 0x571   :  { %v462_v3 = vsub.f32 %v449_v58, %v460_v0 }
 0x572   :  { %v461_v4 = vsub.f32 %v444_v60, %v459_v2 }
 0x573   :  { %v464_v5 = vmul.f32 %v462_v3, %v462_v3 }
 0x574   :  { %v463_v6 = vmul.f32 %v461_v4, %v461_v4 }
 0x575   :  { %v468_v7 = vsel %vm370_vm9, %v464_v5, 0.0 }
 0x576   :  { %469 = vadd.xlane.f32.xlu1 %v468_v7  ;;  %v465_v9 = vsel %vm370_vm9, %v463_v6, 0.0 }
 0x577   :  { %466 = vadd.xlane.f32.xlu0 %v465_v9 }
 0x603   :  { %v470_v11 = vpop.xlane.xlu1 %469 }
 0x604   :  { %v472_v12 = vmul.f32 0.03125, %v470_v11  ;;  %v467_v13 = vpop.xlane.xlu0 %466 }
 0x605   :  { %v471_v15 = vmul.f32 0.03125, %v467_v13 }
 0x606   :  { %v474_v16 = vadd.f32 1e-05, %v472_v12 }
 0x607   :  { %v473_v17 = vadd.f32 1e-05, %v471_v15 }
 0x608   :  { %3245 = vrsqrt.f32 %v474_v16 }
 0x609   :  { %3247 = vrsqrt.f32 %v473_v17 }
 0x612   :  { %v3246_v19 = vpop.eup %3245 }
 0x613   :  { %v3248_v20 = vpop.eup %3247  ;;  %v478_v21 = vmul.f32 %v3246_v19, %v462_v3 }
 0x614   :  { %v477_v23 = vmul.f32 %v3248_v20, %v461_v4 }
 0x615   :  { %v484_v24 = vmul.f32 %v482_v18, %v478_v21 }
 0x616   :  { %v483_v29 = vmul.f32 %v482_v18, %v477_v23 }
 0x617   :  { %v490_v30 = vadd.f32 %v488_v22, %v484_v24 }
 0x618   :  { %v489_v31 = vadd.f32 %v488_v22, %v483_v29 }
 0x619   :  { %v493_v32 = vadd.f32 %v491_v25, %v490_v30 }
 0x61a   :  { %v492_v28 = vadd.f32 %v491_v25, %v489_v31 }
 0x61b   :  { %v497_v33 = vsel %vm370_vm9, %v493_v32, 0.0 }
 0x61c   :  { %498 = vadd.xlane.f32.xlu1 %v497_v33  ;;  %v494_v34 = vsel %vm370_vm9, %v492_v28, 0.0 }
 0x61d   :  { %495 = vadd.xlane.f32.xlu0 %v494_v34 }
 0x6a9   :  { %v499_v35 = vpop.xlane.xlu1 %498 }
 0x6aa   :  { %v501_v37 = vmul.f32 0.03125, %v499_v35  ;;  %v496_v38 = vpop.xlane.xlu0 %495 }
 0x6ab   :  { %v500_v39 = vmul.f32 0.03125, %v496_v38 }
 0x6ac   :  { %v503_v40 = vsub.f32 %v493_v32, %v501_v37 }
 0x6ad   :  { %v502_v41 = vsub.f32 %v492_v28, %v500_v39 }
 0x6ae   :  { %v505_v42 = vmul.f32 %v503_v40, %v503_v40 }
 0x6af   :  { %v504_v43 = vmul.f32 %v502_v41, %v502_v41 }
 0x6b0   :  { %v509_v44 = vsel %vm370_vm9, %v505_v42, 0.0 }
 0x6b1   :  { %510 = vadd.xlane.f32.xlu1 %v509_v44  ;;  %v506_v45 = vsel %vm370_vm9, %v504_v43, 0.0 }
 0x6b2   :  { %507 = vadd.xlane.f32.xlu0 %v506_v45 }
 0x73e   :  { %v511_v49 = vpop.xlane.xlu1 %510 }
 0x73f   :  { %v513_v50 = vmul.f32 0.03125, %v511_v49  ;;  %v508_v51 = vpop.xlane.xlu0 %507 }
 0x740   :  { %v512_v52 = vmul.f32 0.03125, %v508_v51 }
 0x741   :  { %v515_v53 = vadd.f32 1e-05, %v513_v50 }
 0x742   :  { %v514_v54 = vadd.f32 1e-05, %v512_v52 }
 0x743   :  { %3249 = vrsqrt.f32 %v515_v53 }
 0x744   :  { %3251 = vrsqrt.f32 %v514_v54 }
 0x74d   :  { %v3250_v58 = vpop.eup %3249 }
 0x74e   :  { %v3252_v59 = vpop.eup %3251  ;;  %v519_v60 = vmul.f32 %v3250_v58, %v503_v40 }
 0x74f   :  { %v518_v61 = vmul.f32 %v3252_v59, %v502_v41 }
 0x750   :  { %v525_v63 = vmul.f32 %v523_v57, %v519_v60 }
 0x751   :  { %v524_v0 = vmul.f32 %v523_v57, %v518_v61 }
 0x752   :  { %v3509_v2 = vadd.f32 %v529_v62, %v525_v63 }
 0x753   :  { %v3507_v1 = vadd.f32 %v529_v62, %v524_v0 }
 0x755   :  { %3008 = vmatprep.mubr.msk.f32.mxu1 %vm170_vm5, %v3507_v1 }
 0x756   :  { %3009 = vmatmul.mubr.msk.f32.vlgmr.msra.gmra.mrb[4].mxu1 %vm170_vm5, %v3509_v2 }
 0x757   :  { %3013 = vmatprep.mubr.msk.f32.mxu1 %vm3304_vm11, %v3302_v8 }
 0x829   :  { %v3010_v3 = vpop.f32.mrb[4].mxu1 }
 0x82a   :  { %v3522_v4 = vadd.f32 %v3010_v3, %v2851_v55  ;;  %v644_v5 = vpop.f32.mrb[5].mxu1 }
 0x82b   :  { %v3524_v6 = vadd.f32 %v2851_v55, %v644_v5 }
 0x82c   :  { %731 = vrot.lane.b32.xlu1 %v3522_v4, %s3305_s16 }
 0x82d   :  { %654 = vrot.lane.b32.xlu0 %v3524_v6, %s3305_s16 }
 0x89e   :  { %v732_v7 = vpop.permute.xlu1 %731 }
 0x89f   :  { %3017 = vmatpush3.xpose.msk.msra.mxu0 %vm46_vm0, %v732_v7  ;;  %v655_v9 = vpop.permute.xlu0 %654 }
 0x8a0   :  { %3012 = vmatpush3.xpose.msk.msra.mxu1 %vm46_vm0, %v655_v9  ;;  %3026 = vmatprep.subr.mxu0 %v3302_v8 }
 0x8a1   :  { %3021 = vmatprep.subr.mxu1 %v3302_v8 }
 0x8a2   :  { %3019 = vmatmul.mubr.msk.f32.vlgmr.msra.gmra.mrb[2].mxu0 %vm46_vm0, %v3522_v4 }
 0x8a3   :  { %3014 = vmatmul.mubr.msk.f32.vlgmr.msra.gmra.mrb[6].mxu1 %vm46_vm0, %v3524_v6  ;;  %3028 = vmatprep.mubr.msk.f32.mxu0 %vm3304_vm11, %v3302_v8 }
 0x8a4   :  { %3023 = vmatprep.mubr.msk.f32.mxu1 %vm3304_vm11, %v3302_v8 }
 0x975   :  { %v803_v11 = vpop.f32.mrb[2].mxu0 }
 0x976   :  { %v808_v12 = vmul.f32 0.35355338, %v803_v11  ;;  %v726_v13 = vpop.f32.mrb[6].mxu1  ;;  %v3020_v15 = vpop.f32.mrb[3].mxu0 }
 0x977   :  { %v807_v16 = vmul.f32 0.35355338, %v726_v13  ;;  %v3015_v17 = vpop.f32.mrb[7].mxu1 }
 0x978   :  { %v812_v18 = vsel %vm46_vm0, %v808_v12, -inf }
 0x979   :  { %813 = vmax.xlane.f32.xlu0 %v812_v18  ;;  %v809_v19 = vsel %vm46_vm0, %v807_v16, -inf }
 0x97a   :  { %810 = vmax.xlane.f32.xlu1 %v809_v19 }
 0x98b   :  { %907 = vrot.lane.b32.xlu1 %v3522_v4, %s3306_s17 }
 0x98f   :  { %831 = vrot.lane.b32.xlu0 %v3524_v6, %s3306_s17  ;;  %985 = vrot.lane.b32.xlu1 %v3524_v6, %s3307_s18 }
 0xa06   :  { %v814_v20 = vpop.xlane.xlu0 %813 }
 0xa07   :  { %v816_v21 = vsub.f32 %v808_v12, %v814_v20  ;;  %v811_v22 = vpop.xlane.xlu1 %810 }
 0xa08   :  { %v815_v23 = vsub.f32 %v807_v16, %v811_v22 }
 0xa09   :  { %v819_v24 = vmul.f32 1.442695, %v816_v21 }
 0xa0a   :  { %v817_v25 = vmul.f32 1.442695, %v815_v23  ;;  %v832_v29 = vpop.permute.xlu0 %831 }
 0xa0b   :  { %3253 = vpow2.f32 %v819_v24  ;;  %v908_v30 = vpop.permute.xlu1 %907  ;;  %3022 = vmatpush3.msra.mxu1 %v832_v29 }
 0xa0c   :  { %3255 = vpow2.f32 %v817_v25  ;;  %3027 = vmatpush3.msra.mxu0 %v908_v30  ;;  %3031 = vmatprep.subr.mxu1 %v3302_v8 }
 0xa0d   :  { %3036 = vmatprep.subr.mxu0 %v3302_v8 }
 0xa0f   :  { %v986_v34 = vpop.permute.xlu1 %985 }
 0xa15   :  { %v3254_v31 = vpop.eup %3253 }
 0xa16   :  { %v3256_v32 = vpop.eup %3255  ;;  %v824_v28 = vsel %vm46_vm0, %v3254_v31, 0.0 }
 0xa17   :  { %825 = vadd.xlane.f32.xlu1 %v824_v28  ;;  %v821_v33 = vsel %vm46_vm0, %v3256_v32, 0.0 }
 0xa18   :  { %822 = vadd.xlane.f32.xlu0 %v821_v33 }
 0xa28   :  { %983 = vrot.lane.b32.xlu1 %v3524_v6, %s3301_s27 }
 0xa2e   :  { %1063 = vrot.lane.b32.xlu0 %v3522_v4, %s3307_s18 }
 0xa32   :  { %1061 = vrot.lane.b32.xlu0 %v3522_v4, %s3301_s27 }
 0xaa4   :  { %v826_v35 = vpop.xlane.xlu1 %825 }
 0xaa5   :  { %3257 = vrcp.f32 %v826_v35  ;;  %v823_v37 = vpop.xlane.xlu0 %822 }
 0xaa6   :  { %3259 = vrcp.f32 %v823_v37 }
 0xaa8   :  { %v984_v44 = vpop.permute.xlu1 %983 }
 0xaa9   :  { %v1064_v39 = vpop.permute.xlu0 %1063 }
 0xaad   :  { %v1062_v43 = vpop.permute.xlu0 %1061 }
 0xaaf   :  { %v3258_v38 = vpop.eup %3257 }
 0xab0   :  { %v3260_v40 = vpop.eup %3259  ;;  %v830_v41 = vmul.f32 %v3258_v38, %v3254_v31  ;;  %v3601_v31 = vld [vmem:[%s3873_s12] sm:$0x3f] }
 0xab1   :  { %v828_v42 = vmul.f32 %v3260_v40, %v3256_v32  ;;  %v1328_v32 = vrot.slane %v3601_v31, %v3412_v27 }
 0xab2   :  { %3029 = vmatmul.mubr.msk.f32.vlgmr.msra.gmra.mrb[4].mxu0 %vm46_vm0, %v830_v41 }
 0xab3   :  { %3037 = vmatpush3.xpose.msk.msra.mxu0 %vm46_vm0, %v1064_v39  ;;  %3024 = vmatmul.mubr.msk.f32.vlgmr.msra.gmra.mrb[8].mxu1 %vm46_vm0, %v828_v42 }
 0xab4   :  { %3032 = vmatpush3.xpose.msk.msra.mxu1 %vm46_vm0, %v986_v34  ;;  %3038 = vmatprep.mubr.msk.f32.mxu0 %vm3304_vm11, %v3302_v8 }
 0xab5   :  { %3033 = vmatprep.mubr.msk.f32.mxu1 %vm3304_vm11, %v3302_v8  ;;  %3046 = vmatprep.subr.mxu0 %v3302_v8 }
 0xab6   :  { %3039 = vmatmul.mubr.msk.f32.vlgmr.msra.gmra.mrb[6].mxu0 %vm46_vm0, %v1062_v43  ;;  %3041 = vmatprep.subr.mxu1 %v3302_v8 }
 0xab7   :  { %3034 = vmatmul.mubr.msk.f32.vlgmr.msra.gmra.mrb[10].mxu1 %vm46_vm0, %v984_v44  ;;  %3048 = vmatprep.mubr.msk.f32.mxu0 %vm3304_vm11, %v3302_v8 }
 0xab8   :  { %3043 = vmatprep.mubr.msk.f32.mxu1 %vm3304_vm11, %v3302_v8 }
 0xb85   :  { %v979_v45 = vpop.f32.mrb[4].mxu0 }
 0xb86   :  { %v903_v46 = vpop.f32.mrb[8].mxu1  ;;  %v3030_v47 = vpop.f32.mrb[5].mxu0 }
 0xb87   :  { %v3025_v48 = vpop.f32.mrb[9].mxu1 }
 0xb89   :  { %v1135_v49 = vpop.f32.mrb[6].mxu0 }
 0xb8a   :  { %v1140_v50 = vmul.f32 0.35355338, %v1135_v49  ;;  %v1057_v51 = vpop.f32.mrb[10].mxu1  ;;  %v3040_v52 = vpop.f32.mrb[7].mxu0 }
 0xb8b   :  { %v1139_v53 = vmul.f32 0.35355338, %v1057_v51  ;;  %v3035_v54 = vpop.f32.mrb[11].mxu1  ;;  %v542_v51 = vld [vmem:[%s3874_s9] sm:$0xff]  ;;  %v543_v52 = vld [vmem:[%s3874_s9 + $0x8] sm:$0xff] }
 0xb8c   :  { %v1144_v57 = vsel %vm46_vm0, %v1140_v50, -inf  ;;  %v534_v54 = vld [vmem:[%s3870_s6 + $0x10] sm:$0xff] }
 0xb8d   :  { %1145 = vmax.xlane.f32.xlu0 %v1144_v57  ;;  %v1141_v58 = vsel %vm46_vm0, %v1139_v53, -inf  ;;  %v535_v57 = vld [vmem:[%s3870_s6 + $0x18] sm:$0xff] }
 0xb8e   :  { %1142 = vmax.xlane.f32.xlu1 %v1141_v58  ;;  %v3200_v58 = vpack.c.bf16 %v535_v57, %v534_v54 }
 0xc1a   :  { %v1146_v59 = vpop.xlane.xlu0 %1145 }
 0xc1b   :  { %v1148_v60 = vsub.f32 %v1140_v50, %v1146_v59  ;;  %v1143_v61 = vpop.xlane.xlu1 %1142  ;;  %v548_v59 = vld [vmem:[%s3875_s11] sm:$0xff] }
 0xc1c   :  { %v1147_v62 = vsub.f32 %v1139_v53, %v1143_v61  ;;  %v3180_v53 = vpack.c.bf16 %v543_v52, %v542_v51  ;;  %v550_v61 = vld [vmem:[%s3875_s11 + $0x10] sm:$0xff] }
 0xc1d   :  { %v1151_v63 = vmul.f32 1.442695, %v1148_v60  ;;  %v549_v60 = vld [vmem:[%s3875_s11 + $0x8] sm:$0xff] }
 0xc1e   :  { %v1149_v0 = vmul.f32 1.442695, %v1147_v62  ;;  %v3184_v62 = vpack.c.bf16 %v549_v60, %v548_v59 }
 0xc1f   :  { %3261 = vpow2.f32 %v1151_v63  ;;  %v551_v63 = vld [vmem:[%s3875_s11 + $0x18] sm:$0xff] }
 0xc20   :  { %3263 = vpow2.f32 %v1149_v0  ;;  %v3188_v0 = vpack.c.bf16 %v551_v63, %v550_v61 }
 0xc29   :  { %v3262_v55 = vpop.eup %3261 }
 0xc2a   :  { %v3264_v3 = vpop.eup %3263  ;;  %v1156_v5 = vsel %vm46_vm0, %v3262_v55, 0.0 }
 0xc2b   :  { %1157 = vadd.xlane.f32.xlu1 %v1156_v5  ;;  %v1153_v7 = vsel %vm46_vm0, %v3264_v3, 0.0 }
 0xc2c   :  { %1154 = vadd.xlane.f32.xlu0 %v1153_v7 }
 0xc3c   :  { %1239 = vrot.lane.b32.xlu1 %v3522_v4, %s3308_s2  ;;  %v538_v4 = vld [vmem:[%s3872_s8] sm:$0xff] }
 0xc42   :  { %1163 = vrot.lane.b32.xlu0 %v3524_v6, %s3308_s2  ;;  %v539_v6 = vld [vmem:[%s3872_s8 + $0x8] sm:$0xff] }
 0xc43   :  { %v3176_v19 = vpack.c.bf16 %v539_v6, %v538_v4 }
 0xcb8   :  { %v1158_v9 = vpop.xlane.xlu1 %1157 }
 0xcb9   :  { %3265 = vrcp.f32 %v1158_v9  ;;  %v1155_v11 = vpop.xlane.xlu0 %1154 }
 0xcba   :  { %3267 = vrcp.f32 %v1155_v11 }
 0xcbc   :  { %v1240_v12 = vpop.permute.xlu1 %1239 }
 0xcbd   :  { %3047 = vmatpush3.msra.mxu0 %v1240_v12  ;;  %v1164_v13 = vpop.permute.xlu0 %1163 }
 0xcbe   :  { %3042 = vmatpush3.msra.mxu1 %v1164_v13  ;;  %3181 = vmatprep.subr.bf16.mxu0 %v3180_v53 }
 0xcbf   :  { %3177 = vmatprep.subr.bf16.mxu1 %v3176_v19 }
 0xcc3   :  { %v3266_v15 = vpop.eup %3265 }
 0xcc4   :  { %v3268_v16 = vpop.eup %3267  ;;  %v1162_v17 = vmul.f32 %v3266_v15, %v3262_v55  ;;  %v552_v55 = vld [vmem:[%s3875_s11 + $0x20] sm:$0xff] }
 0xcc5   :  { %v1160_v18 = vmul.f32 %v3268_v16, %v3264_v3  ;;  %v553_v3 = vld [vmem:[%s3875_s11 + $0x28] sm:$0xff]  ;;  %v1441_v16 = vrot.slane %v3601_v31, %v3443_v10 }
 0xcc6   :  { %3049 = vmatmul.mubr.msk.f32.vlgmr.msra.gmra.mrb[8].mxu0 %vm46_vm0, %v1162_v17  ;;  %v3192_v5 = vpack.c.bf16 %v553_v3, %v552_v55 }
 0xcc7   :  { %3044 = vmatmul.mubr.msk.f32.vlgmr.msra.gmra.mrb[12].mxu1 %vm46_vm0, %v1160_v18  ;;  %3183 = vmatpush3.bf16.msra.mxu0 %v3180_v53 }
 0xcc8   :  { %3179 = vmatpush3.bf16.msra.mxu1 %v3176_v19  ;;  %3201 = vmatprep.subr.bf16.mxu0 %v3200_v58  ;;  %v1447_v19 = vrot.slane %v3601_v31, %v3452_v14 }
 0xcc9   :  { %3185 = vmatprep.subr.bf16.mxu1 %v3184_v62 }
 0xd99   :  { %v1311_v20 = vpop.f32.mrb[8].mxu0 }
 0xd9a   :  { %v1235_v21 = vpop.f32.mrb[12].mxu1  ;;  %1319 = vrot.lane.b32.xlu0 %v1311_v20, %s3309_s23  ;;  %v3050_v22 = vpop.f32.mrb[9].mxu0 }
 0xd9b   :  { %1317 = vrot.lane.b32.xlu1 %v1235_v21, %s3309_s23  ;;  %v3045_v23 = vpop.f32.mrb[13].mxu1 }
 0xe0c   :  { %v1320_v24 = vpop.permute.xlu0 %1319 }
 0xe0d   :  { %v1318_v25 = vpop.permute.xlu1 %1317  ;;  %v1324_v30 = vsel %vm46_vm0, %v979_v45, %v1320_v24 }
 0xe0e   :  { %v1323_v29 = vsel %vm46_vm0, %v903_v46, %v1318_v25 }
 0xe0f   :  { %3055 = vmatprep.mubr.msk.f32.mxu1 %vm170_vm5, %v1323_v29  ;;  %v554_v29 = vld [vmem:[%s3875_s11 + $0x30] sm:$0xff] }
 0xe10   :  { %3056 = vmatmul.mubr.msk.f32.vlgmr.msra.gmra.mrb[14].mxu1 %vm170_vm5, %v1324_v30  ;;  %v555_v30 = vld [vmem:[%s3875_s11 + $0x38] sm:$0xff] }
 0xe11   :  { %3187 = vmatpush3.bf16.msra.mxu1 %v3184_v62 }
 0xe12   :  { %3189 = vmatprep.subr.bf16.mxu1 %v3188_v0 }
 0xe15   :  { %3191 = vmatpush3.bf16.msra.mxu1 %v3188_v0 }
 0xe16   :  { %3193 = vmatprep.subr.bf16.mxu1 %v3192_v5 }
 0xe19   :  { %3195 = vmatpush3.bf16.msra.mxu1 %v3192_v5 }
 0xee3   :  { %v3057_v28 = vpop.f32.mrb[14].mxu1 }
 0xee4   :  { %v1407_v33 = vadd.f32 %v3057_v28, %v1328_v32  ;;  %v1401_v34 = vpop.f32.mrb[15].mxu1  ;;  %v2868_v28 = vld [vmem:[%s3876_s10] ss:$0 sm:$0xff] }
 0xee5   :  { %v1402_v35 = vadd.f32 %v1401_v34, %v1328_v32  ;;  %v3196_v32 = vpack.c.bf16 %v555_v30, %v554_v29 }
 0xee6   :  { %v1411_v37 = vadd.f32 %v1407_v33, %v3509_v2 }
 0xee7   :  { %v1410_v38 = vadd.f32 %v1402_v35, %v3507_v1  ;;  %3197 = vmatprep.subr.bf16.mxu1 %v3196_v32 }
 0xee8   :  { %v1415_v39 = vsel %vm170_vm5, %v1411_v37, 0.0  ;;  %3199 = vmatpush3.bf16.msra.mxu1 %v3196_v32 }
 0xee9   :  { %1416 = vadd.xlane.f32.xlu0 %v1415_v39  ;;  %v1412_v40 = vsel %vm170_vm5, %v1410_v38, 0.0  ;;  %3106 = vmatprep.subr.mxu1 %v3302_v8 }
 0xeea   :  { %1413 = vadd.xlane.f32.xlu1 %v1412_v40 }
 0xf76   :  { %v1417_v41 = vpop.xlane.xlu0 %1416 }
 0xf77   :  { %v1419_v42 = vmul.f32 0.0625, %v1417_v41  ;;  %v1414_v43 = vpop.xlane.xlu1 %1413 }
 0xf78   :  { %v1418_v44 = vmul.f32 0.0625, %v1414_v43 }
 0xf79   :  { %v1421_v45 = vsub.f32 %v1411_v37, %v1419_v42 }
 0xf7a   :  { %v1420_v46 = vsub.f32 %v1410_v38, %v1418_v44  ;;  %v2873_v38 = vld [vmem:[%s3871_s7 + $0x1] ss:$0 sm:$0xff] }
 0xf7b   :  { %v1423_v47 = vmul.f32 %v1421_v45, %v1421_v45 }
 0xf7c   :  { %v1422_v48 = vmul.f32 %v1420_v46, %v1420_v46 }
 0xf7d   :  { %v1427_v49 = vsel %vm170_vm5, %v1423_v47, 0.0 }
 0xf7e   :  { %1428 = vadd.xlane.f32.xlu1 %v1427_v49  ;;  %v1424_v50 = vsel %vm170_vm5, %v1422_v48, 0.0 }
 0xf7f   :  { %1425 = vadd.xlane.f32.xlu0 %v1424_v50 }
 0xf8f   :  { %1673 = vrot.lane.b32.xlu1 %v3509_v2, %s3305_s16 }
 0xf95   :  { %1671 = vrot.lane.b32.xlu0 %v3507_v1, %s3305_s16 }
0x100b   :  { %v1429_v7 = vpop.xlane.xlu1 %1428 }
0x100c   :  { %v1431_v9 = vmul.f32 0.0625, %v1429_v7  ;;  %v1426_v11 = vpop.xlane.xlu0 %1425 }
0x100d   :  { %v1430_v12 = vmul.f32 0.0625, %v1426_v11 }
0x100e   :  { %v1433_v13 = vadd.f32 1e-05, %v1431_v9 }
0x100f   :  { %v1432_v15 = vadd.f32 1e-05, %v1430_v12  ;;  %v1674_v25 = vpop.permute.xlu1 %1673 }
0x1010   :  { %3269 = vrsqrt.f32 %v1433_v13  ;;  %v1672_v24 = vpop.permute.xlu0 %1671 }
0x1011   :  { %3271 = vrsqrt.f32 %v1432_v15 }
0x101a   :  { %v3270_v17 = vpop.eup %3269 }
0x101b   :  { %v3272_v18 = vpop.eup %3271  ;;  %v1437_v4 = vmul.f32 %v3270_v17, %v1421_v45 }
0x101c   :  { %v1436_v6 = vmul.f32 %v3272_v18, %v1420_v46 }
0x101d   :  { %v1443_v20 = vmul.f32 %v1441_v16, %v1437_v4 }
0x101e   :  { %v1442_v21 = vmul.f32 %v1441_v16, %v1436_v6 }
0x101f   :  { %v3651_v23 = vadd.f32 %v1447_v19, %v1443_v20 }
0x1020   :  { %v3649_v22 = vadd.f32 %v1447_v19, %v1442_v21 }
0x1022   :  { %3062 = vmatprep.mubr.msk.f32.mxu0 %vm170_vm5, %v3649_v22 }
0x1023   :  { %3063 = vmatmul.mubr.msk.f32.vlgmr.msra.gmra.mrb[10].mxu0 %vm170_vm5, %v3651_v23 }
0x1024   :  { %3203 = vmatpush3.bf16.msra.mxu0 %v3200_v58  ;;  %3088 = vmatprep.mubr.msk.f32.mxu0 %vm170_vm5, %v1672_v24 }
0x1025   :  { %3091 = vmatprep.subr.mxu0 %v3302_v8 }
0x1027   :  { %3089 = vmatmul.mubr.msk.f32.vlgmr.msra.gmra.mrb[12].mxu0 %vm170_vm5, %v1674_v25 }
0x1028   :  { %3093 = vmatprep.mubr.msk.f32.mxu0 %vm3304_vm11, %v3302_v8 }
0x10f6   :  { %v3064_v33 = vpop.f32.mrb[10].mxu0 }
0x10f7   :  { %v1534_v34 = vadd.f32 %v3064_v33, %v2868_v28  ;;  %v1528_v35 = vpop.f32.mrb[11].mxu0 }
0x10f8   :  { %v1529_v37 = vadd.f32 %v2868_v28, %v1528_v35 }
0x10f9   :  { %v1538_v41 = vmax.f32 %v1534_v34, 0.0 }
0x10fa   :  { %v1537_v39 = vmax.f32 %v1529_v37, 0.0  ;;  %v3090_v40 = vpop.f32.mrb[12].mxu0 }
0x10fb   :  { %v3675_v42 = vadd.f32 %v3090_v40, %v2873_v38  ;;  %v1745_v43 = vpop.f32.mrb[13].mxu0 }
0x10fc   :  { %v3677_v44 = vadd.f32 %v2873_v38, %v1745_v43  ;;  %3081 = vmatprep.mubr.msk.f32.mxu1 %vm1543_vm12, %v1537_v39 }
0x10fd   :  { %1832 = vrot.lane.b32.xlu0 %v3675_v42, %s3305_s16  ;;  %3082 = vmatmul.mubr.msk.f32.vlgmr.msra.gmra.mrb[16].mxu1 %vm1543_vm12, %v1538_v41 }
0x10fe   :  { %1755 = vrot.lane.b32.xlu1 %v3677_v44, %s3305_s16  ;;  %3108 = vmatprep.mubr.msk.f32.mxu1 %vm3304_vm11, %v3302_v8 }
0x116f   :  { %v1833_v46 = vpop.permute.xlu0 %1832 }
0x1170   :  { %v1756_v45 = vpop.permute.xlu1 %1755 }
0x1171   :  { %3092 = vmatpush3.xpose.msk.msra.mxu0 %vm46_vm0, %v1756_v45 }
0x1172   :  { %3096 = vmatprep.subr.mxu0 %v3302_v8 }
0x1174   :  { %3094 = vmatmul.mubr.msk.f32.vlgmr.msra.gmra.mrb[14].mxu0 %vm46_vm0, %v3677_v44 }
0x1175   :  { %3097 = vmatpush3.xpose.msk.msra.mxu0 %vm46_vm0, %v1833_v46  ;;  %3098 = vmatprep.mubr.msk.f32.mxu0 %vm3304_vm11, %v3302_v8 }
0x1176   :  { %3101 = vmatprep.subr.mxu0 %v3302_v8 }
0x1178   :  { %3099 = vmatmul.mubr.msk.f32.vlgmr.msra.gmra.mrb[16].mxu0 %vm46_vm0, %v3675_v42 }
0x1179   :  { %3103 = vmatprep.mubr.msk.f32.mxu0 %vm3304_vm11, %v3302_v8 }
0x11d0   :  { %v3699_v47 = vpop.f32.mrb[16].mxu1 }
0x11d1   :  { %v3701_v48 = vpop.f32.mrb[17].mxu1 }
0x1247   :  { %v1827_v49 = vpop.f32.mrb[14].mxu0 }
0x1248   :  { %v1908_v50 = vmul.f32 0.35355338, %v1827_v49  ;;  %v3095_v51 = vpop.f32.mrb[15].mxu0 }
0x124a   :  { %v1910_v52 = vsel %vm46_vm0, %v1908_v50, -inf }
0x124b   :  { %1911 = vmax.xlane.f32.xlu1 %v1910_v52  ;;  %v1904_v53 = vpop.f32.mrb[16].mxu0 }
0x124c   :  { %v1909_v54 = vmul.f32 0.35355338, %v1904_v53  ;;  %v3100_v57 = vpop.f32.mrb[17].mxu0 }
0x124e   :  { %v1913_v58 = vsel %vm46_vm0, %v1909_v54, -inf }
0x124f   :  { %1914 = vmax.xlane.f32.xlu0 %v1913_v58 }
0x125c   :  { %2008 = vrot.lane.b32.xlu1 %v3675_v42, %s3306_s17 }
0x1260   :  { %2086 = vrot.lane.b32.xlu1 %v3677_v44, %s3307_s18 }
0x1265   :  { %1932 = vrot.lane.b32.xlu0 %v3677_v44, %s3306_s17 }
0x12d8   :  { %v1912_v59 = vpop.xlane.xlu1 %1911 }
0x12d9   :  { %v1916_v60 = vsub.f32 %v1908_v50, %v1912_v59 }
0x12db   :  { %v1918_v61 = vmul.f32 1.442695, %v1916_v60 }
0x12dc   :  { %v2009_v62 = vpop.permute.xlu1 %2008  ;;  %v1915_v63 = vpop.xlane.xlu0 %1914 }
0x12dd   :  { %3273 = vpow2.f32 %v1918_v61  ;;  %v1917_v0 = vsub.f32 %v1909_v54, %v1915_v63  ;;  %3107 = vmatpush3.msra.mxu1 %v2009_v62 }
0x12de   :  { %3116 = vmatprep.subr.mxu1 %v3302_v8 }
0x12df   :  { %v1920_v55 = vmul.f32 1.442695, %v1917_v0 }
0x12e0   :  { %v1933_v3 = vpop.permute.xlu0 %1932  ;;  %v2087_v12 = vpop.permute.xlu1 %2086 }
0x12e1   :  { %3275 = vpow2.f32 %v1920_v55  ;;  %3102 = vmatpush3.msra.mxu0 %v1933_v3 }
0x12e2   :  { %3111 = vmatprep.subr.mxu0 %v3302_v8 }
0x12e7   :  { %v3274_v5 = vpop.eup %3273 }
0x12e8   :  { %v1922_v7 = vsel %vm46_vm0, %v3274_v5, 0.0 }
0x12e9   :  { %1923 = vadd.xlane.f32.xlu0 %v1922_v7 }
0x12eb   :  { %v3276_v9 = vpop.eup %3275 }
0x12ec   :  { %v1925_v11 = vsel %vm46_vm0, %v3276_v9, 0.0 }
0x12ed   :  { %1926 = vadd.xlane.f32.xlu1 %v1925_v11 }
0x12fe   :  { %2084 = vrot.lane.b32.xlu1 %v3677_v44, %s3301_s27 }
0x12ff   :  { %2164 = vrot.lane.b32.xlu0 %v3675_v42, %s3307_s18 }
0x1303   :  { %2162 = vrot.lane.b32.xlu0 %v3675_v42, %s3301_s27 }
0x1376   :  { %v1924_v13 = vpop.xlane.xlu0 %1923 }
0x1377   :  { %3277 = vrcp.f32 %v1924_v13 }
0x137a   :  { %v1927_v15 = vpop.xlane.xlu1 %1926  ;;  %v2165_v4 = vpop.permute.xlu0 %2164 }
0x137b   :  { %3279 = vrcp.f32 %v1927_v15 }
0x137e   :  { %v2085_v19 = vpop.permute.xlu1 %2084  ;;  %v2163_v20 = vpop.permute.xlu0 %2162 }
0x1381   :  { %v3278_v16 = vpop.eup %3277 }
0x1382   :  { %v1929_v17 = vmul.f32 %v3278_v16, %v3274_v5 }
0x1384   :  { %3104 = vmatmul.mubr.msk.f32.vlgmr.msra.gmra.mrb[18].mxu0 %vm46_vm0, %v1929_v17 }
0x1385   :  { %v3280_v18 = vpop.eup %3279  ;;  %3112 = vmatpush3.xpose.msk.msra.mxu0 %vm46_vm0, %v2087_v12  ;;  %3113 = vmatprep.mubr.msk.f32.mxu0 %vm3304_vm11, %v3302_v8  ;;  %v3762_v12 = vld [vmem:[%s3873_s12 + $0x8] sm:$0x3f] }
0x1386   :  { %v1931_v6 = vmul.f32 %v3280_v18, %v3276_v9  ;;  %3121 = vmatprep.subr.mxu0 %v3302_v8  ;;  %v2429_v13 = vrot.slane %v3762_v12, %v3412_v27 }
0x1388   :  { %3109 = vmatmul.mubr.msk.f32.vlgmr.msra.gmra.mrb[18].mxu1 %vm46_vm0, %v1931_v6  ;;  %3114 = vmatmul.mubr.msk.f32.vlgmr.msra.gmra.mrb[20].mxu0 %vm46_vm0, %v2085_v19 }
0x1389   :  { %3117 = vmatpush3.xpose.msk.msra.mxu1 %vm46_vm0, %v2165_v4  ;;  %3118 = vmatprep.mubr.msk.f32.mxu1 %vm3304_vm11, %v3302_v8 }
0x138a   :  { %3126 = vmatprep.subr.mxu1 %v3302_v8  ;;  %3123 = vmatprep.mubr.msk.f32.mxu0 %vm3304_vm11, %v3302_v8 }
0x138c   :  { %3119 = vmatmul.mubr.msk.f32.vlgmr.msra.gmra.mrb[20].mxu1 %vm46_vm0, %v2163_v20 }
0x138d   :  { %3128 = vmatprep.mubr.msk.f32.mxu1 %vm3304_vm11, %v3302_v8 }
0x1457   :  { %v2004_v21 = vpop.f32.mrb[18].mxu0 }
0x1458   :  { %v3105_v24 = vpop.f32.mrb[19].mxu0 }
0x145b   :  { %v2080_v25 = vpop.f32.mrb[18].mxu1  ;;  %v2158_v29 = vpop.f32.mrb[20].mxu0 }
0x145c   :  { %v2240_v30 = vmul.f32 0.35355338, %v2158_v29  ;;  %v3110_v32 = vpop.f32.mrb[19].mxu1  ;;  %v3115_v28 = vpop.f32.mrb[21].mxu0 }
0x145e   :  { %v2242_v33 = vsel %vm46_vm0, %v2240_v30, -inf }
0x145f   :  { %2243 = vmax.xlane.f32.xlu1 %v2242_v33  ;;  %v2236_v34 = vpop.f32.mrb[20].mxu1 }
0x1460   :  { %v2241_v35 = vmul.f32 0.35355338, %v2236_v34  ;;  %v3120_v37 = vpop.f32.mrb[21].mxu1 }
0x1462   :  { %v2245_v38 = vsel %vm46_vm0, %v2241_v35, -inf }
0x1463   :  { %2246 = vmax.xlane.f32.xlu0 %v2245_v38 }
0x14ec   :  { %v2244_v39 = vpop.xlane.xlu1 %2243 }
0x14ed   :  { %v2248_v40 = vsub.f32 %v2240_v30, %v2244_v39 }
0x14ef   :  { %v2250_v41 = vmul.f32 1.442695, %v2248_v40  ;;  %v2576_v40 = vrot.slane %v3762_v12, %v3452_v14 }
0x14f0   :  { %v2247_v8 = vpop.xlane.xlu0 %2246 }
0x14f1   :  { %3281 = vpow2.f32 %v2250_v41  ;;  %v2249_v43 = vsub.f32 %v2241_v35, %v2247_v8  ;;  %v2566_v41 = vrot.slane %v3762_v12, %v3443_v10  ;;  %v544_v8 = vld [vmem:[%s3874_s9 + $0x10] sm:$0xff] }
0x14f3   :  { %v2252_v45 = vmul.f32 1.442695, %v2249_v43  ;;  %v545_v43 = vld [vmem:[%s3874_s9 + $0x18] sm:$0xff] }
0x14f5   :  { %3283 = vpow2.f32 %v2252_v45  ;;  %v3208_v45 = vpack.c.bf16 %v545_v43, %v544_v8 }
0x14fb   :  { %v3282_v46 = vpop.eup %3281 }
0x14fc   :  { %v2254_v49 = vsel %vm46_vm0, %v3282_v46, 0.0 }
0x14fd   :  { %2255 = vadd.xlane.f32.xlu0 %v2254_v49 }
0x14ff   :  { %v3284_v50 = vpop.eup %3283 }
0x1500   :  { %v2257_v51 = vsel %vm46_vm0, %v3284_v50, 0.0 }
0x1501   :  { %2258 = vadd.xlane.f32.xlu1 %v2257_v51 }
0x1512   :  { %2340 = vrot.lane.b32.xlu1 %v3675_v42, %s3308_s2  ;;  %v540_v42 = vld [vmem:[%s3872_s8 + $0x10] sm:$0xff] }
0x1513   :  { %2264 = vrot.lane.b32.xlu0 %v3677_v44, %s3308_s2  ;;  %v541_v44 = vld [vmem:[%s3872_s8 + $0x18] sm:$0xff] }
0x1514   :  { %v3204_v62 = vpack.c.bf16 %v541_v44, %v540_v42 }
0x158a   :  { %v2256_v52 = vpop.xlane.xlu0 %2255 }
0x158b   :  { %3285 = vrcp.f32 %v2256_v52  ;;  %v556_v52 = vld [vmem:[%s3875_s11 + $0x40] sm:$0xff] }
0x158e   :  { %v2259_v53 = vpop.xlane.xlu1 %2258  ;;  %v2265_v54 = vpop.permute.xlu0 %2264 }
0x158f   :  { %3287 = vrcp.f32 %v2259_v53  ;;  %3122 = vmatpush3.msra.mxu0 %v2265_v54  ;;  %v557_v53 = vld [vmem:[%s3875_s11 + $0x48] sm:$0xff]  ;;  %v558_v54 = vld [vmem:[%s3875_s11 + $0x50] sm:$0xff] }
0x1590   :  { %3205 = vmatprep.subr.bf16.mxu0 %v3204_v62 }
0x1592   :  { %v2341_v57 = vpop.permute.xlu1 %2340 }
0x1593   :  { %3127 = vmatpush3.msra.mxu1 %v2341_v57  ;;  %v3212_v57 = vpack.c.bf16 %v557_v53, %v556_v52 }
0x1594   :  { %3209 = vmatprep.subr.bf16.mxu1 %v3208_v45 }
0x1595   :  { %v3286_v58 = vpop.eup %3285 }
0x1596   :  { %v2261_v59 = vmul.f32 %v3286_v58, %v3282_v46  ;;  %v559_v58 = vld [vmem:[%s3875_s11 + $0x58] sm:$0xff] }
0x1598   :  { %3124 = vmatmul.mubr.msk.f32.vlgmr.msra.gmra.mrb[22].mxu0 %vm46_vm0, %v2261_v59  ;;  %v3216_v59 = vpack.c.bf16 %v559_v58, %v558_v54 }
0x1599   :  { %v3288_v60 = vpop.eup %3287  ;;  %3207 = vmatpush3.bf16.msra.mxu0 %v3204_v62 }
0x159a   :  { %v2263_v61 = vmul.f32 %v3288_v60, %v3284_v50  ;;  %v560_v60 = vld [vmem:[%s3875_s11 + $0x60] sm:$0xff]  ;;  %3213 = vmatprep.subr.bf16.mxu0 %v3212_v57 }
0x159c   :  { %3129 = vmatmul.mubr.msk.f32.vlgmr.msra.gmra.mrb[22].mxu1 %vm46_vm0, %v2263_v61  ;;  %v561_v61 = vld [vmem:[%s3875_s11 + $0x68] sm:$0xff] }
0x159d   :  { %3211 = vmatpush3.bf16.msra.mxu1 %v3208_v45 }
0x166b   :  { %v2336_v63 = vpop.f32.mrb[22].mxu0 }
0x166c   :  { %2418 = vrot.lane.b32.xlu1 %v2336_v63, %s3309_s23  ;;  %v3125_v0 = vpop.f32.mrb[23].mxu0 }
0x166d   :  { %v3220_v0 = vpack.c.bf16 %v561_v61, %v560_v60 }
0x166f   :  { %v2412_v55 = vpop.f32.mrb[22].mxu1 }
0x1670   :  { %2420 = vrot.lane.b32.xlu0 %v2412_v55, %s3309_s23  ;;  %v3130_v3 = vpop.f32.mrb[23].mxu1 }
0x16de   :  { %v2419_v5 = vpop.permute.xlu1 %2418 }
0x16df   :  { %v2424_v7 = vsel %vm46_vm0, %v2004_v21, %v2419_v5 }
0x16e0   :  { %3135 = vmatprep.mubr.msk.f32.mxu0 %vm170_vm5, %v2424_v7 }
0x16e2   :  { %v2421_v9 = vpop.permute.xlu0 %2420 }
0x16e3   :  { %v2425_v11 = vsel %vm46_vm0, %v2080_v25, %v2421_v9 }
0x16e4   :  { %3136 = vmatmul.mubr.msk.f32.vlgmr.msra.gmra.mrb[24].mxu0 %vm170_vm5, %v2425_v11 }
0x16e5   :  { %3215 = vmatpush3.bf16.msra.mxu0 %v3212_v57 }
0x16e6   :  { %3217 = vmatprep.subr.bf16.mxu0 %v3216_v59 }
0x16e9   :  { %3219 = vmatpush3.bf16.msra.mxu0 %v3216_v59 }
0x16ea   :  { %3221 = vmatprep.subr.bf16.mxu0 %v3220_v0 }
0x16ed   :  { %3223 = vmatpush3.bf16.msra.mxu0 %v3220_v0 }
0x17b7   :  { %v3137_v15 = vpop.f32.mrb[24].mxu0 }
0x17b8   :  { %v2508_v16 = vadd.f32 %v3137_v15, %v2429_v13  ;;  %v2502_v17 = vpop.f32.mrb[25].mxu0 }
0x17b9   :  { %v2503_v18 = vadd.f32 %v2502_v17, %v2429_v13  ;;  %v563_v17 = vld [vmem:[%s3875_s11 + $0x78] sm:$0xff] }
0x17ba   :  { %2515 = vrot.lane.b32.xlu0 %v2508_v16, %s3303_s3  ;;  %v562_v16 = vld [vmem:[%s3875_s11 + $0x70] sm:$0xff] }
0x17bb   :  { %2513 = vrot.lane.b32.xlu1 %v2503_v18, %s3303_s3  ;;  %v3224_v18 = vpack.c.bf16 %v563_v17, %v562_v16 }
0x17bd   :  { %3225 = vmatprep.subr.bf16.mxu0 %v3224_v18 }
0x17be   :  { %3227 = vmatpush3.bf16.msra.mxu0 %v3224_v18 }
0x182c   :  { %v2516_v4 = vpop.permute.xlu0 %2515 }
0x182d   :  { %v2520_v6 = vadd.f32 %v2516_v4, %v3509_v2  ;;  %v2514_v19 = vpop.permute.xlu1 %2513  ;;  %v2890_v4 = vld [vmem:[%s3876_s10 + $0x1] ss:$0 sm:$0xff] }
0x182e   :  { %v2519_v20 = vadd.f32 %v2514_v19, %v3507_v1 }
0x182f   :  { %2525 = vrot.lane.b32.xlu0 %v2520_v6, %s3305_s16 }
0x1830   :  { %2523 = vrot.lane.b32.xlu1 %v2519_v20, %s3305_s16 }
0x18a1   :  { %v2526_v21 = vpop.permute.xlu0 %2525 }
0x18a2   :  { %v2524_v27 = vpop.permute.xlu1 %2523  ;;  %v2532_v24 = vsel %vm170_vm5, %v2526_v21, 0.0 }
0x18a3   :  { %2533 = vadd.xlane.f32.xlu0 %v2532_v24  ;;  %v2529_v25 = vsel %vm170_vm5, %v2524_v27, 0.0 }
0x18a4   :  { %2530 = vadd.xlane.f32.xlu1 %v2529_v25  ;;  %v2679_v25 = vrot.slane %v3762_v12, %v3498_v36 }
0x1930   :  { %v2534_v29 = vpop.xlane.xlu0 %2533 }
0x1931   :  { %v2536_v30 = vmul.f32 0.0625, %v2534_v29  ;;  %v2531_v32 = vpop.xlane.xlu1 %2530 }
0x1932   :  { %v2535_v28 = vmul.f32 0.0625, %v2531_v32 }
0x1933   :  { %v2538_v2 = vsub.f32 %v2520_v6, %v2536_v30 }
0x1934   :  { %v2537_v33 = vsub.f32 %v2519_v20, %v2535_v28 }
0x1935   :  { %v2540_v34 = vmul.f32 %v2538_v2, %v2538_v2 }
0x1936   :  { %v2539_v1 = vmul.f32 %v2537_v33, %v2537_v33 }
0x1937   :  { %2545 = vrot.lane.b32.xlu1 %v2540_v34, %s3305_s16 }
0x1938   :  { %2543 = vrot.lane.b32.xlu0 %v2539_v1, %s3305_s16 }
0x19a9   :  { %v2546_v35 = vpop.permute.xlu1 %2545 }
0x19aa   :  { %v2544_v37 = vpop.permute.xlu0 %2543  ;;  %v2552_v38 = vsel %vm170_vm5, %v2546_v35, 0.0  ;;  %v1542_v35 = vrot.slane %v3601_v31, %v3498_v36 }
0x19ab   :  { %2553 = vadd.xlane.f32.xlu0 %v2552_v38  ;;  %v2549_v39 = vsel %vm170_vm5, %v2544_v37, 0.0 }
0x19ac   :  { %2550 = vadd.xlane.f32.xlu1 %v2549_v39  ;;  %v1617_v37 = vadd.f32 %v3701_v48, %v1542_v35  ;;  %v1622_v38 = vadd.f32 %v3699_v47, %v1542_v35 }
0x19ae   :  { %v1625_v8 = vadd.f32 %v1617_v37, %v3649_v22  ;;  %v1626_v45 = vadd.f32 %v1622_v38, %v3651_v23 }
0x19b0   :  { %v1630_v36 = vsel %vm170_vm5, %v1626_v45, 0.0 }
0x19bd   :  { %2578 = vrot.lane.b32.xlu1 %v2576_v40, %s3303_s3 }
0x19c1   :  { %2568 = vrot.lane.b32.xlu0 %v2566_v41, %s3303_s3 }
0x1a38   :  { %v2554_v46 = vpop.xlane.xlu0 %2553 }
0x1a39   :  { %v2556_v14 = vmul.f32 0.0625, %v2554_v46  ;;  %v2551_v49 = vpop.xlane.xlu1 %2550  ;;  %v1627_v46 = vsel %vm170_vm5, %v1625_v8, 0.0 }
0x1a3a   :  { %v2555_v50 = vmul.f32 0.0625, %v2551_v49 }
0x1a3b   :  { %v2558_v10 = vadd.f32 1e-05, %v2556_v14 }
0x1a3c   :  { %v2557_v51 = vadd.f32 1e-05, %v2555_v50  ;;  %v2569_v44 = vpop.permute.xlu0 %2568 }
0x1a3d   :  { %3289 = vrsqrt.f32 %v2558_v10  ;;  %v2579_v3 = vpop.permute.xlu1 %2578 }
0x1a3e   :  { %3291 = vrsqrt.f32 %v2557_v51 }
0x1a47   :  { %v3290_v42 = vpop.eup %3289 }
0x1a48   :  { %v3292_v62 = vpop.eup %3291  ;;  %v2562_v63 = vmul.f32 %v3290_v42, %v2538_v2 }
0x1a49   :  { %v2561_v55 = vmul.f32 %v3292_v62, %v2537_v33 }
0x1a4a   :  { %v2572_v5 = vmul.f32 %v2569_v44, %v2562_v63 }
0x1a4b   :  { %v2571_v7 = vmul.f32 %v2569_v44, %v2561_v55  ;;  %v1661_v55 = vsub.s32 5, %v3409_v26 }
0x1a4c   :  { %v2582_v9 = vadd.f32 %v2579_v3, %v2572_v5  ;;  %v2816_v5 = vrot.slane %v3762_v12, %v3501_v56 }
0x1a4d   :  { %v2581_v11 = vadd.f32 %v2579_v3, %v2571_v7  ;;  %v2826_v3 = vrot.slane %v3762_v12, %v1661_v55 }
0x1a4e   :  { %2593 = vrot.lane.b32.xlu0 %v2582_v9, %s3305_s16 }
0x1a4f   :  { %2591 = vrot.lane.b32.xlu1 %v2581_v11, %s3305_s16 }
0x1ac0   :  { %v2594_v15 = vpop.permute.xlu0 %2593 }
0x1ac1   :  { %v2592_v13 = vpop.permute.xlu1 %2591 }
0x1ac2   :  { %3142 = vmatprep.mubr.msk.f32.mxu1 %vm170_vm5, %v2592_v13 }
0x1ac3   :  { %3143 = vmatmul.mubr.msk.f32.vlgmr.msra.gmra.mrb[24].mxu1 %vm170_vm5, %v2594_v15 }
0x1b96   :  { %v3144_v6 = vpop.f32.mrb[24].mxu1 }
0x1b97   :  { %v2671_v19 = vadd.f32 %v3144_v6, %v2890_v4  ;;  %v2665_v20 = vpop.f32.mrb[25].mxu1 }
0x1b98   :  { %v2666_v21 = vadd.f32 %v2890_v4, %v2665_v20 }
0x1b99   :  { %v2675_v24 = vmax.f32 %v2671_v19, 0.0 }
0x1b9a   :  { %v2674_v27 = vmax.f32 %v2666_v21, 0.0 }
0x1b9c   :  { %3161 = vmatprep.mubr.msk.f32.mxu0 %vm1543_vm12, %v2674_v27  ;;  %v1656_v27 = vrot.slane %v3601_v31, %v3501_v56 }
0x1b9d   :  { %3162 = vmatmul.mubr.msk.f32.vlgmr.msra.gmra.mrb[26].mxu0 %vm1543_vm12, %v2675_v24 }
0x1c70   :  { %v3163_v29 = vpop.f32.mrb[26].mxu0 }
0x1c71   :  { %v2758_v30 = vadd.f32 %v3163_v29, %v2679_v25  ;;  %v2752_v32 = vpop.f32.mrb[27].mxu0 }
0x1c72   :  { %v2753_v28 = vadd.f32 %v2752_v32, %v2679_v25  ;;  %v1662_v32 = vrot.slane %v3601_v31, %v1661_v55 }
0x1c73   :  { %2765 = vrot.lane.b32.xlu0 %v2758_v30, %s3303_s3 }
0x1c74   :  { %2763 = vrot.lane.b32.xlu1 %v2753_v28, %s3303_s3 }
0x1ce5   :  { %v2766_v2 = vpop.permute.xlu0 %2765 }
0x1ce6   :  { %v2770_v33 = vadd.f32 %v2766_v2, %v2582_v9  ;;  %v2764_v34 = vpop.permute.xlu1 %2763 }
0x1ce7   :  { %v2769_v1 = vadd.f32 %v2764_v34, %v2581_v11 }
0x1ce8   :  { %2775 = vrot.lane.b32.xlu0 %v2770_v33, %s3305_s16 }
0x1ce9   :  { %2773 = vrot.lane.b32.xlu1 %v2769_v1, %s3305_s16 }
0x1d5a   :  { %v2776_v39 = vpop.permute.xlu0 %2775 }
0x1d5b   :  { %v2774_v40 = vpop.permute.xlu1 %2773  ;;  %v2782_v41 = vsel %vm170_vm5, %v2776_v39, 0.0 }
0x1d5c   :  { %2783 = vadd.xlane.f32.xlu0 %v2782_v41  ;;  %v2779_v43 = vsel %vm170_vm5, %v2774_v40, 0.0 }
0x1d5d   :  { %2780 = vadd.xlane.f32.xlu1 %v2779_v43 }
0x1d60   :  { %1628 = vadd.xlane.f32.xlu0 %v1627_v46 }
0x1d61   :  { %1631 = vadd.xlane.f32.xlu1 %v1630_v36 }
0x1de9   :  { %v2784_v48 = vpop.xlane.xlu0 %2783 }
0x1dea   :  { %v2786_v47 = vmul.f32 0.0625, %v2784_v48  ;;  %v2781_v14 = vpop.xlane.xlu1 %2780 }
0x1deb   :  { %v2785_v49 = vmul.f32 0.0625, %v2781_v14 }
0x1dec   :  { %v2788_v50 = vsub.f32 %v2770_v33, %v2786_v47 }
0x1ded   :  { %v2787_v10 = vsub.f32 %v2769_v1, %v2785_v49  ;;  %v1629_v53 = vpop.xlane.xlu0 %1628 }
0x1dee   :  { %v2790_v51 = vmul.f32 %v2788_v50, %v2788_v50  ;;  %v1632_v23 = vpop.xlane.xlu1 %1631  ;;  %v1633_v54 = vmul.f32 0.0625, %v1629_v53 }
0x1def   :  { %v2789_v22 = vmul.f32 %v2787_v10, %v2787_v10  ;;  %v1634_v52 = vmul.f32 0.0625, %v1632_v23 }
0x1df0   :  { %2795 = vrot.lane.b32.xlu1 %v2790_v51, %s3305_s16  ;;  %v1635_v58 = vsub.f32 %v1625_v8, %v1633_v54 }
0x1df1   :  { %2793 = vrot.lane.b32.xlu0 %v2789_v22, %s3305_s16  ;;  %v1636_v57 = vsub.f32 %v1626_v45, %v1634_v52 }
0x1df2   :  { %v1637_v61 = vmul.f32 %v1635_v58, %v1635_v58 }
0x1df3   :  { %v1638_v59 = vmul.f32 %v1636_v57, %v1636_v57 }
0x1df4   :  { %v1639_v42 = vsel %vm170_vm5, %v1637_v61, 0.0 }
0x1df5   :  { %v1642_v60 = vsel %vm170_vm5, %v1638_v59, 0.0 }
0x1e10   :  { %1643 = vadd.xlane.f32.xlu0 %v1642_v60 }
0x1e14   :  { %1640 = vadd.xlane.f32.xlu1 %v1639_v42 }
0x1e62   :  { %v2796_v44 = vpop.permute.xlu1 %2795 }
0x1e63   :  { %v2794_v62 = vpop.permute.xlu0 %2793  ;;  %v2802_v63 = vsel %vm170_vm5, %v2796_v44, 0.0 }
0x1e64   :  { %v2799_v0 = vsel %vm170_vm5, %v2794_v62, 0.0  ;;  %2803 = vadd.xlane.f32.xlu1 %v2802_v63 }
0x1e65   :  { %2800 = vadd.xlane.f32.xlu0 %v2799_v0 }
0x1e75   :  { %2828 = vrot.lane.b32.xlu1 %v2826_v3, %s3303_s3 }
0x1e7b   :  { %2818 = vrot.lane.b32.xlu0 %v2816_v5, %s3303_s3 }
0x1e9d   :  { %v1644_v7 = vpop.xlane.xlu0 %1643 }
0x1e9e   :  { %v1646_v11 = vmul.f32 0.0625, %v1644_v7 }
0x1ea0   :  { %v1648_v15 = vadd.f32 1e-05, %v1646_v11 }
0x1ea1   :  { %v1641_v9 = vpop.xlane.xlu1 %1640 }
0x1ea2   :  { %v1645_v13 = vmul.f32 0.0625, %v1641_v9  ;;  %3293 = vrsqrt.f32 %v1648_v15 }
0x1ea4   :  { %v1647_v16 = vadd.f32 1e-05, %v1645_v13 }
0x1ea6   :  { %3295 = vrsqrt.f32 %v1647_v16 }
0x1eac   :  { %v3294_v20 = vpop.eup %3293 }
0x1ead   :  { %v1652_v21 = vmul.f32 %v3294_v20, %v1636_v57 }
0x1eaf   :  { %v1658_v2 = vmul.f32 %v1656_v27, %v1652_v21 }
0x1eb0   :  { %v3296_v12 = vpop.eup %3295 }
0x1eb1   :  { %v1651_v24 = vmul.f32 %v3296_v12, %v1635_v58  ;;  %v1664_v38 = vadd.f32 %v1662_v32, %v1658_v2 }
0x1eb3   :  { %v1657_v34 = vmul.f32 %v1656_v27, %v1651_v24 }
0x1eb5   :  { %v1663_v40 = vadd.f32 %v1662_v32, %v1657_v34 }
0x1ef1   :  { %v2804_v17 = vpop.xlane.xlu1 %2803 }
0x1ef2   :  { %v2806_v18 = vmul.f32 0.0625, %v2804_v17  ;;  %v2801_v26 = vpop.xlane.xlu0 %2800 }
0x1ef3   :  { %v2805_v4 = vmul.f32 0.0625, %v2801_v26 }
0x1ef4   :  { %v2808_v6 = vadd.f32 1e-05, %v2806_v18 }
0x1ef5   :  { %v2807_v19 = vadd.f32 1e-05, %v2805_v4  ;;  %v2829_v1 = vpop.permute.xlu1 %2828 }
0x1ef6   :  { %3297 = vrsqrt.f32 %v2808_v6  ;;  %v2819_v29 = vpop.permute.xlu0 %2818 }
0x1ef7   :  { %3299 = vrsqrt.f32 %v2807_v19 }
0x1f00   :  { %v3298_v25 = vpop.eup %3297 }
0x1f01   :  { %v3300_v30 = vpop.eup %3299  ;;  %v2812_v28 = vmul.f32 %v3298_v25, %v2788_v50 }
0x1f02   :  { %v2811_v33 = vmul.f32 %v3300_v30, %v2787_v10 }
0x1f03   :  { %v2822_v35 = vmul.f32 %v2819_v29, %v2812_v28 }
0x1f04   :  { %v2821_v37 = vmul.f32 %v2819_v29, %v2811_v33 }
0x1f05   :  { %v2832_v39 = vadd.f32 %v2829_v1, %v2822_v35 }
0x1f06   :  { %v2831_v41 = vadd.f32 %v2829_v1, %v2821_v37 }
0x1f07   :  { %v2834_v8 = vsel %vm170_vm5, %v1664_v38, %v2832_v39 }
0x1f08   :  { %v2833_v56 = vsel %vm170_vm5, %v1663_v40, %v2831_v41  ;;  %2836 = vst.msk [vmem:[%s3877_s13 + $0x8] sm:$0xff] %vm370_vm9, %v2834_v8 }
0x1f09   :  { %2835 = vst.msk [vmem:[%s3877_s13] sm:$0xff] %vm370_vm9, %v2833_v56 }

</bundles_post_ra>
